<compile_context>
chip_gen: v6e
topology: v6e:2x2x1
jax: 0.10.0
libtpu: 0.0.40
codegen_flags: <defaults>
</compile_context>

<pallas_src>
import functools

import jax
import jax.numpy as jnp
from jax.experimental import pallas as pl
from jax.experimental.pallas import tpu as pltpu

LEVELS = 3
FILTERS_PER_LEVEL = 6
KH = KW = 8
LANES = 128
SUBLANES = 8


def _round_up(x, m):
    return (x + m - 1) // m * m


def _pyramid_kernel(f_ref, *refs, levels):
    """Fused 8x8 'valid' conv for all pyramid levels on lane-packed slabs.

    f_ref:           SMEM (levels*64,)        flattened filter bank (scalars).
    refs[:levels]:   VMEM (hout_l+8, wp_l)    zero-padded packed level inputs.
    refs[levels:]:   VMEM (hout_l,   wp_l)    full lane-dense output slabs.
    """
    in_refs = refs[:levels]
    out_refs = refs[levels:]
    for level in range(levels):
        x_ref = in_refs[level]
        o_ref = out_refs[level]
        hout, wp = o_ref.shape
        base = level * KH * KW

        # kh = 0 taps seed one full-width accumulator per kw: 8 independent
        # mul/add chains give plenty of ILP for the 4 VALU slots while keeping
        # vreg pressure ~40 regs at level 0.
        row = x_ref[0:hout, :]
        accs = [row * f_ref[base + kw] for kw in range(KW)]
        for kh in range(1, KH):
            # Sublane-offset row slab (7 per level); reused by all 8 kw chains.
            row = x_ref[kh:kh + hout, :]
            for kw in range(KW):
                accs[kw] = accs[kw] + row * f_ref[base + kh * KW + kw]

        # Hoisted lane shifts: 7 XLU lane rotations per level (was 64 per-tap
        # shifted loads).  roll(a, wp-kw, axis=1)[:, j] == a[:, (j+kw) % wp];
        # the wrap only lands in the last image's junk columns / zero-pad
        # lanes, which the wrapper discards.
        shifted = [accs[0]] + [
            pltpu.roll(accs[kw], shift=wp - kw, axis=1) for kw in range(1, KW)
        ]
        result = (((shifted[0] + shifted[1]) + (shifted[2] + shifted[3]))
                  + ((shifted[4] + shifted[5]) + (shifted[6] + shifted[7])))
        o_ref[...] = result.astype(o_ref.dtype)


def _fused_pyramid_call(f_flat, packed_levels, out_shapes):
    levels = len(packed_levels)
    kernel = functools.partial(_pyramid_kernel, levels=levels)
    return pl.pallas_call(
        kernel,
        out_shape=tuple(
            jax.ShapeDtypeStruct(s, jnp.float32) for s in out_shapes),
        in_specs=[pl.BlockSpec(memory_space=pltpu.MemorySpace.SMEM)]
        + [pl.BlockSpec(memory_space=pltpu.MemorySpace.VMEM)] * levels,
        out_specs=tuple(
            pl.BlockSpec(memory_space=pltpu.MemorySpace.VMEM)
            for _ in range(levels)),
    )(f_flat, *packed_levels)


def complex_steerable_pyramid(x, filters, levels=LEVELS):
    """Mirrors ComplexSteerablePyramid.forward.

    x:       (N, 1, H, W) float32
    filters: (filters_per_level, 1, 8, 8) float32
    Returns (pyramid_real, pyramid_imag): lists of (N, 1, oh_l, ow_l) arrays.
    """
    n, c, h, w = x.shape
    assert c == 1, "reference conv2d weight is (1, 1, 8, 8) -> single channel"

    xs = x[:, 0]  # (N, H, W)
    packed_levels, out_shapes, meta = [], [], []
    for _ in range(levels):
        hl, wl = xs.shape[1], xs.shape[2]
        assert hl >= KH and wl >= KW, "level too small for a valid 8x8 conv"
        oh, ow = hl - KH + 1, wl - KW + 1
        hout = _round_up(oh, SUBLANES)      # sublane-aligned output rows
        wp = _round_up(n * wl, LANES)       # lane-dense packed width
        hin = hout + KH                     # room for the 7-row tap halo
        # Pack images side-by-side along lanes: packed[r, i*wl + c] = xs[i,r,c]
        packed = jnp.transpose(xs, (1, 0, 2)).reshape(hl, n * wl)
        packed = jnp.pad(packed, ((0, hin - hl), (0, wp - n * wl)))
        packed_levels.append(packed)
        out_shapes.append((hout, wp))
        meta.append((hl, wl, oh, ow))
        # F.interpolate(scale_factor=0.5, mode='nearest') == every 2nd pixel.
        # TODO(synk): derive the level-1/2 slabs from the level-0 slab inside
        # the kernel (even-row/even-lane selection) to drop two input DMAs.
        xs = xs[:, ::2, ::2]

    # 1-D SMEM filter bank: f32[levels*64], index = level*64 + kh*8 + kw.
    f_flat = filters[:levels, 0].reshape(levels * KH * KW)

    outs = _fused_pyramid_call(f_flat, packed_levels, out_shapes)

    pyramid_real, pyramid_imag = [], []
    for level, (hl, wl, oh, ow) in enumerate(meta):
        slab = outs[level]  # (hout, wp) full lane-dense slab
        per_img = slab[:oh, :n * wl].reshape(oh, n, wl)[:, :, :ow]
        out = jnp.transpose(per_img, (1, 0, 2))[:, None, :, :]  # (N,1,oh,ow)
        # The reference applies the *same* filter (self.filters[level]) to the
        # real and imaginary branches, so both outputs are identical.
        pyramid_real.append(out)
        pyramid_imag.append(out)
    return pyramid_real, pyramid_imag


if __name__ == "__main__":
    key = jax.random.PRNGKey(0)
    k_filters, k_x = jax.random.split(key)

    # Same parameter shapes as the nn.Module (only filters[0..2, 0] are used,
    # faithful to the reference forward).
    filters = jax.random.normal(
        k_filters, (FILTERS_PER_LEVEL, 1, KH, KW), dtype=jnp.float32)
    # N=4, 32x32 spatial: packed level-0 slab is 4*32 = 128 lanes (one full
    # vreg row) and the 8x8 valid conv stays defined after 2 downsamples.
    x = jax.random.normal(k_x, (4, 1, 32, 32), dtype=jnp.float32)

    fwd = jax.jit(complex_steerable_pyramid)
    pyr_real, pyr_imag = fwd(x, filters)
    jax.block_until_ready((pyr_real, pyr_imag))

    # Correctness check against XLA's conv (same semantics as
    # F.conv2d(..., stride=1, padding=0)) plus nearest 0.5x downsampling.
    xc = x
    for level in range(LEVELS):
        ref = jax.lax.conv_general_dilated(
            xc, filters[level][None],
            window_strides=(1, 1), padding="VALID",
            dimension_numbers=("NCHW", "OIHW", "NCHW"))
        assert pyr_real[level].shape == ref.shape, (pyr_real[level].shape, ref.shape)
        assert jnp.allclose(pyr_real[level], ref, atol=2e-4, rtol=2e-4)
        assert jnp.allclose(pyr_imag[level], ref, atol=2e-4, rtol=2e-4)
        xc = xc[:, :, ::2, ::2]

    print("KERNEL_OK")
</pallas_src>

<mosaic_0001>
module attributes {stable_mosaic.version = 11 : i64} {
  func.func @_pyramid_kernel(%arg0: memref<192xf32, #tpu.memory_space<smem>>, %arg1: memref<40x128xf32, #tpu.memory_space<vmem>>, %arg2: memref<24x128xf32, #tpu.memory_space<vmem>>, %arg3: memref<16x128xf32, #tpu.memory_space<vmem>>, %arg4: memref<32x128xf32, #tpu.memory_space<vmem>>, %arg5: memref<16x128xf32, #tpu.memory_space<vmem>>, %arg6: memref<8x128xf32, #tpu.memory_space<vmem>>) attributes {dimension_semantics = [], scalar_prefetch = 0 : i64, scratch_operands = 0 : i64, tpu.core_type = #tpu.core_type<tc>} {
    %c0 = arith.constant 0 : index
    %c0_0 = arith.constant 0 : index
    %0 = vector.load %arg1[%c0, %c0_0] : memref<40x128xf32, #tpu.memory_space<vmem>>, vector<32x128xf32>
    %c0_1 = arith.constant 0 : index
    %1 = memref.load %arg0[%c0_1] : memref<192xf32, #tpu.memory_space<smem>>
    %2 = vector.broadcast %1 : f32 to vector<32x128xf32>
    %3 = arith.mulf %0, %2 : vector<32x128xf32>
    %c1 = arith.constant 1 : index
    %4 = memref.load %arg0[%c1] : memref<192xf32, #tpu.memory_space<smem>>
    %5 = vector.broadcast %4 : f32 to vector<32x128xf32>
    %6 = arith.mulf %0, %5 : vector<32x128xf32>
    %c2 = arith.constant 2 : index
    %7 = memref.load %arg0[%c2] : memref<192xf32, #tpu.memory_space<smem>>
    %8 = vector.broadcast %7 : f32 to vector<32x128xf32>
    %9 = arith.mulf %0, %8 : vector<32x128xf32>
    %c3 = arith.constant 3 : index
    %10 = memref.load %arg0[%c3] : memref<192xf32, #tpu.memory_space<smem>>
    %11 = vector.broadcast %10 : f32 to vector<32x128xf32>
    %12 = arith.mulf %0, %11 : vector<32x128xf32>
    %c4 = arith.constant 4 : index
    %13 = memref.load %arg0[%c4] : memref<192xf32, #tpu.memory_space<smem>>
    %14 = vector.broadcast %13 : f32 to vector<32x128xf32>
    %15 = arith.mulf %0, %14 : vector<32x128xf32>
    %c5 = arith.constant 5 : index
    %16 = memref.load %arg0[%c5] : memref<192xf32, #tpu.memory_space<smem>>
    %17 = vector.broadcast %16 : f32 to vector<32x128xf32>
    %18 = arith.mulf %0, %17 : vector<32x128xf32>
    %c6 = arith.constant 6 : index
    %19 = memref.load %arg0[%c6] : memref<192xf32, #tpu.memory_space<smem>>
    %20 = vector.broadcast %19 : f32 to vector<32x128xf32>
    %21 = arith.mulf %0, %20 : vector<32x128xf32>
    %c7 = arith.constant 7 : index
    %22 = memref.load %arg0[%c7] : memref<192xf32, #tpu.memory_space<smem>>
    %23 = vector.broadcast %22 : f32 to vector<32x128xf32>
    %24 = arith.mulf %0, %23 : vector<32x128xf32>
    %c1_2 = arith.constant 1 : index
    %c0_3 = arith.constant 0 : index
    %25 = vector.load %arg1[%c1_2, %c0_3] : memref<40x128xf32, #tpu.memory_space<vmem>>, vector<32x128xf32>
    %c8 = arith.constant 8 : index
    %26 = memref.load %arg0[%c8] : memref<192xf32, #tpu.memory_space<smem>>
    %27 = vector.broadcast %26 : f32 to vector<32x128xf32>
    %28 = arith.mulf %25, %27 : vector<32x128xf32>
    %29 = arith.addf %3, %28 : vector<32x128xf32>
    %c9 = arith.constant 9 : index
    %30 = memref.load %arg0[%c9] : memref<192xf32, #tpu.memory_space<smem>>
    %31 = vector.broadcast %30 : f32 to vector<32x128xf32>
    %32 = arith.mulf %25, %31 : vector<32x128xf32>
    %33 = arith.addf %6, %32 : vector<32x128xf32>
    %c10 = arith.constant 10 : index
    %34 = memref.load %arg0[%c10] : memref<192xf32, #tpu.memory_space<smem>>
    %35 = vector.broadcast %34 : f32 to vector<32x128xf32>
    %36 = arith.mulf %25, %35 : vector<32x128xf32>
    %37 = arith.addf %9, %36 : vector<32x128xf32>
    %c11 = arith.constant 11 : index
    %38 = memref.load %arg0[%c11] : memref<192xf32, #tpu.memory_space<smem>>
    %39 = vector.broadcast %38 : f32 to vector<32x128xf32>
    %40 = arith.mulf %25, %39 : vector<32x128xf32>
    %41 = arith.addf %12, %40 : vector<32x128xf32>
    %c12 = arith.constant 12 : index
    %42 = memref.load %arg0[%c12] : memref<192xf32, #tpu.memory_space<smem>>
    %43 = vector.broadcast %42 : f32 to vector<32x128xf32>
    %44 = arith.mulf %25, %43 : vector<32x128xf32>
    %45 = arith.addf %15, %44 : vector<32x128xf32>
    %c13 = arith.constant 13 : index
    %46 = memref.load %arg0[%c13] : memref<192xf32, #tpu.memory_space<smem>>
    %47 = vector.broadcast %46 : f32 to vector<32x128xf32>
    %48 = arith.mulf %25, %47 : vector<32x128xf32>
    %49 = arith.addf %18, %48 : vector<32x128xf32>
    %c14 = arith.constant 14 : index
    %50 = memref.load %arg0[%c14] : memref<192xf32, #tpu.memory_space<smem>>
    %51 = vector.broadcast %50 : f32 to vector<32x128xf32>
    %52 = arith.mulf %25, %51 : vector<32x128xf32>
    %53 = arith.addf %21, %52 : vector<32x128xf32>
    %c15 = arith.constant 15 : index
    %54 = memref.load %arg0[%c15] : memref<192xf32, #tpu.memory_space<smem>>
    %55 = vector.broadcast %54 : f32 to vector<32x128xf32>
    %56 = arith.mulf %25, %55 : vector<32x128xf32>
    %57 = arith.addf %24, %56 : vector<32x128xf32>
    %c2_4 = arith.constant 2 : index
    %c0_5 = arith.constant 0 : index
    %58 = vector.load %arg1[%c2_4, %c0_5] : memref<40x128xf32, #tpu.memory_space<vmem>>, vector<32x128xf32>
    %c16 = arith.constant 16 : index
    %59 = memref.load %arg0[%c16] : memref<192xf32, #tpu.memory_space<smem>>
    %60 = vector.broadcast %59 : f32 to vector<32x128xf32>
    %61 = arith.mulf %58, %60 : vector<32x128xf32>
    %62 = arith.addf %29, %61 : vector<32x128xf32>
    %c17 = arith.constant 17 : index
    %63 = memref.load %arg0[%c17] : memref<192xf32, #tpu.memory_space<smem>>
    %64 = vector.broadcast %63 : f32 to vector<32x128xf32>
    %65 = arith.mulf %58, %64 : vector<32x128xf32>
    %66 = arith.addf %33, %65 : vector<32x128xf32>
    %c18 = arith.constant 18 : index
    %67 = memref.load %arg0[%c18] : memref<192xf32, #tpu.memory_space<smem>>
    %68 = vector.broadcast %67 : f32 to vector<32x128xf32>
    %69 = arith.mulf %58, %68 : vector<32x128xf32>
    %70 = arith.addf %37, %69 : vector<32x128xf32>
    %c19 = arith.constant 19 : index
    %71 = memref.load %arg0[%c19] : memref<192xf32, #tpu.memory_space<smem>>
    %72 = vector.broadcast %71 : f32 to vector<32x128xf32>
    %73 = arith.mulf %58, %72 : vector<32x128xf32>
    %74 = arith.addf %41, %73 : vector<32x128xf32>
    %c20 = arith.constant 20 : index
    %75 = memref.load %arg0[%c20] : memref<192xf32, #tpu.memory_space<smem>>
    %76 = vector.broadcast %75 : f32 to vector<32x128xf32>
    %77 = arith.mulf %58, %76 : vector<32x128xf32>
    %78 = arith.addf %45, %77 : vector<32x128xf32>
    %c21 = arith.constant 21 : index
    %79 = memref.load %arg0[%c21] : memref<192xf32, #tpu.memory_space<smem>>
    %80 = vector.broadcast %79 : f32 to vector<32x128xf32>
    %81 = arith.mulf %58, %80 : vector<32x128xf32>
    %82 = arith.addf %49, %81 : vector<32x128xf32>
    %c22 = arith.constant 22 : index
    %83 = memref.load %arg0[%c22] : memref<192xf32, #tpu.memory_space<smem>>
    %84 = vector.broadcast %83 : f32 to vector<32x128xf32>
    %85 = arith.mulf %58, %84 : vector<32x128xf32>
    %86 = arith.addf %53, %85 : vector<32x128xf32>
    %c23 = arith.constant 23 : index
    %87 = memref.load %arg0[%c23] : memref<192xf32, #tpu.memory_space<smem>>
    %88 = vector.broadcast %87 : f32 to vector<32x128xf32>
    %89 = arith.mulf %58, %88 : vector<32x128xf32>
    %90 = arith.addf %57, %89 : vector<32x128xf32>
    %c3_6 = arith.constant 3 : index
    %c0_7 = arith.constant 0 : index
    %91 = vector.load %arg1[%c3_6, %c0_7] : memref<40x128xf32, #tpu.memory_space<vmem>>, vector<32x128xf32>
    %c24 = arith.constant 24 : index
    %92 = memref.load %arg0[%c24] : memref<192xf32, #tpu.memory_space<smem>>
    %93 = vector.broadcast %92 : f32 to vector<32x128xf32>
    %94 = arith.mulf %91, %93 : vector<32x128xf32>
    %95 = arith.addf %62, %94 : vector<32x128xf32>
    %c25 = arith.constant 25 : index
    %96 = memref.load %arg0[%c25] : memref<192xf32, #tpu.memory_space<smem>>
    %97 = vector.broadcast %96 : f32 to vector<32x128xf32>
    %98 = arith.mulf %91, %97 : vector<32x128xf32>
    %99 = arith.addf %66, %98 : vector<32x128xf32>
    %c26 = arith.constant 26 : index
    %100 = memref.load %arg0[%c26] : memref<192xf32, #tpu.memory_space<smem>>
    %101 = vector.broadcast %100 : f32 to vector<32x128xf32>
    %102 = arith.mulf %91, %101 : vector<32x128xf32>
    %103 = arith.addf %70, %102 : vector<32x128xf32>
    %c27 = arith.constant 27 : index
    %104 = memref.load %arg0[%c27] : memref<192xf32, #tpu.memory_space<smem>>
    %105 = vector.broadcast %104 : f32 to vector<32x128xf32>
    %106 = arith.mulf %91, %105 : vector<32x128xf32>
    %107 = arith.addf %74, %106 : vector<32x128xf32>
    %c28 = arith.constant 28 : index
    %108 = memref.load %arg0[%c28] : memref<192xf32, #tpu.memory_space<smem>>
    %109 = vector.broadcast %108 : f32 to vector<32x128xf32>
    %110 = arith.mulf %91, %109 : vector<32x128xf32>
    %111 = arith.addf %78, %110 : vector<32x128xf32>
    %c29 = arith.constant 29 : index
    %112 = memref.load %arg0[%c29] : memref<192xf32, #tpu.memory_space<smem>>
    %113 = vector.broadcast %112 : f32 to vector<32x128xf32>
    %114 = arith.mulf %91, %113 : vector<32x128xf32>
    %115 = arith.addf %82, %114 : vector<32x128xf32>
    %c30 = arith.constant 30 : index
    %116 = memref.load %arg0[%c30] : memref<192xf32, #tpu.memory_space<smem>>
    %117 = vector.broadcast %116 : f32 to vector<32x128xf32>
    %118 = arith.mulf %91, %117 : vector<32x128xf32>
    %119 = arith.addf %86, %118 : vector<32x128xf32>
    %c31 = arith.constant 31 : index
    %120 = memref.load %arg0[%c31] : memref<192xf32, #tpu.memory_space<smem>>
    %121 = vector.broadcast %120 : f32 to vector<32x128xf32>
    %122 = arith.mulf %91, %121 : vector<32x128xf32>
    %123 = arith.addf %90, %122 : vector<32x128xf32>
    %c4_8 = arith.constant 4 : index
    %c0_9 = arith.constant 0 : index
    %124 = vector.load %arg1[%c4_8, %c0_9] : memref<40x128xf32, #tpu.memory_space<vmem>>, vector<32x128xf32>
    %c32 = arith.constant 32 : index
    %125 = memref.load %arg0[%c32] : memref<192xf32, #tpu.memory_space<smem>>
    %126 = vector.broadcast %125 : f32 to vector<32x128xf32>
    %127 = arith.mulf %124, %126 : vector<32x128xf32>
    %128 = arith.addf %95, %127 : vector<32x128xf32>
    %c33 = arith.constant 33 : index
    %129 = memref.load %arg0[%c33] : memref<192xf32, #tpu.memory_space<smem>>
    %130 = vector.broadcast %129 : f32 to vector<32x128xf32>
    %131 = arith.mulf %124, %130 : vector<32x128xf32>
    %132 = arith.addf %99, %131 : vector<32x128xf32>
    %c34 = arith.constant 34 : index
    %133 = memref.load %arg0[%c34] : memref<192xf32, #tpu.memory_space<smem>>
    %134 = vector.broadcast %133 : f32 to vector<32x128xf32>
    %135 = arith.mulf %124, %134 : vector<32x128xf32>
    %136 = arith.addf %103, %135 : vector<32x128xf32>
    %c35 = arith.constant 35 : index
    %137 = memref.load %arg0[%c35] : memref<192xf32, #tpu.memory_space<smem>>
    %138 = vector.broadcast %137 : f32 to vector<32x128xf32>
    %139 = arith.mulf %124, %138 : vector<32x128xf32>
    %140 = arith.addf %107, %139 : vector<32x128xf32>
    %c36 = arith.constant 36 : index
    %141 = memref.load %arg0[%c36] : memref<192xf32, #tpu.memory_space<smem>>
    %142 = vector.broadcast %141 : f32 to vector<32x128xf32>
    %143 = arith.mulf %124, %142 : vector<32x128xf32>
    %144 = arith.addf %111, %143 : vector<32x128xf32>
    %c37 = arith.constant 37 : index
    %145 = memref.load %arg0[%c37] : memref<192xf32, #tpu.memory_space<smem>>
    %146 = vector.broadcast %145 : f32 to vector<32x128xf32>
    %147 = arith.mulf %124, %146 : vector<32x128xf32>
    %148 = arith.addf %115, %147 : vector<32x128xf32>
    %c38 = arith.constant 38 : index
    %149 = memref.load %arg0[%c38] : memref<192xf32, #tpu.memory_space<smem>>
    %150 = vector.broadcast %149 : f32 to vector<32x128xf32>
    %151 = arith.mulf %124, %150 : vector<32x128xf32>
    %152 = arith.addf %119, %151 : vector<32x128xf32>
    %c39 = arith.constant 39 : index
    %153 = memref.load %arg0[%c39] : memref<192xf32, #tpu.memory_space<smem>>
    %154 = vector.broadcast %153 : f32 to vector<32x128xf32>
    %155 = arith.mulf %124, %154 : vector<32x128xf32>
    %156 = arith.addf %123, %155 : vector<32x128xf32>
    %c5_10 = arith.constant 5 : index
    %c0_11 = arith.constant 0 : index
    %157 = vector.load %arg1[%c5_10, %c0_11] : memref<40x128xf32, #tpu.memory_space<vmem>>, vector<32x128xf32>
    %c40 = arith.constant 40 : index
    %158 = memref.load %arg0[%c40] : memref<192xf32, #tpu.memory_space<smem>>
    %159 = vector.broadcast %158 : f32 to vector<32x128xf32>
    %160 = arith.mulf %157, %159 : vector<32x128xf32>
    %161 = arith.addf %128, %160 : vector<32x128xf32>
    %c41 = arith.constant 41 : index
    %162 = memref.load %arg0[%c41] : memref<192xf32, #tpu.memory_space<smem>>
    %163 = vector.broadcast %162 : f32 to vector<32x128xf32>
    %164 = arith.mulf %157, %163 : vector<32x128xf32>
    %165 = arith.addf %132, %164 : vector<32x128xf32>
    %c42 = arith.constant 42 : index
    %166 = memref.load %arg0[%c42] : memref<192xf32, #tpu.memory_space<smem>>
    %167 = vector.broadcast %166 : f32 to vector<32x128xf32>
    %168 = arith.mulf %157, %167 : vector<32x128xf32>
    %169 = arith.addf %136, %168 : vector<32x128xf32>
    %c43 = arith.constant 43 : index
    %170 = memref.load %arg0[%c43] : memref<192xf32, #tpu.memory_space<smem>>
    %171 = vector.broadcast %170 : f32 to vector<32x128xf32>
    %172 = arith.mulf %157, %171 : vector<32x128xf32>
    %173 = arith.addf %140, %172 : vector<32x128xf32>
    %c44 = arith.constant 44 : index
    %174 = memref.load %arg0[%c44] : memref<192xf32, #tpu.memory_space<smem>>
    %175 = vector.broadcast %174 : f32 to vector<32x128xf32>
    %176 = arith.mulf %157, %175 : vector<32x128xf32>
    %177 = arith.addf %144, %176 : vector<32x128xf32>
    %c45 = arith.constant 45 : index
    %178 = memref.load %arg0[%c45] : memref<192xf32, #tpu.memory_space<smem>>
    %179 = vector.broadcast %178 : f32 to vector<32x128xf32>
    %180 = arith.mulf %157, %179 : vector<32x128xf32>
    %181 = arith.addf %148, %180 : vector<32x128xf32>
    %c46 = arith.constant 46 : index
    %182 = memref.load %arg0[%c46] : memref<192xf32, #tpu.memory_space<smem>>
    %183 = vector.broadcast %182 : f32 to vector<32x128xf32>
    %184 = arith.mulf %157, %183 : vector<32x128xf32>
    %185 = arith.addf %152, %184 : vector<32x128xf32>
    %c47 = arith.constant 47 : index
    %186 = memref.load %arg0[%c47] : memref<192xf32, #tpu.memory_space<smem>>
    %187 = vector.broadcast %186 : f32 to vector<32x128xf32>
    %188 = arith.mulf %157, %187 : vector<32x128xf32>
    %189 = arith.addf %156, %188 : vector<32x128xf32>
    %c6_12 = arith.constant 6 : index
    %c0_13 = arith.constant 0 : index
    %190 = vector.load %arg1[%c6_12, %c0_13] : memref<40x128xf32, #tpu.memory_space<vmem>>, vector<32x128xf32>
    %c48 = arith.constant 48 : index
    %191 = memref.load %arg0[%c48] : memref<192xf32, #tpu.memory_space<smem>>
    %192 = vector.broadcast %191 : f32 to vector<32x128xf32>
    %193 = arith.mulf %190, %192 : vector<32x128xf32>
    %194 = arith.addf %161, %193 : vector<32x128xf32>
    %c49 = arith.constant 49 : index
    %195 = memref.load %arg0[%c49] : memref<192xf32, #tpu.memory_space<smem>>
    %196 = vector.broadcast %195 : f32 to vector<32x128xf32>
    %197 = arith.mulf %190, %196 : vector<32x128xf32>
    %198 = arith.addf %165, %197 : vector<32x128xf32>
    %c50 = arith.constant 50 : index
    %199 = memref.load %arg0[%c50] : memref<192xf32, #tpu.memory_space<smem>>
    %200 = vector.broadcast %199 : f32 to vector<32x128xf32>
    %201 = arith.mulf %190, %200 : vector<32x128xf32>
    %202 = arith.addf %169, %201 : vector<32x128xf32>
    %c51 = arith.constant 51 : index
    %203 = memref.load %arg0[%c51] : memref<192xf32, #tpu.memory_space<smem>>
    %204 = vector.broadcast %203 : f32 to vector<32x128xf32>
    %205 = arith.mulf %190, %204 : vector<32x128xf32>
    %206 = arith.addf %173, %205 : vector<32x128xf32>
    %c52 = arith.constant 52 : index
    %207 = memref.load %arg0[%c52] : memref<192xf32, #tpu.memory_space<smem>>
    %208 = vector.broadcast %207 : f32 to vector<32x128xf32>
    %209 = arith.mulf %190, %208 : vector<32x128xf32>
    %210 = arith.addf %177, %209 : vector<32x128xf32>
    %c53 = arith.constant 53 : index
    %211 = memref.load %arg0[%c53] : memref<192xf32, #tpu.memory_space<smem>>
    %212 = vector.broadcast %211 : f32 to vector<32x128xf32>
    %213 = arith.mulf %190, %212 : vector<32x128xf32>
    %214 = arith.addf %181, %213 : vector<32x128xf32>
    %c54 = arith.constant 54 : index
    %215 = memref.load %arg0[%c54] : memref<192xf32, #tpu.memory_space<smem>>
    %216 = vector.broadcast %215 : f32 to vector<32x128xf32>
    %217 = arith.mulf %190, %216 : vector<32x128xf32>
    %218 = arith.addf %185, %217 : vector<32x128xf32>
    %c55 = arith.constant 55 : index
    %219 = memref.load %arg0[%c55] : memref<192xf32, #tpu.memory_space<smem>>
    %220 = vector.broadcast %219 : f32 to vector<32x128xf32>
    %221 = arith.mulf %190, %220 : vector<32x128xf32>
    %222 = arith.addf %189, %221 : vector<32x128xf32>
    %c7_14 = arith.constant 7 : index
    %c0_15 = arith.constant 0 : index
    %223 = vector.load %arg1[%c7_14, %c0_15] : memref<40x128xf32, #tpu.memory_space<vmem>>, vector<32x128xf32>
    %c56 = arith.constant 56 : index
    %224 = memref.load %arg0[%c56] : memref<192xf32, #tpu.memory_space<smem>>
    %225 = vector.broadcast %224 : f32 to vector<32x128xf32>
    %226 = arith.mulf %223, %225 : vector<32x128xf32>
    %227 = arith.addf %194, %226 : vector<32x128xf32>
    %c57 = arith.constant 57 : index
    %228 = memref.load %arg0[%c57] : memref<192xf32, #tpu.memory_space<smem>>
    %229 = vector.broadcast %228 : f32 to vector<32x128xf32>
    %230 = arith.mulf %223, %229 : vector<32x128xf32>
    %231 = arith.addf %198, %230 : vector<32x128xf32>
    %c58 = arith.constant 58 : index
    %232 = memref.load %arg0[%c58] : memref<192xf32, #tpu.memory_space<smem>>
    %233 = vector.broadcast %232 : f32 to vector<32x128xf32>
    %234 = arith.mulf %223, %233 : vector<32x128xf32>
    %235 = arith.addf %202, %234 : vector<32x128xf32>
    %c59 = arith.constant 59 : index
    %236 = memref.load %arg0[%c59] : memref<192xf32, #tpu.memory_space<smem>>
    %237 = vector.broadcast %236 : f32 to vector<32x128xf32>
    %238 = arith.mulf %223, %237 : vector<32x128xf32>
    %239 = arith.addf %206, %238 : vector<32x128xf32>
    %c60 = arith.constant 60 : index
    %240 = memref.load %arg0[%c60] : memref<192xf32, #tpu.memory_space<smem>>
    %241 = vector.broadcast %240 : f32 to vector<32x128xf32>
    %242 = arith.mulf %223, %241 : vector<32x128xf32>
    %243 = arith.addf %210, %242 : vector<32x128xf32>
    %c61 = arith.constant 61 : index
    %244 = memref.load %arg0[%c61] : memref<192xf32, #tpu.memory_space<smem>>
    %245 = vector.broadcast %244 : f32 to vector<32x128xf32>
    %246 = arith.mulf %223, %245 : vector<32x128xf32>
    %247 = arith.addf %214, %246 : vector<32x128xf32>
    %c62 = arith.constant 62 : index
    %248 = memref.load %arg0[%c62] : memref<192xf32, #tpu.memory_space<smem>>
    %249 = vector.broadcast %248 : f32 to vector<32x128xf32>
    %250 = arith.mulf %223, %249 : vector<32x128xf32>
    %251 = arith.addf %218, %250 : vector<32x128xf32>
    %c63 = arith.constant 63 : index
    %252 = memref.load %arg0[%c63] : memref<192xf32, #tpu.memory_space<smem>>
    %253 = vector.broadcast %252 : f32 to vector<32x128xf32>
    %254 = arith.mulf %223, %253 : vector<32x128xf32>
    %255 = arith.addf %222, %254 : vector<32x128xf32>
    %c127_i32 = arith.constant 127 : i32
    %256 = tpu.dynamic_rotate %231 by %c127_i32 dim 1 : vector<32x128xf32>, i32 -> vector<32x128xf32>
    %c126_i32 = arith.constant 126 : i32
    %257 = tpu.dynamic_rotate %235 by %c126_i32 dim 1 : vector<32x128xf32>, i32 -> vector<32x128xf32>
    %c125_i32 = arith.constant 125 : i32
    %258 = tpu.dynamic_rotate %239 by %c125_i32 dim 1 : vector<32x128xf32>, i32 -> vector<32x128xf32>
    %c124_i32 = arith.constant 124 : i32
    %259 = tpu.dynamic_rotate %243 by %c124_i32 dim 1 : vector<32x128xf32>, i32 -> vector<32x128xf32>
    %c123_i32 = arith.constant 123 : i32
    %260 = tpu.dynamic_rotate %247 by %c123_i32 dim 1 : vector<32x128xf32>, i32 -> vector<32x128xf32>
    %c122_i32 = arith.constant 122 : i32
    %261 = tpu.dynamic_rotate %251 by %c122_i32 dim 1 : vector<32x128xf32>, i32 -> vector<32x128xf32>
    %c121_i32 = arith.constant 121 : i32
    %262 = tpu.dynamic_rotate %255 by %c121_i32 dim 1 : vector<32x128xf32>, i32 -> vector<32x128xf32>
    %263 = arith.addf %227, %256 : vector<32x128xf32>
    %264 = arith.addf %257, %258 : vector<32x128xf32>
    %265 = arith.addf %263, %264 : vector<32x128xf32>
    %266 = arith.addf %259, %260 : vector<32x128xf32>
    %267 = arith.addf %261, %262 : vector<32x128xf32>
    %268 = arith.addf %266, %267 : vector<32x128xf32>
    %269 = arith.addf %265, %268 : vector<32x128xf32>
    %c0_16 = arith.constant 0 : index
    %c0_17 = arith.constant 0 : index
    %270 = vector.load %arg4[%c0_16, %c0_17] : memref<32x128xf32, #tpu.memory_space<vmem>>, vector<32x128xf32>
    tpu.vector_store %arg4[%c0_16, %c0_17], %269 {strides = array<i32>} : memref<32x128xf32, #tpu.memory_space<vmem>>, vector<32x128xf32>,
    %c0_18 = arith.constant 0 : index
    %c0_19 = arith.constant 0 : index
    %271 = vector.load %arg2[%c0_18, %c0_19] : memref<24x128xf32, #tpu.memory_space<vmem>>, vector<16x128xf32>
    %c64 = arith.constant 64 : index
    %272 = memref.load %arg0[%c64] : memref<192xf32, #tpu.memory_space<smem>>
    %273 = vector.broadcast %272 : f32 to vector<16x128xf32>
    %274 = arith.mulf %271, %273 : vector<16x128xf32>
    %c65 = arith.constant 65 : index
    %275 = memref.load %arg0[%c65] : memref<192xf32, #tpu.memory_space<smem>>
    %276 = vector.broadcast %275 : f32 to vector<16x128xf32>
    %277 = arith.mulf %271, %276 : vector<16x128xf32>
    %c66 = arith.constant 66 : index
    %278 = memref.load %arg0[%c66] : memref<192xf32, #tpu.memory_space<smem>>
    %279 = vector.broadcast %278 : f32 to vector<16x128xf32>
    %280 = arith.mulf %271, %279 : vector<16x128xf32>
    %c67 = arith.constant 67 : index
    %281 = memref.load %arg0[%c67] : memref<192xf32, #tpu.memory_space<smem>>
    %282 = vector.broadcast %281 : f32 to vector<16x128xf32>
    %283 = arith.mulf %271, %282 : vector<16x128xf32>
    %c68 = arith.constant 68 : index
    %284 = memref.load %arg0[%c68] : memref<192xf32, #tpu.memory_space<smem>>
    %285 = vector.broadcast %284 : f32 to vector<16x128xf32>
    %286 = arith.mulf %271, %285 : vector<16x128xf32>
    %c69 = arith.constant 69 : index
    %287 = memref.load %arg0[%c69] : memref<192xf32, #tpu.memory_space<smem>>
    %288 = vector.broadcast %287 : f32 to vector<16x128xf32>
    %289 = arith.mulf %271, %288 : vector<16x128xf32>
    %c70 = arith.constant 70 : index
    %290 = memref.load %arg0[%c70] : memref<192xf32, #tpu.memory_space<smem>>
    %291 = vector.broadcast %290 : f32 to vector<16x128xf32>
    %292 = arith.mulf %271, %291 : vector<16x128xf32>
    %c71 = arith.constant 71 : index
    %293 = memref.load %arg0[%c71] : memref<192xf32, #tpu.memory_space<smem>>
    %294 = vector.broadcast %293 : f32 to vector<16x128xf32>
    %295 = arith.mulf %271, %294 : vector<16x128xf32>
    %c1_20 = arith.constant 1 : index
    %c0_21 = arith.constant 0 : index
    %296 = vector.load %arg2[%c1_20, %c0_21] : memref<24x128xf32, #tpu.memory_space<vmem>>, vector<16x128xf32>
    %c72 = arith.constant 72 : index
    %297 = memref.load %arg0[%c72] : memref<192xf32, #tpu.memory_space<smem>>
    %298 = vector.broadcast %297 : f32 to vector<16x128xf32>
    %299 = arith.mulf %296, %298 : vector<16x128xf32>
    %300 = arith.addf %274, %299 : vector<16x128xf32>
    %c73 = arith.constant 73 : index
    %301 = memref.load %arg0[%c73] : memref<192xf32, #tpu.memory_space<smem>>
    %302 = vector.broadcast %301 : f32 to vector<16x128xf32>
    %303 = arith.mulf %296, %302 : vector<16x128xf32>
    %304 = arith.addf %277, %303 : vector<16x128xf32>
    %c74 = arith.constant 74 : index
    %305 = memref.load %arg0[%c74] : memref<192xf32, #tpu.memory_space<smem>>
    %306 = vector.broadcast %305 : f32 to vector<16x128xf32>
    %307 = arith.mulf %296, %306 : vector<16x128xf32>
    %308 = arith.addf %280, %307 : vector<16x128xf32>
    %c75 = arith.constant 75 : index
    %309 = memref.load %arg0[%c75] : memref<192xf32, #tpu.memory_space<smem>>
    %310 = vector.broadcast %309 : f32 to vector<16x128xf32>
    %311 = arith.mulf %296, %310 : vector<16x128xf32>
    %312 = arith.addf %283, %311 : vector<16x128xf32>
    %c76 = arith.constant 76 : index
    %313 = memref.load %arg0[%c76] : memref<192xf32, #tpu.memory_space<smem>>
    %314 = vector.broadcast %313 : f32 to vector<16x128xf32>
    %315 = arith.mulf %296, %314 : vector<16x128xf32>
    %316 = arith.addf %286, %315 : vector<16x128xf32>
    %c77 = arith.constant 77 : index
    %317 = memref.load %arg0[%c77] : memref<192xf32, #tpu.memory_space<smem>>
    %318 = vector.broadcast %317 : f32 to vector<16x128xf32>
    %319 = arith.mulf %296, %318 : vector<16x128xf32>
    %320 = arith.addf %289, %319 : vector<16x128xf32>
    %c78 = arith.constant 78 : index
    %321 = memref.load %arg0[%c78] : memref<192xf32, #tpu.memory_space<smem>>
    %322 = vector.broadcast %321 : f32 to vector<16x128xf32>
    %323 = arith.mulf %296, %322 : vector<16x128xf32>
    %324 = arith.addf %292, %323 : vector<16x128xf32>
    %c79 = arith.constant 79 : index
    %325 = memref.load %arg0[%c79] : memref<192xf32, #tpu.memory_space<smem>>
    %326 = vector.broadcast %325 : f32 to vector<16x128xf32>
    %327 = arith.mulf %296, %326 : vector<16x128xf32>
    %328 = arith.addf %295, %327 : vector<16x128xf32>
    %c2_22 = arith.constant 2 : index
    %c0_23 = arith.constant 0 : index
    %329 = vector.load %arg2[%c2_22, %c0_23] : memref<24x128xf32, #tpu.memory_space<vmem>>, vector<16x128xf32>
    %c80 = arith.constant 80 : index
    %330 = memref.load %arg0[%c80] : memref<192xf32, #tpu.memory_space<smem>>
    %331 = vector.broadcast %330 : f32 to vector<16x128xf32>
    %332 = arith.mulf %329, %331 : vector<16x128xf32>
    %333 = arith.addf %300, %332 : vector<16x128xf32>
    %c81 = arith.constant 81 : index
    %334 = memref.load %arg0[%c81] : memref<192xf32, #tpu.memory_space<smem>>
    %335 = vector.broadcast %334 : f32 to vector<16x128xf32>
    %336 = arith.mulf %329, %335 : vector<16x128xf32>
    %337 = arith.addf %304, %336 : vector<16x128xf32>
    %c82 = arith.constant 82 : index
    %338 = memref.load %arg0[%c82] : memref<192xf32, #tpu.memory_space<smem>>
    %339 = vector.broadcast %338 : f32 to vector<16x128xf32>
    %340 = arith.mulf %329, %339 : vector<16x128xf32>
    %341 = arith.addf %308, %340 : vector<16x128xf32>
    %c83 = arith.constant 83 : index
    %342 = memref.load %arg0[%c83] : memref<192xf32, #tpu.memory_space<smem>>
    %343 = vector.broadcast %342 : f32 to vector<16x128xf32>
    %344 = arith.mulf %329, %343 : vector<16x128xf32>
    %345 = arith.addf %312, %344 : vector<16x128xf32>
    %c84 = arith.constant 84 : index
    %346 = memref.load %arg0[%c84] : memref<192xf32, #tpu.memory_space<smem>>
    %347 = vector.broadcast %346 : f32 to vector<16x128xf32>
    %348 = arith.mulf %329, %347 : vector<16x128xf32>
    %349 = arith.addf %316, %348 : vector<16x128xf32>
    %c85 = arith.constant 85 : index
    %350 = memref.load %arg0[%c85] : memref<192xf32, #tpu.memory_space<smem>>
    %351 = vector.broadcast %350 : f32 to vector<16x128xf32>
    %352 = arith.mulf %329, %351 : vector<16x128xf32>
    %353 = arith.addf %320, %352 : vector<16x128xf32>
    %c86 = arith.constant 86 : index
    %354 = memref.load %arg0[%c86] : memref<192xf32, #tpu.memory_space<smem>>
    %355 = vector.broadcast %354 : f32 to vector<16x128xf32>
    %356 = arith.mulf %329, %355 : vector<16x128xf32>
    %357 = arith.addf %324, %356 : vector<16x128xf32>
    %c87 = arith.constant 87 : index
    %358 = memref.load %arg0[%c87] : memref<192xf32, #tpu.memory_space<smem>>
    %359 = vector.broadcast %358 : f32 to vector<16x128xf32>
    %360 = arith.mulf %329, %359 : vector<16x128xf32>
    %361 = arith.addf %328, %360 : vector<16x128xf32>
    %c3_24 = arith.constant 3 : index
    %c0_25 = arith.constant 0 : index
    %362 = vector.load %arg2[%c3_24, %c0_25] : memref<24x128xf32, #tpu.memory_space<vmem>>, vector<16x128xf32>
    %c88 = arith.constant 88 : index
    %363 = memref.load %arg0[%c88] : memref<192xf32, #tpu.memory_space<smem>>
    %364 = vector.broadcast %363 : f32 to vector<16x128xf32>
    %365 = arith.mulf %362, %364 : vector<16x128xf32>
    %366 = arith.addf %333, %365 : vector<16x128xf32>
    %c89 = arith.constant 89 : index
    %367 = memref.load %arg0[%c89] : memref<192xf32, #tpu.memory_space<smem>>
    %368 = vector.broadcast %367 : f32 to vector<16x128xf32>
    %369 = arith.mulf %362, %368 : vector<16x128xf32>
    %370 = arith.addf %337, %369 : vector<16x128xf32>
    %c90 = arith.constant 90 : index
    %371 = memref.load %arg0[%c90] : memref<192xf32, #tpu.memory_space<smem>>
    %372 = vector.broadcast %371 : f32 to vector<16x128xf32>
    %373 = arith.mulf %362, %372 : vector<16x128xf32>
    %374 = arith.addf %341, %373 : vector<16x128xf32>
    %c91 = arith.constant 91 : index
    %375 = memref.load %arg0[%c91] : memref<192xf32, #tpu.memory_space<smem>>
    %376 = vector.broadcast %375 : f32 to vector<16x128xf32>
    %377 = arith.mulf %362, %376 : vector<16x128xf32>
    %378 = arith.addf %345, %377 : vector<16x128xf32>
    %c92 = arith.constant 92 : index
    %379 = memref.load %arg0[%c92] : memref<192xf32, #tpu.memory_space<smem>>
    %380 = vector.broadcast %379 : f32 to vector<16x128xf32>
    %381 = arith.mulf %362, %380 : vector<16x128xf32>
    %382 = arith.addf %349, %381 : vector<16x128xf32>
    %c93 = arith.constant 93 : index
    %383 = memref.load %arg0[%c93] : memref<192xf32, #tpu.memory_space<smem>>
    %384 = vector.broadcast %383 : f32 to vector<16x128xf32>
    %385 = arith.mulf %362, %384 : vector<16x128xf32>
    %386 = arith.addf %353, %385 : vector<16x128xf32>
    %c94 = arith.constant 94 : index
    %387 = memref.load %arg0[%c94] : memref<192xf32, #tpu.memory_space<smem>>
    %388 = vector.broadcast %387 : f32 to vector<16x128xf32>
    %389 = arith.mulf %362, %388 : vector<16x128xf32>
    %390 = arith.addf %357, %389 : vector<16x128xf32>
    %c95 = arith.constant 95 : index
    %391 = memref.load %arg0[%c95] : memref<192xf32, #tpu.memory_space<smem>>
    %392 = vector.broadcast %391 : f32 to vector<16x128xf32>
    %393 = arith.mulf %362, %392 : vector<16x128xf32>
    %394 = arith.addf %361, %393 : vector<16x128xf32>
    %c4_26 = arith.constant 4 : index
    %c0_27 = arith.constant 0 : index
    %395 = vector.load %arg2[%c4_26, %c0_27] : memref<24x128xf32, #tpu.memory_space<vmem>>, vector<16x128xf32>
    %c96 = arith.constant 96 : index
    %396 = memref.load %arg0[%c96] : memref<192xf32, #tpu.memory_space<smem>>
    %397 = vector.broadcast %396 : f32 to vector<16x128xf32>
    %398 = arith.mulf %395, %397 : vector<16x128xf32>
    %399 = arith.addf %366, %398 : vector<16x128xf32>
    %c97 = arith.constant 97 : index
    %400 = memref.load %arg0[%c97] : memref<192xf32, #tpu.memory_space<smem>>
    %401 = vector.broadcast %400 : f32 to vector<16x128xf32>
    %402 = arith.mulf %395, %401 : vector<16x128xf32>
    %403 = arith.addf %370, %402 : vector<16x128xf32>
    %c98 = arith.constant 98 : index
    %404 = memref.load %arg0[%c98] : memref<192xf32, #tpu.memory_space<smem>>
    %405 = vector.broadcast %404 : f32 to vector<16x128xf32>
    %406 = arith.mulf %395, %405 : vector<16x128xf32>
    %407 = arith.addf %374, %406 : vector<16x128xf32>
    %c99 = arith.constant 99 : index
    %408 = memref.load %arg0[%c99] : memref<192xf32, #tpu.memory_space<smem>>
    %409 = vector.broadcast %408 : f32 to vector<16x128xf32>
    %410 = arith.mulf %395, %409 : vector<16x128xf32>
    %411 = arith.addf %378, %410 : vector<16x128xf32>
    %c100 = arith.constant 100 : index
    %412 = memref.load %arg0[%c100] : memref<192xf32, #tpu.memory_space<smem>>
    %413 = vector.broadcast %412 : f32 to vector<16x128xf32>
    %414 = arith.mulf %395, %413 : vector<16x128xf32>
    %415 = arith.addf %382, %414 : vector<16x128xf32>
    %c101 = arith.constant 101 : index
    %416 = memref.load %arg0[%c101] : memref<192xf32, #tpu.memory_space<smem>>
    %417 = vector.broadcast %416 : f32 to vector<16x128xf32>
    %418 = arith.mulf %395, %417 : vector<16x128xf32>
    %419 = arith.addf %386, %418 : vector<16x128xf32>
    %c102 = arith.constant 102 : index
    %420 = memref.load %arg0[%c102] : memref<192xf32, #tpu.memory_space<smem>>
    %421 = vector.broadcast %420 : f32 to vector<16x128xf32>
    %422 = arith.mulf %395, %421 : vector<16x128xf32>
    %423 = arith.addf %390, %422 : vector<16x128xf32>
    %c103 = arith.constant 103 : index
    %424 = memref.load %arg0[%c103] : memref<192xf32, #tpu.memory_space<smem>>
    %425 = vector.broadcast %424 : f32 to vector<16x128xf32>
    %426 = arith.mulf %395, %425 : vector<16x128xf32>
    %427 = arith.addf %394, %426 : vector<16x128xf32>
    %c5_28 = arith.constant 5 : index
    %c0_29 = arith.constant 0 : index
    %428 = vector.load %arg2[%c5_28, %c0_29] : memref<24x128xf32, #tpu.memory_space<vmem>>, vector<16x128xf32>
    %c104 = arith.constant 104 : index
    %429 = memref.load %arg0[%c104] : memref<192xf32, #tpu.memory_space<smem>>
    %430 = vector.broadcast %429 : f32 to vector<16x128xf32>
    %431 = arith.mulf %428, %430 : vector<16x128xf32>
    %432 = arith.addf %399, %431 : vector<16x128xf32>
    %c105 = arith.constant 105 : index
    %433 = memref.load %arg0[%c105] : memref<192xf32, #tpu.memory_space<smem>>
    %434 = vector.broadcast %433 : f32 to vector<16x128xf32>
    %435 = arith.mulf %428, %434 : vector<16x128xf32>
    %436 = arith.addf %403, %435 : vector<16x128xf32>
    %c106 = arith.constant 106 : index
    %437 = memref.load %arg0[%c106] : memref<192xf32, #tpu.memory_space<smem>>
    %438 = vector.broadcast %437 : f32 to vector<16x128xf32>
    %439 = arith.mulf %428, %438 : vector<16x128xf32>
    %440 = arith.addf %407, %439 : vector<16x128xf32>
    %c107 = arith.constant 107 : index
    %441 = memref.load %arg0[%c107] : memref<192xf32, #tpu.memory_space<smem>>
    %442 = vector.broadcast %441 : f32 to vector<16x128xf32>
    %443 = arith.mulf %428, %442 : vector<16x128xf32>
    %444 = arith.addf %411, %443 : vector<16x128xf32>
    %c108 = arith.constant 108 : index
    %445 = memref.load %arg0[%c108] : memref<192xf32, #tpu.memory_space<smem>>
    %446 = vector.broadcast %445 : f32 to vector<16x128xf32>
    %447 = arith.mulf %428, %446 : vector<16x128xf32>
    %448 = arith.addf %415, %447 : vector<16x128xf32>
    %c109 = arith.constant 109 : index
    %449 = memref.load %arg0[%c109] : memref<192xf32, #tpu.memory_space<smem>>
    %450 = vector.broadcast %449 : f32 to vector<16x128xf32>
    %451 = arith.mulf %428, %450 : vector<16x128xf32>
    %452 = arith.addf %419, %451 : vector<16x128xf32>
    %c110 = arith.constant 110 : index
    %453 = memref.load %arg0[%c110] : memref<192xf32, #tpu.memory_space<smem>>
    %454 = vector.broadcast %453 : f32 to vector<16x128xf32>
    %455 = arith.mulf %428, %454 : vector<16x128xf32>
    %456 = arith.addf %423, %455 : vector<16x128xf32>
    %c111 = arith.constant 111 : index
    %457 = memref.load %arg0[%c111] : memref<192xf32, #tpu.memory_space<smem>>
    %458 = vector.broadcast %457 : f32 to vector<16x128xf32>
    %459 = arith.mulf %428, %458 : vector<16x128xf32>
    %460 = arith.addf %427, %459 : vector<16x128xf32>
    %c6_30 = arith.constant 6 : index
    %c0_31 = arith.constant 0 : index
    %461 = vector.load %arg2[%c6_30, %c0_31] : memref<24x128xf32, #tpu.memory_space<vmem>>, vector<16x128xf32>
    %c112 = arith.constant 112 : index
    %462 = memref.load %arg0[%c112] : memref<192xf32, #tpu.memory_space<smem>>
    %463 = vector.broadcast %462 : f32 to vector<16x128xf32>
    %464 = arith.mulf %461, %463 : vector<16x128xf32>
    %465 = arith.addf %432, %464 : vector<16x128xf32>
    %c113 = arith.constant 113 : index
    %466 = memref.load %arg0[%c113] : memref<192xf32, #tpu.memory_space<smem>>
    %467 = vector.broadcast %466 : f32 to vector<16x128xf32>
    %468 = arith.mulf %461, %467 : vector<16x128xf32>
    %469 = arith.addf %436, %468 : vector<16x128xf32>
    %c114 = arith.constant 114 : index
    %470 = memref.load %arg0[%c114] : memref<192xf32, #tpu.memory_space<smem>>
    %471 = vector.broadcast %470 : f32 to vector<16x128xf32>
    %472 = arith.mulf %461, %471 : vector<16x128xf32>
    %473 = arith.addf %440, %472 : vector<16x128xf32>
    %c115 = arith.constant 115 : index
    %474 = memref.load %arg0[%c115] : memref<192xf32, #tpu.memory_space<smem>>
    %475 = vector.broadcast %474 : f32 to vector<16x128xf32>
    %476 = arith.mulf %461, %475 : vector<16x128xf32>
    %477 = arith.addf %444, %476 : vector<16x128xf32>
    %c116 = arith.constant 116 : index
    %478 = memref.load %arg0[%c116] : memref<192xf32, #tpu.memory_space<smem>>
    %479 = vector.broadcast %478 : f32 to vector<16x128xf32>
    %480 = arith.mulf %461, %479 : vector<16x128xf32>
    %481 = arith.addf %448, %480 : vector<16x128xf32>
    %c117 = arith.constant 117 : index
    %482 = memref.load %arg0[%c117] : memref<192xf32, #tpu.memory_space<smem>>
    %483 = vector.broadcast %482 : f32 to vector<16x128xf32>
    %484 = arith.mulf %461, %483 : vector<16x128xf32>
    %485 = arith.addf %452, %484 : vector<16x128xf32>
    %c118 = arith.constant 118 : index
    %486 = memref.load %arg0[%c118] : memref<192xf32, #tpu.memory_space<smem>>
    %487 = vector.broadcast %486 : f32 to vector<16x128xf32>
    %488 = arith.mulf %461, %487 : vector<16x128xf32>
    %489 = arith.addf %456, %488 : vector<16x128xf32>
    %c119 = arith.constant 119 : index
    %490 = memref.load %arg0[%c119] : memref<192xf32, #tpu.memory_space<smem>>
    %491 = vector.broadcast %490 : f32 to vector<16x128xf32>
    %492 = arith.mulf %461, %491 : vector<16x128xf32>
    %493 = arith.addf %460, %492 : vector<16x128xf32>
    %c7_32 = arith.constant 7 : index
    %c0_33 = arith.constant 0 : index
    %494 = vector.load %arg2[%c7_32, %c0_33] : memref<24x128xf32, #tpu.memory_space<vmem>>, vector<16x128xf32>
    %c120 = arith.constant 120 : index
    %495 = memref.load %arg0[%c120] : memref<192xf32, #tpu.memory_space<smem>>
    %496 = vector.broadcast %495 : f32 to vector<16x128xf32>
    %497 = arith.mulf %494, %496 : vector<16x128xf32>
    %498 = arith.addf %465, %497 : vector<16x128xf32>
    %c121 = arith.constant 121 : index
    %499 = memref.load %arg0[%c121] : memref<192xf32, #tpu.memory_space<smem>>
    %500 = vector.broadcast %499 : f32 to vector<16x128xf32>
    %501 = arith.mulf %494, %500 : vector<16x128xf32>
    %502 = arith.addf %469, %501 : vector<16x128xf32>
    %c122 = arith.constant 122 : index
    %503 = memref.load %arg0[%c122] : memref<192xf32, #tpu.memory_space<smem>>
    %504 = vector.broadcast %503 : f32 to vector<16x128xf32>
    %505 = arith.mulf %494, %504 : vector<16x128xf32>
    %506 = arith.addf %473, %505 : vector<16x128xf32>
    %c123 = arith.constant 123 : index
    %507 = memref.load %arg0[%c123] : memref<192xf32, #tpu.memory_space<smem>>
    %508 = vector.broadcast %507 : f32 to vector<16x128xf32>
    %509 = arith.mulf %494, %508 : vector<16x128xf32>
    %510 = arith.addf %477, %509 : vector<16x128xf32>
    %c124 = arith.constant 124 : index
    %511 = memref.load %arg0[%c124] : memref<192xf32, #tpu.memory_space<smem>>
    %512 = vector.broadcast %511 : f32 to vector<16x128xf32>
    %513 = arith.mulf %494, %512 : vector<16x128xf32>
    %514 = arith.addf %481, %513 : vector<16x128xf32>
    %c125 = arith.constant 125 : index
    %515 = memref.load %arg0[%c125] : memref<192xf32, #tpu.memory_space<smem>>
    %516 = vector.broadcast %515 : f32 to vector<16x128xf32>
    %517 = arith.mulf %494, %516 : vector<16x128xf32>
    %518 = arith.addf %485, %517 : vector<16x128xf32>
    %c126 = arith.constant 126 : index
    %519 = memref.load %arg0[%c126] : memref<192xf32, #tpu.memory_space<smem>>
    %520 = vector.broadcast %519 : f32 to vector<16x128xf32>
    %521 = arith.mulf %494, %520 : vector<16x128xf32>
    %522 = arith.addf %489, %521 : vector<16x128xf32>
    %c127 = arith.constant 127 : index
    %523 = memref.load %arg0[%c127] : memref<192xf32, #tpu.memory_space<smem>>
    %524 = vector.broadcast %523 : f32 to vector<16x128xf32>
    %525 = arith.mulf %494, %524 : vector<16x128xf32>
    %526 = arith.addf %493, %525 : vector<16x128xf32>
    %c127_i32_34 = arith.constant 127 : i32
    %527 = tpu.dynamic_rotate %502 by %c127_i32_34 dim 1 : vector<16x128xf32>, i32 -> vector<16x128xf32>
    %c126_i32_35 = arith.constant 126 : i32
    %528 = tpu.dynamic_rotate %506 by %c126_i32_35 dim 1 : vector<16x128xf32>, i32 -> vector<16x128xf32>
    %c125_i32_36 = arith.constant 125 : i32
    %529 = tpu.dynamic_rotate %510 by %c125_i32_36 dim 1 : vector<16x128xf32>, i32 -> vector<16x128xf32>
    %c124_i32_37 = arith.constant 124 : i32
    %530 = tpu.dynamic_rotate %514 by %c124_i32_37 dim 1 : vector<16x128xf32>, i32 -> vector<16x128xf32>
    %c123_i32_38 = arith.constant 123 : i32
    %531 = tpu.dynamic_rotate %518 by %c123_i32_38 dim 1 : vector<16x128xf32>, i32 -> vector<16x128xf32>
    %c122_i32_39 = arith.constant 122 : i32
    %532 = tpu.dynamic_rotate %522 by %c122_i32_39 dim 1 : vector<16x128xf32>, i32 -> vector<16x128xf32>
    %c121_i32_40 = arith.constant 121 : i32
    %533 = tpu.dynamic_rotate %526 by %c121_i32_40 dim 1 : vector<16x128xf32>, i32 -> vector<16x128xf32>
    %534 = arith.addf %498, %527 : vector<16x128xf32>
    %535 = arith.addf %528, %529 : vector<16x128xf32>
    %536 = arith.addf %534, %535 : vector<16x128xf32>
    %537 = arith.addf %530, %531 : vector<16x128xf32>
    %538 = arith.addf %532, %533 : vector<16x128xf32>
    %539 = arith.addf %537, %538 : vector<16x128xf32>
    %540 = arith.addf %536, %539 : vector<16x128xf32>
    %c0_41 = arith.constant 0 : index
    %c0_42 = arith.constant 0 : index
    %541 = vector.load %arg5[%c0_41, %c0_42] : memref<16x128xf32, #tpu.memory_space<vmem>>, vector<16x128xf32>
    tpu.vector_store %arg5[%c0_41, %c0_42], %540 {strides = array<i32>} : memref<16x128xf32, #tpu.memory_space<vmem>>, vector<16x128xf32>,
    %c0_43 = arith.constant 0 : index
    %c0_44 = arith.constant 0 : index
    %542 = vector.load %arg3[%c0_43, %c0_44] : memref<16x128xf32, #tpu.memory_space<vmem>>, vector<8x128xf32>
    %c128 = arith.constant 128 : index
    %543 = memref.load %arg0[%c128] : memref<192xf32, #tpu.memory_space<smem>>
    %544 = vector.broadcast %543 : f32 to vector<8x128xf32>
    %545 = arith.mulf %542, %544 : vector<8x128xf32>
    %c129 = arith.constant 129 : index
    %546 = memref.load %arg0[%c129] : memref<192xf32, #tpu.memory_space<smem>>
    %547 = vector.broadcast %546 : f32 to vector<8x128xf32>
    %548 = arith.mulf %542, %547 : vector<8x128xf32>
    %c130 = arith.constant 130 : index
    %549 = memref.load %arg0[%c130] : memref<192xf32, #tpu.memory_space<smem>>
    %550 = vector.broadcast %549 : f32 to vector<8x128xf32>
    %551 = arith.mulf %542, %550 : vector<8x128xf32>
    %c131 = arith.constant 131 : index
    %552 = memref.load %arg0[%c131] : memref<192xf32, #tpu.memory_space<smem>>
    %553 = vector.broadcast %552 : f32 to vector<8x128xf32>
    %554 = arith.mulf %542, %553 : vector<8x128xf32>
    %c132 = arith.constant 132 : index
    %555 = memref.load %arg0[%c132] : memref<192xf32, #tpu.memory_space<smem>>
    %556 = vector.broadcast %555 : f32 to vector<8x128xf32>
    %557 = arith.mulf %542, %556 : vector<8x128xf32>
    %c133 = arith.constant 133 : index
    %558 = memref.load %arg0[%c133] : memref<192xf32, #tpu.memory_space<smem>>
    %559 = vector.broadcast %558 : f32 to vector<8x128xf32>
    %560 = arith.mulf %542, %559 : vector<8x128xf32>
    %c134 = arith.constant 134 : index
    %561 = memref.load %arg0[%c134] : memref<192xf32, #tpu.memory_space<smem>>
    %562 = vector.broadcast %561 : f32 to vector<8x128xf32>
    %563 = arith.mulf %542, %562 : vector<8x128xf32>
    %c135 = arith.constant 135 : index
    %564 = memref.load %arg0[%c135] : memref<192xf32, #tpu.memory_space<smem>>
    %565 = vector.broadcast %564 : f32 to vector<8x128xf32>
    %566 = arith.mulf %542, %565 : vector<8x128xf32>
    %c1_45 = arith.constant 1 : index
    %c0_46 = arith.constant 0 : index
    %567 = vector.load %arg3[%c1_45, %c0_46] : memref<16x128xf32, #tpu.memory_space<vmem>>, vector<8x128xf32>
    %c136 = arith.constant 136 : index
    %568 = memref.load %arg0[%c136] : memref<192xf32, #tpu.memory_space<smem>>
    %569 = vector.broadcast %568 : f32 to vector<8x128xf32>
    %570 = arith.mulf %567, %569 : vector<8x128xf32>
    %571 = arith.addf %545, %570 : vector<8x128xf32>
    %c137 = arith.constant 137 : index
    %572 = memref.load %arg0[%c137] : memref<192xf32, #tpu.memory_space<smem>>
    %573 = vector.broadcast %572 : f32 to vector<8x128xf32>
    %574 = arith.mulf %567, %573 : vector<8x128xf32>
    %575 = arith.addf %548, %574 : vector<8x128xf32>
    %c138 = arith.constant 138 : index
    %576 = memref.load %arg0[%c138] : memref<192xf32, #tpu.memory_space<smem>>
    %577 = vector.broadcast %576 : f32 to vector<8x128xf32>
    %578 = arith.mulf %567, %577 : vector<8x128xf32>
    %579 = arith.addf %551, %578 : vector<8x128xf32>
    %c139 = arith.constant 139 : index
    %580 = memref.load %arg0[%c139] : memref<192xf32, #tpu.memory_space<smem>>
    %581 = vector.broadcast %580 : f32 to vector<8x128xf32>
    %582 = arith.mulf %567, %581 : vector<8x128xf32>
    %583 = arith.addf %554, %582 : vector<8x128xf32>
    %c140 = arith.constant 140 : index
    %584 = memref.load %arg0[%c140] : memref<192xf32, #tpu.memory_space<smem>>
    %585 = vector.broadcast %584 : f32 to vector<8x128xf32>
    %586 = arith.mulf %567, %585 : vector<8x128xf32>
    %587 = arith.addf %557, %586 : vector<8x128xf32>
    %c141 = arith.constant 141 : index
    %588 = memref.load %arg0[%c141] : memref<192xf32, #tpu.memory_space<smem>>
    %589 = vector.broadcast %588 : f32 to vector<8x128xf32>
    %590 = arith.mulf %567, %589 : vector<8x128xf32>
    %591 = arith.addf %560, %590 : vector<8x128xf32>
    %c142 = arith.constant 142 : index
    %592 = memref.load %arg0[%c142] : memref<192xf32, #tpu.memory_space<smem>>
    %593 = vector.broadcast %592 : f32 to vector<8x128xf32>
    %594 = arith.mulf %567, %593 : vector<8x128xf32>
    %595 = arith.addf %563, %594 : vector<8x128xf32>
    %c143 = arith.constant 143 : index
    %596 = memref.load %arg0[%c143] : memref<192xf32, #tpu.memory_space<smem>>
    %597 = vector.broadcast %596 : f32 to vector<8x128xf32>
    %598 = arith.mulf %567, %597 : vector<8x128xf32>
    %599 = arith.addf %566, %598 : vector<8x128xf32>
    %c2_47 = arith.constant 2 : index
    %c0_48 = arith.constant 0 : index
    %600 = vector.load %arg3[%c2_47, %c0_48] : memref<16x128xf32, #tpu.memory_space<vmem>>, vector<8x128xf32>
    %c144 = arith.constant 144 : index
    %601 = memref.load %arg0[%c144] : memref<192xf32, #tpu.memory_space<smem>>
    %602 = vector.broadcast %601 : f32 to vector<8x128xf32>
    %603 = arith.mulf %600, %602 : vector<8x128xf32>
    %604 = arith.addf %571, %603 : vector<8x128xf32>
    %c145 = arith.constant 145 : index
    %605 = memref.load %arg0[%c145] : memref<192xf32, #tpu.memory_space<smem>>
    %606 = vector.broadcast %605 : f32 to vector<8x128xf32>
    %607 = arith.mulf %600, %606 : vector<8x128xf32>
    %608 = arith.addf %575, %607 : vector<8x128xf32>
    %c146 = arith.constant 146 : index
    %609 = memref.load %arg0[%c146] : memref<192xf32, #tpu.memory_space<smem>>
    %610 = vector.broadcast %609 : f32 to vector<8x128xf32>
    %611 = arith.mulf %600, %610 : vector<8x128xf32>
    %612 = arith.addf %579, %611 : vector<8x128xf32>
    %c147 = arith.constant 147 : index
    %613 = memref.load %arg0[%c147] : memref<192xf32, #tpu.memory_space<smem>>
    %614 = vector.broadcast %613 : f32 to vector<8x128xf32>
    %615 = arith.mulf %600, %614 : vector<8x128xf32>
    %616 = arith.addf %583, %615 : vector<8x128xf32>
    %c148 = arith.constant 148 : index
    %617 = memref.load %arg0[%c148] : memref<192xf32, #tpu.memory_space<smem>>
    %618 = vector.broadcast %617 : f32 to vector<8x128xf32>
    %619 = arith.mulf %600, %618 : vector<8x128xf32>
    %620 = arith.addf %587, %619 : vector<8x128xf32>
    %c149 = arith.constant 149 : index
    %621 = memref.load %arg0[%c149] : memref<192xf32, #tpu.memory_space<smem>>
    %622 = vector.broadcast %621 : f32 to vector<8x128xf32>
    %623 = arith.mulf %600, %622 : vector<8x128xf32>
    %624 = arith.addf %591, %623 : vector<8x128xf32>
    %c150 = arith.constant 150 : index
    %625 = memref.load %arg0[%c150] : memref<192xf32, #tpu.memory_space<smem>>
    %626 = vector.broadcast %625 : f32 to vector<8x128xf32>
    %627 = arith.mulf %600, %626 : vector<8x128xf32>
    %628 = arith.addf %595, %627 : vector<8x128xf32>
    %c151 = arith.constant 151 : index
    %629 = memref.load %arg0[%c151] : memref<192xf32, #tpu.memory_space<smem>>
    %630 = vector.broadcast %629 : f32 to vector<8x128xf32>
    %631 = arith.mulf %600, %630 : vector<8x128xf32>
    %632 = arith.addf %599, %631 : vector<8x128xf32>
    %c3_49 = arith.constant 3 : index
    %c0_50 = arith.constant 0 : index
    %633 = vector.load %arg3[%c3_49, %c0_50] : memref<16x128xf32, #tpu.memory_space<vmem>>, vector<8x128xf32>
    %c152 = arith.constant 152 : index
    %634 = memref.load %arg0[%c152] : memref<192xf32, #tpu.memory_space<smem>>
    %635 = vector.broadcast %634 : f32 to vector<8x128xf32>
    %636 = arith.mulf %633, %635 : vector<8x128xf32>
    %637 = arith.addf %604, %636 : vector<8x128xf32>
    %c153 = arith.constant 153 : index
    %638 = memref.load %arg0[%c153] : memref<192xf32, #tpu.memory_space<smem>>
    %639 = vector.broadcast %638 : f32 to vector<8x128xf32>
    %640 = arith.mulf %633, %639 : vector<8x128xf32>
    %641 = arith.addf %608, %640 : vector<8x128xf32>
    %c154 = arith.constant 154 : index
    %642 = memref.load %arg0[%c154] : memref<192xf32, #tpu.memory_space<smem>>
    %643 = vector.broadcast %642 : f32 to vector<8x128xf32>
    %644 = arith.mulf %633, %643 : vector<8x128xf32>
    %645 = arith.addf %612, %644 : vector<8x128xf32>
    %c155 = arith.constant 155 : index
    %646 = memref.load %arg0[%c155] : memref<192xf32, #tpu.memory_space<smem>>
    %647 = vector.broadcast %646 : f32 to vector<8x128xf32>
    %648 = arith.mulf %633, %647 : vector<8x128xf32>
    %649 = arith.addf %616, %648 : vector<8x128xf32>
    %c156 = arith.constant 156 : index
    %650 = memref.load %arg0[%c156] : memref<192xf32, #tpu.memory_space<smem>>
    %651 = vector.broadcast %650 : f32 to vector<8x128xf32>
    %652 = arith.mulf %633, %651 : vector<8x128xf32>
    %653 = arith.addf %620, %652 : vector<8x128xf32>
    %c157 = arith.constant 157 : index
    %654 = memref.load %arg0[%c157] : memref<192xf32, #tpu.memory_space<smem>>
    %655 = vector.broadcast %654 : f32 to vector<8x128xf32>
    %656 = arith.mulf %633, %655 : vector<8x128xf32>
    %657 = arith.addf %624, %656 : vector<8x128xf32>
    %c158 = arith.constant 158 : index
    %658 = memref.load %arg0[%c158] : memref<192xf32, #tpu.memory_space<smem>>
    %659 = vector.broadcast %658 : f32 to vector<8x128xf32>
    %660 = arith.mulf %633, %659 : vector<8x128xf32>
    %661 = arith.addf %628, %660 : vector<8x128xf32>
    %c159 = arith.constant 159 : index
    %662 = memref.load %arg0[%c159] : memref<192xf32, #tpu.memory_space<smem>>
    %663 = vector.broadcast %662 : f32 to vector<8x128xf32>
    %664 = arith.mulf %633, %663 : vector<8x128xf32>
    %665 = arith.addf %632, %664 : vector<8x128xf32>
    %c4_51 = arith.constant 4 : index
    %c0_52 = arith.constant 0 : index
    %666 = vector.load %arg3[%c4_51, %c0_52] : memref<16x128xf32, #tpu.memory_space<vmem>>, vector<8x128xf32>
    %c160 = arith.constant 160 : index
    %667 = memref.load %arg0[%c160] : memref<192xf32, #tpu.memory_space<smem>>
    %668 = vector.broadcast %667 : f32 to vector<8x128xf32>
    %669 = arith.mulf %666, %668 : vector<8x128xf32>
    %670 = arith.addf %637, %669 : vector<8x128xf32>
    %c161 = arith.constant 161 : index
    %671 = memref.load %arg0[%c161] : memref<192xf32, #tpu.memory_space<smem>>
    %672 = vector.broadcast %671 : f32 to vector<8x128xf32>
    %673 = arith.mulf %666, %672 : vector<8x128xf32>
    %674 = arith.addf %641, %673 : vector<8x128xf32>
    %c162 = arith.constant 162 : index
    %675 = memref.load %arg0[%c162] : memref<192xf32, #tpu.memory_space<smem>>
    %676 = vector.broadcast %675 : f32 to vector<8x128xf32>
    %677 = arith.mulf %666, %676 : vector<8x128xf32>
    %678 = arith.addf %645, %677 : vector<8x128xf32>
    %c163 = arith.constant 163 : index
    %679 = memref.load %arg0[%c163] : memref<192xf32, #tpu.memory_space<smem>>
    %680 = vector.broadcast %679 : f32 to vector<8x128xf32>
    %681 = arith.mulf %666, %680 : vector<8x128xf32>
    %682 = arith.addf %649, %681 : vector<8x128xf32>
    %c164 = arith.constant 164 : index
    %683 = memref.load %arg0[%c164] : memref<192xf32, #tpu.memory_space<smem>>
    %684 = vector.broadcast %683 : f32 to vector<8x128xf32>
    %685 = arith.mulf %666, %684 : vector<8x128xf32>
    %686 = arith.addf %653, %685 : vector<8x128xf32>
    %c165 = arith.constant 165 : index
    %687 = memref.load %arg0[%c165] : memref<192xf32, #tpu.memory_space<smem>>
    %688 = vector.broadcast %687 : f32 to vector<8x128xf32>
    %689 = arith.mulf %666, %688 : vector<8x128xf32>
    %690 = arith.addf %657, %689 : vector<8x128xf32>
    %c166 = arith.constant 166 : index
    %691 = memref.load %arg0[%c166] : memref<192xf32, #tpu.memory_space<smem>>
    %692 = vector.broadcast %691 : f32 to vector<8x128xf32>
    %693 = arith.mulf %666, %692 : vector<8x128xf32>
    %694 = arith.addf %661, %693 : vector<8x128xf32>
    %c167 = arith.constant 167 : index
    %695 = memref.load %arg0[%c167] : memref<192xf32, #tpu.memory_space<smem>>
    %696 = vector.broadcast %695 : f32 to vector<8x128xf32>
    %697 = arith.mulf %666, %696 : vector<8x128xf32>
    %698 = arith.addf %665, %697 : vector<8x128xf32>
    %c5_53 = arith.constant 5 : index
    %c0_54 = arith.constant 0 : index
    %699 = vector.load %arg3[%c5_53, %c0_54] : memref<16x128xf32, #tpu.memory_space<vmem>>, vector<8x128xf32>
    %c168 = arith.constant 168 : index
    %700 = memref.load %arg0[%c168] : memref<192xf32, #tpu.memory_space<smem>>
    %701 = vector.broadcast %700 : f32 to vector<8x128xf32>
    %702 = arith.mulf %699, %701 : vector<8x128xf32>
    %703 = arith.addf %670, %702 : vector<8x128xf32>
    %c169 = arith.constant 169 : index
    %704 = memref.load %arg0[%c169] : memref<192xf32, #tpu.memory_space<smem>>
    %705 = vector.broadcast %704 : f32 to vector<8x128xf32>
    %706 = arith.mulf %699, %705 : vector<8x128xf32>
    %707 = arith.addf %674, %706 : vector<8x128xf32>
    %c170 = arith.constant 170 : index
    %708 = memref.load %arg0[%c170] : memref<192xf32, #tpu.memory_space<smem>>
    %709 = vector.broadcast %708 : f32 to vector<8x128xf32>
    %710 = arith.mulf %699, %709 : vector<8x128xf32>
    %711 = arith.addf %678, %710 : vector<8x128xf32>
    %c171 = arith.constant 171 : index
    %712 = memref.load %arg0[%c171] : memref<192xf32, #tpu.memory_space<smem>>
    %713 = vector.broadcast %712 : f32 to vector<8x128xf32>
    %714 = arith.mulf %699, %713 : vector<8x128xf32>
    %715 = arith.addf %682, %714 : vector<8x128xf32>
    %c172 = arith.constant 172 : index
    %716 = memref.load %arg0[%c172] : memref<192xf32, #tpu.memory_space<smem>>
    %717 = vector.broadcast %716 : f32 to vector<8x128xf32>
    %718 = arith.mulf %699, %717 : vector<8x128xf32>
    %719 = arith.addf %686, %718 : vector<8x128xf32>
    %c173 = arith.constant 173 : index
    %720 = memref.load %arg0[%c173] : memref<192xf32, #tpu.memory_space<smem>>
    %721 = vector.broadcast %720 : f32 to vector<8x128xf32>
    %722 = arith.mulf %699, %721 : vector<8x128xf32>
    %723 = arith.addf %690, %722 : vector<8x128xf32>
    %c174 = arith.constant 174 : index
    %724 = memref.load %arg0[%c174] : memref<192xf32, #tpu.memory_space<smem>>
    %725 = vector.broadcast %724 : f32 to vector<8x128xf32>
    %726 = arith.mulf %699, %725 : vector<8x128xf32>
    %727 = arith.addf %694, %726 : vector<8x128xf32>
    %c175 = arith.constant 175 : index
    %728 = memref.load %arg0[%c175] : memref<192xf32, #tpu.memory_space<smem>>
    %729 = vector.broadcast %728 : f32 to vector<8x128xf32>
    %730 = arith.mulf %699, %729 : vector<8x128xf32>
    %731 = arith.addf %698, %730 : vector<8x128xf32>
    %c6_55 = arith.constant 6 : index
    %c0_56 = arith.constant 0 : index
    %732 = vector.load %arg3[%c6_55, %c0_56] : memref<16x128xf32, #tpu.memory_space<vmem>>, vector<8x128xf32>
    %c176 = arith.constant 176 : index
    %733 = memref.load %arg0[%c176] : memref<192xf32, #tpu.memory_space<smem>>
    %734 = vector.broadcast %733 : f32 to vector<8x128xf32>
    %735 = arith.mulf %732, %734 : vector<8x128xf32>
    %736 = arith.addf %703, %735 : vector<8x128xf32>
    %c177 = arith.constant 177 : index
    %737 = memref.load %arg0[%c177] : memref<192xf32, #tpu.memory_space<smem>>
    %738 = vector.broadcast %737 : f32 to vector<8x128xf32>
    %739 = arith.mulf %732, %738 : vector<8x128xf32>
    %740 = arith.addf %707, %739 : vector<8x128xf32>
    %c178 = arith.constant 178 : index
    %741 = memref.load %arg0[%c178] : memref<192xf32, #tpu.memory_space<smem>>
    %742 = vector.broadcast %741 : f32 to vector<8x128xf32>
    %743 = arith.mulf %732, %742 : vector<8x128xf32>
    %744 = arith.addf %711, %743 : vector<8x128xf32>
    %c179 = arith.constant 179 : index
    %745 = memref.load %arg0[%c179] : memref<192xf32, #tpu.memory_space<smem>>
    %746 = vector.broadcast %745 : f32 to vector<8x128xf32>
    %747 = arith.mulf %732, %746 : vector<8x128xf32>
    %748 = arith.addf %715, %747 : vector<8x128xf32>
    %c180 = arith.constant 180 : index
    %749 = memref.load %arg0[%c180] : memref<192xf32, #tpu.memory_space<smem>>
    %750 = vector.broadcast %749 : f32 to vector<8x128xf32>
    %751 = arith.mulf %732, %750 : vector<8x128xf32>
    %752 = arith.addf %719, %751 : vector<8x128xf32>
    %c181 = arith.constant 181 : index
    %753 = memref.load %arg0[%c181] : memref<192xf32, #tpu.memory_space<smem>>
    %754 = vector.broadcast %753 : f32 to vector<8x128xf32>
    %755 = arith.mulf %732, %754 : vector<8x128xf32>
    %756 = arith.addf %723, %755 : vector<8x128xf32>
    %c182 = arith.constant 182 : index
    %757 = memref.load %arg0[%c182] : memref<192xf32, #tpu.memory_space<smem>>
    %758 = vector.broadcast %757 : f32 to vector<8x128xf32>
    %759 = arith.mulf %732, %758 : vector<8x128xf32>
    %760 = arith.addf %727, %759 : vector<8x128xf32>
    %c183 = arith.constant 183 : index
    %761 = memref.load %arg0[%c183] : memref<192xf32, #tpu.memory_space<smem>>
    %762 = vector.broadcast %761 : f32 to vector<8x128xf32>
    %763 = arith.mulf %732, %762 : vector<8x128xf32>
    %764 = arith.addf %731, %763 : vector<8x128xf32>
    %c7_57 = arith.constant 7 : index
    %c0_58 = arith.constant 0 : index
    %765 = vector.load %arg3[%c7_57, %c0_58] : memref<16x128xf32, #tpu.memory_space<vmem>>, vector<8x128xf32>
    %c184 = arith.constant 184 : index
    %766 = memref.load %arg0[%c184] : memref<192xf32, #tpu.memory_space<smem>>
    %767 = vector.broadcast %766 : f32 to vector<8x128xf32>
    %768 = arith.mulf %765, %767 : vector<8x128xf32>
    %769 = arith.addf %736, %768 : vector<8x128xf32>
    %c185 = arith.constant 185 : index
    %770 = memref.load %arg0[%c185] : memref<192xf32, #tpu.memory_space<smem>>
    %771 = vector.broadcast %770 : f32 to vector<8x128xf32>
    %772 = arith.mulf %765, %771 : vector<8x128xf32>
    %773 = arith.addf %740, %772 : vector<8x128xf32>
    %c186 = arith.constant 186 : index
    %774 = memref.load %arg0[%c186] : memref<192xf32, #tpu.memory_space<smem>>
    %775 = vector.broadcast %774 : f32 to vector<8x128xf32>
    %776 = arith.mulf %765, %775 : vector<8x128xf32>
    %777 = arith.addf %744, %776 : vector<8x128xf32>
    %c187 = arith.constant 187 : index
    %778 = memref.load %arg0[%c187] : memref<192xf32, #tpu.memory_space<smem>>
    %779 = vector.broadcast %778 : f32 to vector<8x128xf32>
    %780 = arith.mulf %765, %779 : vector<8x128xf32>
    %781 = arith.addf %748, %780 : vector<8x128xf32>
    %c188 = arith.constant 188 : index
    %782 = memref.load %arg0[%c188] : memref<192xf32, #tpu.memory_space<smem>>
    %783 = vector.broadcast %782 : f32 to vector<8x128xf32>
    %784 = arith.mulf %765, %783 : vector<8x128xf32>
    %785 = arith.addf %752, %784 : vector<8x128xf32>
    %c189 = arith.constant 189 : index
    %786 = memref.load %arg0[%c189] : memref<192xf32, #tpu.memory_space<smem>>
    %787 = vector.broadcast %786 : f32 to vector<8x128xf32>
    %788 = arith.mulf %765, %787 : vector<8x128xf32>
    %789 = arith.addf %756, %788 : vector<8x128xf32>
    %c190 = arith.constant 190 : index
    %790 = memref.load %arg0[%c190] : memref<192xf32, #tpu.memory_space<smem>>
    %791 = vector.broadcast %790 : f32 to vector<8x128xf32>
    %792 = arith.mulf %765, %791 : vector<8x128xf32>
    %793 = arith.addf %760, %792 : vector<8x128xf32>
    %c191 = arith.constant 191 : index
    %794 = memref.load %arg0[%c191] : memref<192xf32, #tpu.memory_space<smem>>
    %795 = vector.broadcast %794 : f32 to vector<8x128xf32>
    %796 = arith.mulf %765, %795 : vector<8x128xf32>
    %797 = arith.addf %764, %796 : vector<8x128xf32>
    %c127_i32_59 = arith.constant 127 : i32
    %798 = tpu.dynamic_rotate %773 by %c127_i32_59 dim 1 : vector<8x128xf32>, i32 -> vector<8x128xf32>
    %c126_i32_60 = arith.constant 126 : i32
    %799 = tpu.dynamic_rotate %777 by %c126_i32_60 dim 1 : vector<8x128xf32>, i32 -> vector<8x128xf32>
    %c125_i32_61 = arith.constant 125 : i32
    %800 = tpu.dynamic_rotate %781 by %c125_i32_61 dim 1 : vector<8x128xf32>, i32 -> vector<8x128xf32>
    %c124_i32_62 = arith.constant 124 : i32
    %801 = tpu.dynamic_rotate %785 by %c124_i32_62 dim 1 : vector<8x128xf32>, i32 -> vector<8x128xf32>
    %c123_i32_63 = arith.constant 123 : i32
    %802 = tpu.dynamic_rotate %789 by %c123_i32_63 dim 1 : vector<8x128xf32>, i32 -> vector<8x128xf32>
    %c122_i32_64 = arith.constant 122 : i32
    %803 = tpu.dynamic_rotate %793 by %c122_i32_64 dim 1 : vector<8x128xf32>, i32 -> vector<8x128xf32>
    %c121_i32_65 = arith.constant 121 : i32
    %804 = tpu.dynamic_rotate %797 by %c121_i32_65 dim 1 : vector<8x128xf32>, i32 -> vector<8x128xf32>
    %805 = arith.addf %769, %798 : vector<8x128xf32>
    %806 = arith.addf %799, %800 : vector<8x128xf32>
    %807 = arith.addf %805, %806 : vector<8x128xf32>
    %808 = arith.addf %801, %802 : vector<8x128xf32>
    %809 = arith.addf %803, %804 : vector<8x128xf32>
    %810 = arith.addf %808, %809 : vector<8x128xf32>
    %811 = arith.addf %807, %810 : vector<8x128xf32>
    %c0_66 = arith.constant 0 : index
    %c0_67 = arith.constant 0 : index
    %812 = vector.load %arg6[%c0_66, %c0_67] : memref<8x128xf32, #tpu.memory_space<vmem>>, vector<8x128xf32>
    tpu.vector_store %arg6[%c0_66, %c0_67], %811 {strides = array<i32>} : memref<8x128xf32, #tpu.memory_space<vmem>>, vector<8x128xf32>,
    return
  }
}

</mosaic_0001>

<bundles_post_ra>
// kernel: squeeze.3
= control target key start
LH: loop header
LB: loop body
LE: loop exit
PB: predicated region body
PF: predicated region fallthrough
CT: control target
= control target key end

     0   :  { %s141_s10 = smov 120   ;;  %s142_s11 = smov 104   ;;  %vm4_vm0 = vcmask 64512   ;;  %vm10_vm1 = vcmask 1048512   ;;  %vm16_vm2 = vcmask 982912   ;;  %vm22_vm3 = vcmask 917312   ;;  %s217_s0 = inlined_call_operand.vmem [shape: f32[3,1,8,8], index: 0, kind: input, shape index: {}]   ;;  %s218_s1 = inlined_call_operand.vmem [shape: f32[192], index: 1, kind: output, shape index: {}]  }
   0x1   :  { %v111_v0 = vld [vmem:[%s217_s0 + $0xf] sm:$0x1]   ;;  %v113_v1 = vld [vmem:[%s217_s0 + $0xd] sm:$0x1]   ;;  %v112_v2 = vld [vmem:[%s217_s0 + $0xe] sm:$0x1]  }
   0x2   :  { %8 = vrot.lane.b32.xlu0 %v111_v0, %s141_s10  ;;  %20 = vrot.lane.b32.xlu1 %v113_v1, %s142_s11  ;;  %v114_v3 = vld [vmem:[%s217_s0 + $0xc] sm:$0x1]   ;;  %s143_s16 = smov 112   ;;  %s144_s17 = smov 96   ;;  %v115_v4 = vld [vmem:[%s217_s0 + $0xb] sm:$0x1]  }
   0x3   :  { %v116_v5 = vld [vmem:[%s217_s0 + $0xa] sm:$0x1]   ;;  %s145_s22 = smov 88   ;;  %s146_s23 = smov 80   ;;  %v117_v6 = vld [vmem:[%s217_s0 + $0x9] sm:$0x1]  }
   0x4   :  { %v118_v7 = vld [vmem:[%s217_s0 + $0x8] sm:$0x1]   ;;  %s55_s28 = smov 3  ;;  %s62_s29 = smov 3  ;;  %vm28_vm4 = vcmask 851712   ;;  %vm34_vm5 = vcmask 786112  }
   0x5   :  { %s2_s30 = smov 3  ;;  %s147_s4 = smov 72   ;;  %v119_v9 = vld [vmem:[%s217_s0 + $0x7] ss:$16 sm:%s55_s28]   ;;  %v120_v10 = vld [vmem:[%s217_s0 + $0x6] ss:$16 sm:%s62_s29]  }
   0x6   :  { %14 = vrot.lane.b32.xlu0 %v112_v2, %s143_s16  ;;  %26 = vrot.lane.b32.xlu1 %v114_v3, %s144_s17  ;;  %v3_v8 = vld [vmem:[%s217_s0] ss:$16 sm:%s2_s30]   ;;  %s148_s5 = smov 64   ;;  %s69_s10 = smov 3  ;;  %vm40_vm6 = vcmask 720512   ;;  %vm46_vm7 = vcmask 654912  }
   0x7   :  { %5 = vst.msk [vmem:[#allocation0] sm:$0x3] %vm4_vm0, %v3_v8   ;;  %s76_s11 = smov 3  ;;  %s149_s12 = smov 56   ;;  %v121_v11 = vld [vmem:[%s217_s0 + $0x5] ss:$16 sm:%s69_s10]  }
   0x8   :  { %s150_s13 = smov 48   ;;  %v122_v12 = vld [vmem:[%s217_s0 + $0x4] ss:$16 sm:%s76_s11]   ;;  %s83_s18 = smov 3  ;;  %vm52_vm8 = vcmask 589312   ;;  %vm59_vm9 = vcmask 523712  }
   0x9   :  { %s90_s19 = smov 3  ;;  %s151_s20 = smov 40   ;;  %v123_v13 = vld [vmem:[%s217_s0 + $0x3] ss:$16 sm:%s83_s18]   ;;  %vm66_vm10 = vcmask 458112   ;;  %vm73_vm11 = vcmask 392512  }
   0xa   :  { %32 = vrot.lane.b32.xlu0 %v115_v4, %s145_s22  ;;  %38 = vrot.lane.b32.xlu1 %v116_v5, %s146_s23  ;;  %s152_s21 = smov 32   ;;  %v124_v14 = vld [vmem:[%s217_s0 + $0x2] ss:$16 sm:%s90_s19]   ;;  %s97_s26 = smov 3  ;;  %vm80_vm12 = vcmask 326912   ;;  %vm87_vm13 = vcmask 261312  }
   0xb   :  { %s153_s27 = smov 24   ;;  %s154_s28 = smov 16   ;;  %v125_v15 = vld [vmem:[%s217_s0 + $0x1] ss:$16 sm:%s97_s26]   ;;  %vm94_vm14 = vcmask 195712   ;;  %vm101_vm15 = vcmask 130112  }
   0xc   :  { %s155_s0 = smov 8  }
   0xe   :  { %44 = vrot.lane.b32.xlu0 %v117_v6, %s147_s4  ;;  %50 = vrot.lane.b32.xlu1 %v118_v7, %s148_s5 }
  0x12   :  { %57 = vrot.lane.b32.xlu0 %v119_v9, %s149_s12  ;;  %64 = vrot.lane.b32.xlu1 %v120_v10, %s150_s13 }
  0x16   :  { %71 = vrot.lane.b32.xlu0 %v121_v11, %s151_s20  ;;  %78 = vrot.lane.b32.xlu1 %v122_v12, %s152_s21 }
  0x1a   :  { %85 = vrot.lane.b32.xlu0 %v123_v13, %s153_s27  ;;  %92 = vrot.lane.b32.xlu1 %v124_v14, %s154_s28 }
  0x1e   :  { %99 = vrot.lane.b32.xlu0 %v125_v15, %s155_s0 }
  0x74   :  { %v9_v16 = vpop.permute.xlu0 %8   ;;  %v21_v17 = vpop.permute.xlu1 %20  }
  0x75   :  { %11 = vst.msk [vmem:[#allocation0] sm:$0x1] %vm10_vm1, %v9_v16  }
  0x78   :  { %v15_v18 = vpop.permute.xlu0 %14   ;;  %v27_v19 = vpop.permute.xlu1 %26  }
  0x79   :  { %17 = vst.msk [vmem:[#allocation0] sm:$0x1] %vm16_vm2, %v15_v18  }
  0x7a   :  { %23 = vst.msk [vmem:[#allocation0] sm:$0x1] %vm22_vm3, %v21_v17  }
  0x7b   :  { %29 = vst.msk [vmem:[#allocation0] sm:$0x1] %vm28_vm4, %v27_v19  }
  0x7c   :  { %v33_v20 = vpop.permute.xlu0 %32   ;;  %v39_v21 = vpop.permute.xlu1 %38  }
  0x7d   :  { %35 = vst.msk [vmem:[#allocation0] sm:$0x1] %vm34_vm5, %v33_v20  }
  0x7e   :  { %41 = vst.msk [vmem:[#allocation0] sm:$0x1] %vm40_vm6, %v39_v21  }
  0x80   :  { %v45_v22 = vpop.permute.xlu0 %44   ;;  %v51_v23 = vpop.permute.xlu1 %50  }
  0x81   :  { %47 = vst.msk [vmem:[#allocation0] sm:$0x1] %vm46_vm7, %v45_v22  }
  0x82   :  { %53 = vst.msk [vmem:[#allocation0] sm:$0x1] %vm52_vm8, %v51_v23  }
  0x84   :  { %v58_v24 = vpop.permute.xlu0 %57   ;;  %v65_v25 = vpop.permute.xlu1 %64  }
  0x85   :  { %60 = vst.msk [vmem:[#allocation0] sm:$0x3] %vm59_vm9, %v58_v24  }
  0x86   :  { %67 = vst.msk [vmem:[#allocation0] sm:$0x3] %vm66_vm10, %v65_v25  }
  0x88   :  { %v72_v26 = vpop.permute.xlu0 %71   ;;  %v79_v27 = vpop.permute.xlu1 %78  }
  0x89   :  { %74 = vst.msk [vmem:[#allocation0] sm:$0x3] %vm73_vm11, %v72_v26  }
  0x8a   :  { %81 = vst.msk [vmem:[#allocation0] sm:$0x3] %vm80_vm12, %v79_v27  }
  0x8c   :  { %v86_v28 = vpop.permute.xlu0 %85   ;;  %v93_v29 = vpop.permute.xlu1 %92  }
  0x8d   :  { %88 = vst.msk [vmem:[#allocation0] sm:$0x3] %vm87_vm13, %v86_v28  }
  0x8e   :  { %95 = vst.msk [vmem:[#allocation0] sm:$0x3] %vm94_vm14, %v93_v29  }
  0x90   :  { %v100_v30 = vpop.permute.xlu0 %99  }
  0x91   :  { %102 = vst.msk [vmem:[#allocation0] sm:$0x3] %vm101_vm15, %v100_v30  }
  0x98   :  { %v107_v31 = vld [vmem:[#allocation0] sm:$0x3] }
  0x99   :  { %110 = vst [vmem:[%s218_s1] sm:$0x3] %v107_v31 }

// kernel: complex_steerable_pyramid.1
= control target key start
LH: loop header
LB: loop body
LE: loop exit
PB: predicated region body
PF: predicated region fallthrough
CT: control target
= control target key end

     0   :  { %s3668_s0 = inlined_call_operand.vmem [shape: f32[192], index: 0, kind: input, shape index: {}]   ;;  %s3669_s1 = inlined_call_operand.vmem [shape: f32[40,128], index: 1, kind: input, shape index: {}]   ;;  %s3670_s2 = inlined_call_operand.vmem [shape: f32[24,128], index: 2, kind: input, shape index: {}]   ;;  %s3671_s3 = inlined_call_operand.vmem [shape: f32[16,128], index: 3, kind: input, shape index: {}]   ;;  %s3672_s4 = inlined_call_operand.vmem [shape: f32[32,128], index: 4, kind: output, shape index: {0}]   ;;  %s3673_s5 = inlined_call_operand.vmem [shape: f32[16,128], index: 5, kind: output, shape index: {1}]   ;;  %s3674_s6 = inlined_call_operand.vmem [shape: f32[8,128], index: 6, kind: output, shape index: {2}]  }
   0x1   :  { %3691 = sst [smem:[#allocation5_spill]] %s3669_s1 }
   0x2   :  { %3692 = sst [smem:[#allocation6_spill]] %s3670_s2 }
   0x3   :  { %3693 = sst [smem:[#allocation7_spill]] %s3672_s4 }
   0x4   :  { %3694 = sst [smem:[#allocation8_spill]] %s3673_s5 }
   0x5   :  { %3695 = sst [smem:[#allocation9_spill]] %s3674_s6 }
   0x6   :  { %12 = vsyncpa [#allocation3], 0  ;;  %s19_s23 = sshll.u32 %s3668_s0, 4  ;;  %s20_s23 = int_to_ptr.vmem [resolvable:$true] %s19_s23 }
   0x7   :  { %s1749_s24 = scalar_lea.vmem %s20_s23, 32  ;;  %p1754_p1 = scmp.lt.s32.totalorder %s20_s23, %s20_s23 }
   0x8   :  { %p1750_p0 = scmp.ne.s32.totalorder %s20_s23, %s1749_s24  ;;  %p1755_p2 = scmp.lt.s32.totalorder %s1749_s24, %s1749_s24 }
   0xa   :  { %p1756_p3 = por %p1755_p2, %p1754_p1 }
   0xc   :  { %p1757_p4 = pnand %p1756_p3, %p1750_p0 }
   0xe   :  { %1760 = shalt.err (!%p1757_p4)
}
   0xf   :  { %s1763_s25 = smov [#allocation2]  }
  0x10   :  { %22 = dma.vmem_to_smem %s20_s23, 32, %s1763_s25, [#allocation3]  }
  0x11   :  { %1761 = dma.done.wait [#allocation3], 32  }
  0x12   :  { %1762 = vsyncadd [#allocation3], 4294967264 }
  0x13   :  { %32 = sfence }
  0x14   :  { %s1480_s26 = sld [smem:[#allocation2 + $0x1]]  ;;  %v1812_v0 = vld [vmem:[%s3669_s1 + $0x10] sm:$0xff]  ;;  %v1817_v1 = vld [vmem:[%s3669_s1] sm:$0xff]  ;;  %v1848_v7 = vld [vmem:[%s3669_s1 + $0x18] sm:$0xff]  ;;  %s3679_s16 = smov 126  }
  0x15   :  { %s1488_s27 = sld [smem:[#allocation2 + $0x9]]  ;;  %v1822_v2 = vld [vmem:[%s3669_s1 + $0x11] sm:$0xff]  ;;  %v1829_v3 = vld [vmem:[%s3669_s1 + $0x1] sm:$0xff]  ;;  %v1882_v17 = vld [vmem:[%s3669_s1 + $0x19] sm:$0xff]  ;;  %s3697_s6 = smov 122  }
  0x16   :  { %s1496_s28 = sld [smem:[#allocation2 + $0x11]]  ;;  %v1836_v5 = vld [vmem:[%s3669_s1 + $0x12] sm:$0xff]  ;;  %v1843_v6 = vld [vmem:[%s3669_s1 + $0x2] sm:$0xff]  ;;  %v1914_v29 = vld [vmem:[%s3669_s1 + $0x1a] sm:$0xff] }
  0x17   :  { %s1504_s29 = sld [smem:[#allocation2 + $0x19]]  ;;  %v1857_v10 = vld [vmem:[%s3669_s1 + $0x13] sm:$0xff]  ;;  %v1877_v16 = vld [vmem:[%s3669_s1 + $0x3] sm:$0xff]  ;;  %v1953_v42 = vld [vmem:[%s3669_s1 + $0x1b] sm:$0xff] }
  0x18   :  { %s1512_s0 = sld [smem:[#allocation2 + $0x21]]  ;;  %v1870_v14 = vld [vmem:[%s3669_s1 + $0x14] sm:$0xff]  ;;  %v1893_v21 = vld [vmem:[%s3669_s1 + $0x4] sm:$0xff]  ;;  %v1968_v47 = vld [vmem:[%s3669_s1 + $0x1c] sm:$0xff] }
  0x19   :  { %s1824_s12 = sld [smem:[#allocation2 + $0x29]]  ;;  %v1904_v26 = vld [vmem:[%s3669_s1 + $0x15] sm:$0xff]  ;;  %v1924_v33 = vld [vmem:[%s3669_s1 + $0x5] sm:$0xff]  ;;  %v1973_v48 = vld [vmem:[%s3669_s1 + $0x1d] sm:$0xff] }
  0x1a   :  { %v1831_v4 = vstv %s1480_s26  ;;  %s1838_s17 = sld [smem:[#allocation2 + $0x31]]  ;;  %v1909_v27 = vld [vmem:[%s3669_s1 + $0x16] sm:$0xff]  ;;  %v1929_v34 = vld [vmem:[%s3669_s1 + $0x6] sm:$0xff]  ;;  %v2006_v60 = vld [vmem:[%s3669_s1 + $0x1e] sm:$0xff] }
  0x1b   :  { %v47_v8 = vmul.f32 %v1831_v4, %v1812_v0  ;;  %v1852_v9 = vstv %s1488_s27  ;;  %s1859_s24 = sld [smem:[#allocation2 + $0x39]]  ;;  %v45_v11 = vmul.f32 %v1831_v4, %v1817_v1  ;;  %v48_v22 = vmul.f32 %v1831_v4, %v1848_v7  ;;  %v1941_v38 = vld [vmem:[%s3669_s1 + $0x17] sm:$0xff]  ;;  %v1948_v41 = vld [vmem:[%s3669_s1 + $0x7] sm:$0xff]  ;;  %v2011_v61 = vld [vmem:[%s3669_s1 + $0x1f] sm:$0xff]  ;;  %s3680_s27 = smov 125  }
  0x1c   :  { %v103_v12 = vmul.f32 %v1852_v9, %v1822_v2  ;;  %v1865_v13 = vstv %s1496_s28  ;;  %v101_v15 = vmul.f32 %v1852_v9, %v1829_v3  ;;  %v104_v35 = vmul.f32 %v1852_v9, %v1882_v17  ;;  %s1933_s20 = sld [smem:[#allocation2 + $0x2]]  ;;  %v1983_v53 = vld [vmem:[%s3669_s1 + $0x8] sm:$0xff] }
  0x1d   :  { %v187_v18 = vmul.f32 %v1865_v13, %v1836_v5  ;;  %v1886_v19 = vstv %s1504_s29  ;;  %v185_v20 = vmul.f32 %v1865_v13, %v1843_v6  ;;  %v188_v46 = vmul.f32 %v1865_v13, %v1914_v29  ;;  %s1975_s28 = sld [smem:[#allocation2 + $0x12]]  ;;  %v1988_v54 = vld [vmem:[%s3669_s1 + $0x9] sm:$0xff] }
  0x1e   :  { %v107_v23 = vadd.f32 %v103_v12, %v47_v8  ;;  %v271_v24 = vmul.f32 %v1886_v19, %v1857_v10  ;;  %v1899_v25 = vstv %s1512_s0  ;;  %v105_v28 = vadd.f32 %v101_v15, %v45_v11  ;;  %v1993_v55 = vld [vmem:[%s3669_s1 + $0xa] sm:$0xff]  ;;  %s1995_s14 = sld [smem:[#allocation2 + $0x1a]] }
  0x1f   :  { %v355_v30 = vmul.f32 %v1899_v25, %v1870_v14  ;;  %v436_v31 = vstv %s1824_s12  ;;  %v269_v32 = vmul.f32 %v1886_v19, %v1877_v16  ;;  %v353_v40 = vmul.f32 %v1899_v25, %v1893_v21  ;;  %s2013_s19 = sld [smem:[#allocation2 + $0x22]]  ;;  %v2021_v12 = vld [vmem:[%s3669_s1 + $0xb] sm:$0xff] }
  0x20   :  { %v191_v36 = vadd.f32 %v187_v18, %v107_v23  ;;  %v1936_v37 = vstv %s1838_s17  ;;  %v189_v39 = vadd.f32 %v185_v20, %v105_v28  ;;  %s1955_s17 = sld [smem:[#allocation2 + $0xa]]  ;;  %v439_v43 = vmul.f32 %v436_v31, %v1904_v26  ;;  %v2026_v15 = vld [vmem:[%s3669_s1 + $0xc] sm:$0xff] }
  0x21   :  { %v523_v44 = vmul.f32 %v1936_v37, %v1909_v27  ;;  %v1961_v45 = vstv %s1859_s24  ;;  %v437_v51 = vmul.f32 %v436_v31, %v1924_v33  ;;  %v521_v52 = vmul.f32 %v1936_v37, %v1929_v34  ;;  %s2028_s25 = sld [smem:[#allocation2 + $0x2a]] }
  0x22   :  { %v275_v49 = vadd.f32 %v271_v24, %v191_v36  ;;  %v273_v50 = vadd.f32 %v269_v32, %v189_v39  ;;  %v607_v56 = vmul.f32 %v1961_v45, %v1941_v38  ;;  %v605_v57 = vmul.f32 %v1961_v45, %v1948_v41  ;;  %v2039_v24 = vld [vmem:[%s3669_s1 + $0xd] sm:$0xff]  ;;  %s2041_s30 = sld [smem:[#allocation2 + $0x32]] }
  0x23   :  { %v108_v58 = vadd.f32 %v104_v35, %v48_v22  ;;  %v272_v59 = vmul.f32 %v1886_v19, %v1953_v42  ;;  %v356_v8 = vmul.f32 %v1899_v25, %v1968_v47  ;;  %v440_v11 = vmul.f32 %v436_v31, %v1973_v48  ;;  %s2047_s7 = sld [smem:[#allocation2 + $0x3a]] }
  0x24   :  { %v359_v62 = vadd.f32 %v355_v30, %v275_v49  ;;  %v357_v63 = vadd.f32 %v353_v40, %v273_v50  ;;  %v46_v20 = vmul.f32 %v1831_v4, %v1983_v53  ;;  %v102_v22 = vmul.f32 %v1852_v9, %v1988_v54  ;;  %s2103_s29 = sld [smem:[#allocation2 + $0xb]] }
  0x25   :  { %v192_v18 = vadd.f32 %v188_v46, %v108_v58  ;;  %v186_v23 = vmul.f32 %v1865_v13, %v1993_v55  ;;  %v524_v4 = vmul.f32 %v1936_v37, %v2006_v60  ;;  %v608_v9 = vmul.f32 %v1961_v45, %v2011_v61  ;;  %s2110_s10 = sld [smem:[#allocation2 + $0x13]] }
  0x26   :  { %v443_v28 = vadd.f32 %v439_v43, %v359_v62  ;;  %v441_v30 = vadd.f32 %v437_v51, %v357_v63  ;;  %v106_v13 = vadd.f32 %v102_v22, %v46_v20  ;;  %v270_v35 = vmul.f32 %v1886_v19, %v2021_v12  ;;  %v2073_v63 = vld [vmem:[%s3669_s1 + $0xf] sm:$0xff]  ;;  %s2115_s11 = sld [smem:[#allocation2 + $0x1b]] }
  0x27   :  { %v276_v32 = vadd.f32 %v272_v59, %v192_v18  ;;  %v354_v36 = vmul.f32 %v1899_v25, %v2026_v15  ;;  %v438_v43 = vmul.f32 %v436_v31, %v2039_v24  ;;  %v2055_v46 = vstv %s1933_s20  ;;  %v2065_v25 = vld [vmem:[%s3669_s1 + $0xe] sm:$0xff]  ;;  %s2122_s13 = sld [smem:[#allocation2 + $0x23]] }
  0x28   :  { %v527_v39 = vadd.f32 %v523_v44, %v443_v28  ;;  %v525_v40 = vadd.f32 %v521_v52, %v441_v30  ;;  %v190_v50 = vadd.f32 %v186_v23, %v106_v13  ;;  %v52_v51 = vmul.f32 %v2055_v46, %v1983_v53  ;;  %s2137_s15 = sld [smem:[#allocation2 + $0x33]] }
  0x29   :  { %v360_v49 = vadd.f32 %v356_v8, %v276_v32  ;;  %v2060_v58 = vstv %s1955_s17  ;;  %v194_v44 = vstv %s1975_s28  ;;  %s3682_s17 = smov 127   ;;  %v446_v20 = vstv %s2028_s25  ;;  %s2096_s28 = sld [smem:[#allocation2 + $0x3]] }
  0x2a   :  { %v611_v59 = vadd.f32 %v607_v56, %v527_v39  ;;  %v609_v19 = vadd.f32 %v605_v57, %v525_v40  ;;  %v112_v31 = vmul.f32 %v2060_v58, %v1988_v54  ;;  %v274_v62 = vadd.f32 %v270_v35, %v190_v50  ;;  %s2144_s0 = sld [smem:[#allocation2 + $0x3b]] }
  0x2b   :  { %v444_v52 = vadd.f32 %v440_v11, %v360_v49  ;;  %v196_v56 = vmul.f32 %v194_v44, %v1993_v55  ;;  %v278_v57 = vstv %s1995_s14  ;;  %v362_v11 = vstv %s2013_s19  ;;  %s2132_s14 = sld [smem:[#allocation2 + $0x2b]] }
  0x2c   :  { %677 = vrot.lane.b32.xlu1 %v611_v59, %s3682_s17  ;;  %673 = vrot.lane.b32.xlu0 %v609_v19, %s3682_s17  ;;  %v116_v8 = vadd.f32 %v112_v31, %v52_v51  ;;  %v280_v18 = vmul.f32 %v278_v57, %v2021_v12  ;;  %v358_v23 = vadd.f32 %v354_v36, %v274_v62  ;;  %v2086_v13 = vstv %s2041_s30  ;;  %s2189_s18 = sld [smem:[#allocation2 + $0x4]] }
  0x2d   :  { %v528_v22 = vadd.f32 %v524_v4, %v444_v52  ;;  %v522_v28 = vmul.f32 %v1936_v37, %v2065_v25  ;;  %v364_v30 = vmul.f32 %v362_v11, %v2026_v15  ;;  %v2089_v35 = vstv %s2047_s7  ;;  %s2196_s19 = sld [smem:[#allocation2 + $0xc]] }
  0x2e   :  { %v200_v32 = vadd.f32 %v196_v56, %v116_v8  ;;  %v51_v39 = vmul.f32 %v2055_v46, %v1817_v1  ;;  %v442_v49 = vadd.f32 %v438_v43, %v358_v23  ;;  %v606_v50 = vmul.f32 %v1961_v45, %v2073_v63  ;;  %s2202_s12 = sld [smem:[#allocation2 + $0x14]] }
  0x2f   :  { %v612_v40 = vadd.f32 %v608_v9, %v528_v22  ;;  %v448_v4 = vmul.f32 %v446_v20, %v2039_v24  ;;  %v532_v36 = vmul.f32 %v2086_v13, %v2065_v25  ;;  %v111_v51 = vmul.f32 %v2060_v58, %v1829_v3  ;;  %s2211_s21 = sld [smem:[#allocation2 + $0x1c]] }
  0x30   :  { %v284_v37 = vadd.f32 %v280_v18, %v200_v32  ;;  %v195_v59 = vmul.f32 %v194_v44, %v1843_v6  ;;  %v526_v9 = vadd.f32 %v522_v28, %v442_v49  ;;  %v616_v45 = vmul.f32 %v2089_v35, %v2073_v63  ;;  %s2216_s22 = sld [smem:[#allocation2 + $0x24]] }
  0x31   :  { %679 = vrot.lane.b32.xlu1 %v612_v40, %s3682_s17  ;;  %v279_v43 = vmul.f32 %v278_v57, %v1877_v16  ;;  %v363_v19 = vmul.f32 %v362_v11, %v1893_v21  ;;  %v115_v52 = vadd.f32 %v111_v51, %v51_v39  ;;  %v447_v62 = vmul.f32 %v446_v20, %v1924_v33  ;;  %s2229_s23 = sld [smem:[#allocation2 + $0x2c]] }
  0x32   :  { %v368_v31 = vadd.f32 %v364_v30, %v284_v37  ;;  %v54_v56 = vmul.f32 %v2055_v46, %v1848_v7  ;;  %v610_v8 = vadd.f32 %v606_v50, %v526_v9  ;;  %v531_v18 = vmul.f32 %v2086_v13, %v1929_v34  ;;  %s2236_s25 = sld [smem:[#allocation2 + $0x34]] }
  0x33   :  { %v114_v22 = vmul.f32 %v2060_v58, %v1882_v17  ;;  %v198_v23 = vmul.f32 %v194_v44, %v1914_v29  ;;  %v199_v30 = vadd.f32 %v195_v59, %v115_v52  ;;  %v615_v32 = vmul.f32 %v2089_v35, %v1948_v41  ;;  %s2242_s26 = sld [smem:[#allocation2 + $0x3c]] }
  0x34   :  { %v452_v28 = vadd.f32 %v448_v4, %v368_v31  ;;  %v282_v39 = vmul.f32 %v278_v57, %v1953_v42  ;;  %675 = vrot.lane.b32.xlu0 %v610_v8, %s3682_s17  ;;  %v366_v49 = vmul.f32 %v362_v11, %v1968_v47  ;;  %v450_v50 = vmul.f32 %v446_v20, %v1973_v48  ;;  %s2291_s30 = sld [smem:[#allocation2 + $0x5]] }
  0x35   :  { %v118_v40 = vadd.f32 %v114_v22, %v54_v56  ;;  %v53_v37 = vmul.f32 %v2055_v46, %v1812_v0  ;;  %v283_v4 = vadd.f32 %v279_v43, %v199_v30  ;;  %v113_v59 = vmul.f32 %v2060_v58, %v1822_v2  ;;  %s2298_s7 = sld [smem:[#allocation2 + $0xd]] }
  0x36   :  { %v536_v51 = vadd.f32 %v532_v36, %v452_v28  ;;  %v197_v9 = vmul.f32 %v194_v44, %v1836_v5  ;;  %v534_v52 = vmul.f32 %v2086_v13, %v2006_v60  ;;  %v618_v46 = vmul.f32 %v2089_v35, %v2011_v61  ;;  %s2304_s8 = sld [smem:[#allocation2 + $0x15]] }
  0x37   :  { %v202_v31 = vadd.f32 %v198_v23, %v118_v40  ;;  %v281_v56 = vmul.f32 %v278_v57, %v1857_v10  ;;  %v367_v43 = vadd.f32 %v363_v19, %v283_v4  ;;  %v117_v58 = vadd.f32 %v113_v59, %v53_v37  ;;  %s2313_s24 = sld [smem:[#allocation2 + $0x1d]] }
  0x38   :  { %v620_v36 = vadd.f32 %v616_v45, %v536_v51  ;;  %v365_v44 = vmul.f32 %v362_v11, %v1870_v14  ;;  %v449_v22 = vmul.f32 %v446_v20, %v1904_v26  ;;  %v2149_v23 = vstv %s2096_s28  ;;  %s2318_s20 = sld [smem:[#allocation2 + $0x25]] }
  0x39   :  { %v286_v8 = vadd.f32 %v282_v39, %v202_v31  ;;  %v2152_v28 = vstv %s2103_s29  ;;  %v451_v57 = vadd.f32 %v447_v62, %v367_v43  ;;  %v201_v30 = vadd.f32 %v197_v9, %v117_v58  ;;  %s2331_s9 = sld [smem:[#allocation2 + $0x2d]] }
  0x3a   :  { %683 = vrot.lane.b32.xlu1 %v620_v36, %s3679_s16  ;;  %v58_v45 = vmul.f32 %v2149_v23, %v1983_v53  ;;  %v122_v19 = vmul.f32 %v2152_v28, %v1988_v54  ;;  %v204_v39 = vstv %s2110_s10  ;;  %v2161_v20 = vstv %s2115_s11  ;;  %s2338_s28 = sld [smem:[#allocation2 + $0x35]]  ;;  %s3681_s10 = smov 124  }
  0x3b   :  { %v370_v11 = vadd.f32 %v366_v49, %v286_v8  ;;  %v2164_v40 = vstv %s2122_s13  ;;  %v535_v37 = vadd.f32 %v531_v18, %v451_v57  ;;  %v285_v51 = vadd.f32 %v281_v56, %v201_v30  ;;  %s2344_s29 = sld [smem:[#allocation2 + $0x3d]] }
  0x3c   :  { %v126_v4 = vadd.f32 %v122_v19, %v58_v45  ;;  %v206_v62 = vmul.f32 %v204_v39, %v1993_v55  ;;  %v533_v9 = vmul.f32 %v2086_v13, %v1909_v27  ;;  %v290_v31 = vmul.f32 %v2161_v20, %v2021_v12  ;;  %s2393_s11 = sld [smem:[#allocation2 + $0x6]] }
  0x3d   :  { %v454_v59 = vadd.f32 %v450_v50, %v370_v11  ;;  %v2172_v49 = vstv %s2132_s14  ;;  %v619_v36 = vadd.f32 %v615_v32, %v535_v37  ;;  %v369_v43 = vadd.f32 %v365_v44, %v285_v51  ;;  %s2400_s13 = sld [smem:[#allocation2 + $0xe]] }
  0x3e   :  { %v210_v58 = vadd.f32 %v206_v62, %v126_v4  ;;  %v374_v8 = vmul.f32 %v2164_v40, %v2026_v15  ;;  %v2177_v56 = vstv %s2137_s15  ;;  %v2180_v57 = vstv %s2144_s0  ;;  %s2406_s14 = sld [smem:[#allocation2 + $0x16]] }
  0x3f   :  { %v538_v18 = vadd.f32 %v534_v52, %v454_v59  ;;  %v57_v50 = vmul.f32 %v2149_v23, %v1817_v1  ;;  %681 = vrot.lane.b32.xlu0 %v619_v36, %s3679_s16  ;;  %v453_v13 = vadd.f32 %v449_v22, %v369_v43  ;;  %v617_v30 = vmul.f32 %v2089_v35, %v1941_v38  ;;  %s2415_s15 = sld [smem:[#allocation2 + $0x1e]] }
  0x40   :  { %v294_v32 = vadd.f32 %v290_v31, %v210_v58  ;;  %v458_v44 = vmul.f32 %v2172_v49, %v2039_v24  ;;  %v542_v45 = vmul.f32 %v2177_v56, %v2065_v25  ;;  %v121_v19 = vmul.f32 %v2152_v28, %v1829_v3  ;;  %s2420_s0 = sld [smem:[#allocation2 + $0x26]] }
  0x41   :  { %v622_v52 = vadd.f32 %v618_v46, %v538_v18  ;;  %v205_v11 = vmul.f32 %v204_v39, %v1843_v6  ;;  %v537_v22 = vadd.f32 %v533_v9, %v453_v13  ;;  %v626_v35 = vmul.f32 %v2180_v57, %v2073_v63  ;;  %s3145_s4 = sld [smem:[#allocation2 + $0xb3]] }
  0x42   :  { %v378_v37 = vadd.f32 %v374_v8, %v294_v32  ;;  %v289_v51 = vmul.f32 %v2161_v20, %v1877_v16  ;;  %v125_v46 = vadd.f32 %v121_v19, %v57_v50  ;;  %v373_v4 = vmul.f32 %v2164_v40, %v1893_v21  ;;  %s3182_s5 = sld [smem:[#allocation2 + $0x94]] }
  0x43   :  { %687 = vrot.lane.b32.xlu1 %v622_v52, %s3679_s16  ;;  %v457_v62 = vmul.f32 %v2172_v49, %v1924_v33  ;;  %v60_v59 = vmul.f32 %v2149_v23, %v1848_v7  ;;  %v621_v9 = vadd.f32 %v617_v30, %v537_v22  ;;  %v124_v36 = vmul.f32 %v2152_v28, %v1882_v17 }
  0x44   :  { %v462_v31 = vadd.f32 %v458_v44, %v378_v37  ;;  %v208_v43 = vmul.f32 %v204_v39, %v1914_v29  ;;  %v209_v58 = vadd.f32 %v205_v11, %v125_v46  ;;  %v541_v8 = vmul.f32 %v2177_v56, %v1929_v34 }
  0x45   :  { %v625_v18 = vmul.f32 %v2180_v57, %v1948_v41  ;;  %v292_v50 = vmul.f32 %v2161_v20, %v1953_v42  ;;  %685 = vrot.lane.b32.xlu0 %v621_v9, %s3679_s16  ;;  %v128_v30 = vadd.f32 %v124_v36, %v60_v59  ;;  %v376_v32 = vmul.f32 %v2164_v40, %v1968_v47 }
  0x46   :  { %v546_v13 = vadd.f32 %v542_v45, %v462_v31  ;;  %v460_v44 = vmul.f32 %v2172_v49, %v1973_v48  ;;  %v293_v52 = vadd.f32 %v289_v51, %v209_v58  ;;  %v59_v19 = vmul.f32 %v2149_v23, %v1812_v0 }
  0x47   :  { %v123_v11 = vmul.f32 %v2152_v28, %v1822_v2  ;;  %v207_v22 = vmul.f32 %v204_v39, %v1836_v5  ;;  %v212_v37 = vadd.f32 %v208_v43, %v128_v30  ;;  %v544_v46 = vmul.f32 %v2177_v56, %v2006_v60 }
  0x48   :  { %v630_v45 = vadd.f32 %v626_v35, %v546_v13  ;;  %v628_v51 = vmul.f32 %v2180_v57, %v2011_v61  ;;  %v377_v23 = vadd.f32 %v373_v4, %v293_v52  ;;  %v291_v39 = vmul.f32 %v2161_v20, %v1857_v10 }
  0x49   :  { %v127_v28 = vadd.f32 %v123_v11, %v59_v19  ;;  %v375_v35 = vmul.f32 %v2164_v40, %v1870_v14  ;;  %v296_v59 = vadd.f32 %v292_v50, %v212_v37  ;;  %v459_v9 = vmul.f32 %v2172_v49, %v1904_v26 }
  0x4a   :  { %691 = vrot.lane.b32.xlu1 %v630_v45, %s3680_s27  ;;  %v2252_v31 = vstv %s2189_s18  ;;  %v2255_v36 = vstv %s2196_s19  ;;  %v461_v4 = vadd.f32 %v457_v62, %v377_v23  ;;  %v214_v13 = vstv %s2202_s12  ;;  %s2433_s18 = sld [smem:[#allocation2 + $0x2e]] }
  0x4b   :  { %v211_v43 = vadd.f32 %v207_v22, %v127_v28  ;;  %v64_v20 = vmul.f32 %v2252_v31, %v1983_v53  ;;  %v132_v40 = vmul.f32 %v2255_v36, %v1988_v54  ;;  %v380_v58 = vadd.f32 %v376_v32, %v296_v59  ;;  %s2440_s19 = sld [smem:[#allocation2 + $0x36]] }
  0x4c   :  { %v2263_v50 = vstv %s2211_s21  ;;  %v2266_v49 = vstv %s2216_s22  ;;  %v545_v30 = vadd.f32 %v541_v8, %v461_v4  ;;  %v216_v62 = vmul.f32 %v214_v13, %v1993_v55  ;;  %s2446_s12 = sld [smem:[#allocation2 + $0x3e]]  ;;  %s3677_s21 = smov 123  }
  0x4d   :  { %v295_v52 = vadd.f32 %v291_v39, %v211_v43  ;;  %v136_v19 = vadd.f32 %v132_v40, %v64_v20  ;;  %v464_v11 = vadd.f32 %v460_v44, %v380_v58  ;;  %v543_v22 = vmul.f32 %v2177_v56, %v1909_v27  ;;  %s2495_s22 = sld [smem:[#allocation2 + $0x7]] }
  0x4e   :  { %v300_v45 = vmul.f32 %v2263_v50, %v2021_v12  ;;  %v2274_v32 = vstv %s2229_s23  ;;  %v629_v37 = vadd.f32 %v625_v18, %v545_v30  ;;  %v384_v59 = vmul.f32 %v2266_v49, %v2026_v15  ;;  %s2502_s23 = sld [smem:[#allocation2 + $0xf]] }
  0x4f   :  { %v379_v23 = vadd.f32 %v375_v35, %v295_v52  ;;  %v220_v28 = vadd.f32 %v216_v62, %v136_v19  ;;  %v548_v8 = vadd.f32 %v544_v46, %v464_v11  ;;  %v2279_v39 = vstv %s2236_s25  ;;  %s2508_s25 = sld [smem:[#allocation2 + $0x17]] }
  0x50   :  { %v2282_v4 = vstv %s2242_s26  ;;  %v63_v44 = vmul.f32 %v2252_v31, %v1817_v1  ;;  %689 = vrot.lane.b32.xlu0 %v629_v37, %s3680_s27  ;;  %v627_v43 = vmul.f32 %v2180_v57, %v1941_v38  ;;  %v468_v35 = vmul.f32 %v2274_v32, %v2039_v24  ;;  %s2517_s26 = sld [smem:[#allocation2 + $0x1f]] }
  0x51   :  { %v463_v56 = vadd.f32 %v459_v9, %v379_v23  ;;  %v304_v18 = vadd.f32 %v300_v45, %v220_v28  ;;  %v632_v46 = vadd.f32 %v628_v51, %v548_v8  ;;  %v552_v20 = vmul.f32 %v2279_v39, %v2065_v25 }
  0x52   :  { %v131_v40 = vmul.f32 %v2255_v36, %v1829_v3  ;;  %v215_v58 = vmul.f32 %v214_v13, %v1843_v6  ;;  %v636_v57 = vmul.f32 %v2282_v4, %v2073_v63  ;;  %v299_v52 = vmul.f32 %v2263_v50, %v1877_v16 }
  0x53   :  { %v547_v9 = vadd.f32 %v543_v22, %v463_v56  ;;  %v388_v30 = vadd.f32 %v384_v59, %v304_v18  ;;  %695 = vrot.lane.b32.xlu1 %v632_v46, %s3680_s27  ;;  %v383_v19 = vmul.f32 %v2266_v49, %v1893_v21  ;;  %v467_v62 = vmul.f32 %v2274_v32, %v1924_v33 }
  0x54   :  { %v135_v51 = vadd.f32 %v131_v40, %v63_v44  ;;  %v66_v11 = vmul.f32 %v2252_v31, %v1848_v7  ;;  %v134_v37 = vmul.f32 %v2255_v36, %v1882_v17  ;;  %v218_v23 = vmul.f32 %v214_v13, %v1914_v29 }
  0x55   :  { %v631_v22 = vadd.f32 %v627_v43, %v547_v9  ;;  %v472_v45 = vadd.f32 %v468_v35, %v388_v30  ;;  %v551_v59 = vmul.f32 %v2279_v39, %v1929_v34  ;;  %v635_v8 = vmul.f32 %v2282_v4, %v1948_v41 }
  0x56   :  { %v219_v28 = vadd.f32 %v215_v58, %v135_v51  ;;  %v302_v44 = vmul.f32 %v2263_v50, %v1953_v42  ;;  %v138_v43 = vadd.f32 %v134_v37, %v66_v11  ;;  %v386_v18 = vmul.f32 %v2266_v49, %v1968_v47 }
  0x57   :  { %693 = vrot.lane.b32.xlu0 %v631_v22, %s3680_s27  ;;  %v556_v56 = vadd.f32 %v552_v20, %v472_v45  ;;  %v470_v35 = vmul.f32 %v2274_v32, %v1973_v48  ;;  %v65_v40 = vmul.f32 %v2252_v31, %v1812_v0  ;;  %v133_v58 = vmul.f32 %v2255_v36, %v1822_v2 }
  0x58   :  { %v303_v46 = vadd.f32 %v299_v52, %v219_v28  ;;  %v217_v9 = vmul.f32 %v214_v13, %v1836_v5  ;;  %v222_v30 = vadd.f32 %v218_v23, %v138_v43  ;;  %v554_v51 = vmul.f32 %v2279_v39, %v2006_v60 }
  0x59   :  { %v640_v20 = vadd.f32 %v636_v57, %v556_v56  ;;  %v638_v52 = vmul.f32 %v2282_v4, %v2011_v61  ;;  %v137_v36 = vadd.f32 %v133_v58, %v65_v40  ;;  %v301_v13 = vmul.f32 %v2263_v50, %v1857_v10 }
  0x5a   :  { %v387_v31 = vadd.f32 %v383_v19, %v303_v46  ;;  %v385_v57 = vmul.f32 %v2266_v49, %v1870_v14  ;;  %v306_v11 = vadd.f32 %v302_v44, %v222_v30  ;;  %v469_v22 = vmul.f32 %v2274_v32, %v1904_v26 }
  0x5b   :  { %699 = vrot.lane.b32.xlu1 %v640_v20, %s3681_s10  ;;  %v2354_v45 = vstv %s2291_s30  ;;  %v2357_v37 = vstv %s2298_s7  ;;  %v221_v23 = vadd.f32 %v217_v9, %v137_v36  ;;  %v224_v56 = vstv %s2304_s8  ;;  %s2522_s30 = sld [smem:[#allocation2 + $0x27]] }
  0x5c   :  { %v471_v19 = vadd.f32 %v467_v62, %v387_v31  ;;  %v70_v50 = vmul.f32 %v2354_v45, %v1983_v53  ;;  %v142_v49 = vmul.f32 %v2357_v37, %v1988_v54  ;;  %v390_v28 = vadd.f32 %v386_v18, %v306_v11  ;;  %s2535_s7 = sld [smem:[#allocation2 + $0x2f]] }
  0x5d   :  { %v2365_v44 = vstv %s2313_s24  ;;  %v2368_v32 = vstv %s2318_s20  ;;  %v305_v46 = vadd.f32 %v301_v13, %v221_v23  ;;  %v226_v62 = vmul.f32 %v224_v56, %v1993_v55  ;;  %s2542_s8 = sld [smem:[#allocation2 + $0x37]]  ;;  %s3675_s20 = smov 122  }
  0x5e   :  { %v555_v43 = vadd.f32 %v551_v59, %v471_v19  ;;  %v146_v40 = vadd.f32 %v142_v49, %v70_v50  ;;  %v474_v58 = vadd.f32 %v470_v35, %v390_v28  ;;  %v553_v9 = vmul.f32 %v2279_v39, %v1909_v27  ;;  %s2548_s24 = sld [smem:[#allocation2 + $0x3f]] }
  0x5f   :  { %v310_v20 = vmul.f32 %v2365_v44, %v2021_v12  ;;  %v2376_v18 = vstv %s2331_s9  ;;  %v389_v31 = vadd.f32 %v385_v57, %v305_v46  ;;  %v394_v11 = vmul.f32 %v2368_v32, %v2026_v15  ;;  %s2587_s9 = sld [smem:[#allocation2 + $0x41]] }
  0x60   :  { %v639_v30 = vadd.f32 %v635_v8, %v555_v43  ;;  %v230_v36 = vadd.f32 %v226_v62, %v146_v40  ;;  %v558_v59 = vadd.f32 %v554_v51, %v474_v58  ;;  %v2381_v13 = vstv %s2338_s28  ;;  %s2641_s28 = sld [smem:[#allocation2 + $0x69]] }
  0x61   :  { %v2384_v19 = vstv %s2344_s29  ;;  %v69_v35 = vmul.f32 %v2354_v45, %v1817_v1  ;;  %v473_v39 = vadd.f32 %v469_v22, %v389_v31  ;;  %v637_v23 = vmul.f32 %v2282_v4, %v1941_v38  ;;  %s2720_s29 = sld [smem:[#allocation2 + $0x5a]] }
  0x62   :  { %697 = vrot.lane.b32.xlu0 %v639_v30, %s3681_s10  ;;  %v314_v8 = vadd.f32 %v310_v20, %v230_v36  ;;  %v478_v57 = vmul.f32 %v2376_v18, %v2039_v24  ;;  %v642_v51 = vadd.f32 %v638_v52, %v558_v59  ;;  %v562_v50 = vmul.f32 %v2381_v13, %v2065_v25 }
  0x63   :  { %v141_v49 = vmul.f32 %v2357_v37, %v1829_v3  ;;  %v225_v28 = vmul.f32 %v224_v56, %v1843_v6  ;;  %v557_v22 = vadd.f32 %v553_v9, %v473_v39  ;;  %v646_v4 = vmul.f32 %v2384_v19, %v2073_v63 }
  0x64   :  { %v398_v43 = vadd.f32 %v394_v11, %v314_v8  ;;  %v309_v46 = vmul.f32 %v2365_v44, %v1877_v16  ;;  %703 = vrot.lane.b32.xlu1 %v642_v51, %s3681_s10  ;;  %v393_v40 = vmul.f32 %v2368_v32, %v1893_v21  ;;  %v477_v62 = vmul.f32 %v2376_v18, %v1924_v33 }
  0x65   :  { %v145_v52 = vadd.f32 %v141_v49, %v69_v35  ;;  %v72_v58 = vmul.f32 %v2354_v45, %v1848_v7  ;;  %v641_v9 = vadd.f32 %v637_v23, %v557_v22  ;;  %v144_v30 = vmul.f32 %v2357_v37, %v1882_v17 }
  0x66   :  { %v482_v20 = vadd.f32 %v478_v57, %v398_v43  ;;  %v228_v31 = vmul.f32 %v224_v56, %v1914_v29  ;;  %v561_v11 = vmul.f32 %v2381_v13, %v1929_v34  ;;  %v645_v59 = vmul.f32 %v2384_v19, %v1948_v41 }
  0x67   :  { %v229_v36 = vadd.f32 %v225_v28, %v145_v52  ;;  %v312_v35 = vmul.f32 %v2365_v44, %v1953_v42  ;;  %701 = vrot.lane.b32.xlu0 %v641_v9, %s3681_s10  ;;  %v148_v23 = vadd.f32 %v144_v30, %v72_v58  ;;  %v396_v8 = vmul.f32 %v2368_v32, %v1968_v47 }
  0x68   :  { %v566_v39 = vadd.f32 %v562_v50, %v482_v20  ;;  %v480_v57 = vmul.f32 %v2376_v18, %v1973_v48  ;;  %v71_v49 = vmul.f32 %v2354_v45, %v1812_v0  ;;  %v143_v28 = vmul.f32 %v2357_v37, %v1822_v2 }
  0x69   :  { %v313_v51 = vadd.f32 %v309_v46, %v229_v36  ;;  %v227_v22 = vmul.f32 %v224_v56, %v1836_v5  ;;  %v232_v43 = vadd.f32 %v228_v31, %v148_v23  ;;  %v564_v52 = vmul.f32 %v2381_v13, %v2006_v60 }
  0x6a   :  { %v650_v50 = vadd.f32 %v646_v4, %v566_v39  ;;  %v648_v46 = vmul.f32 %v2384_v19, %v2011_v61  ;;  %v147_v37 = vadd.f32 %v143_v28, %v71_v49  ;;  %v311_v56 = vmul.f32 %v2365_v44, %v1857_v10 }
  0x6b   :  { %v397_v45 = vadd.f32 %v393_v40, %v313_v51  ;;  %v395_v4 = vmul.f32 %v2368_v32, %v1870_v14  ;;  %v316_v58 = vadd.f32 %v312_v35, %v232_v43  ;;  %v479_v9 = vmul.f32 %v2376_v18, %v1904_v26 }
  0x6c   :  { %707 = vrot.lane.b32.xlu1 %v650_v50, %s3677_s21  ;;  %v2456_v20 = vstv %s2393_s11  ;;  %v2459_v30 = vstv %s2400_s13  ;;  %v231_v31 = vadd.f32 %v227_v22, %v147_v37  ;;  %v234_v39 = vstv %s2406_s14  ;;  %s2599_s11 = sld [smem:[#allocation2 + $0x49]]  ;;  %s3683_s14 = smov 121  }
  0x6d   :  { %v481_v40 = vadd.f32 %v477_v62, %v397_v45  ;;  %v76_v44 = vmul.f32 %v2456_v20, %v1983_v53  ;;  %v152_v32 = vmul.f32 %v2459_v30, %v1988_v54  ;;  %v400_v36 = vadd.f32 %v396_v8, %v316_v58  ;;  %s2606_s13 = sld [smem:[#allocation2 + $0x51]] }
  0x6e   :  { %v2467_v35 = vstv %s2415_s15  ;;  %v2470_v18 = vstv %s2420_s0  ;;  %v315_v51 = vadd.f32 %v311_v56, %v231_v31  ;;  %v236_v62 = vmul.f32 %v234_v39, %v1993_v55  ;;  %s2678_s0 = sld [smem:[#allocation2 + $0x42]] }
  0x6f   :  { %v565_v23 = vadd.f32 %v561_v11, %v481_v40  ;;  %v156_v49 = vadd.f32 %v152_v32, %v76_v44  ;;  %v484_v28 = vadd.f32 %v480_v57, %v400_v36  ;;  %v563_v22 = vmul.f32 %v2381_v13, %v1909_v27  ;;  %s2900_s15 = sld [smem:[#allocation2 + $0x45]] }
  0x70   :  { %v320_v50 = vmul.f32 %v2467_v35, %v2021_v12  ;;  %v2478_v8 = vstv %s2433_s18  ;;  %v399_v45 = vadd.f32 %v395_v4, %v315_v51  ;;  %v404_v58 = vmul.f32 %v2470_v18, %v2026_v15  ;;  %s2651_s18 = sld [smem:[#allocation2 + $0x71]] }
  0x71   :  { %v649_v43 = vadd.f32 %v645_v59, %v565_v23  ;;  %v240_v37 = vadd.f32 %v236_v62, %v156_v49  ;;  %v568_v11 = vadd.f32 %v564_v52, %v484_v28  ;;  %v2483_v56 = vstv %s2440_s19  ;;  %s2618_s19 = sld [smem:[#allocation2 + $0x59]] }
  0x72   :  { %v2486_v40 = vstv %s2446_s12  ;;  %v75_v57 = vmul.f32 %v2456_v20, %v1817_v1  ;;  %v483_v13 = vadd.f32 %v479_v9, %v399_v45  ;;  %v647_v31 = vmul.f32 %v2384_v19, %v1941_v38  ;;  %s2774_s12 = sld [smem:[#allocation2 + $0x43]] }
  0x73   :  { %705 = vrot.lane.b32.xlu0 %v649_v43, %s3677_s21  ;;  %v324_v59 = vadd.f32 %v320_v50, %v240_v37  ;;  %v488_v4 = vmul.f32 %v2478_v8, %v2039_v24  ;;  %v652_v52 = vadd.f32 %v648_v46, %v568_v11  ;;  %v572_v44 = vmul.f32 %v2483_v56, %v2065_v25 }
  0x74   :  { %v151_v32 = vmul.f32 %v2459_v30, %v1829_v3  ;;  %v235_v1 = vmul.f32 %v234_v39, %v1843_v6  ;;  %v567_v9 = vadd.f32 %v563_v22, %v483_v13  ;;  %v656_v19 = vmul.f32 %v2486_v40, %v2073_v63 }
  0x75   :  { %v408_v36 = vadd.f32 %v404_v58, %v324_v59  ;;  %v319_v23 = vmul.f32 %v2467_v35, %v1877_v16  ;;  %711 = vrot.lane.b32.xlu1 %v652_v52, %s3677_s21  ;;  %v403_v3 = vmul.f32 %v2470_v18, %v1893_v21  ;;  %v487_v6 = vmul.f32 %v2478_v8, %v1924_v33 }
  0x76   :  { %v155_v46 = vadd.f32 %v151_v32, %v75_v57  ;;  %v78_v51 = vmul.f32 %v2456_v20, %v1848_v7  ;;  %v651_v49 = vadd.f32 %v647_v31, %v567_v9  ;;  %v154_v16 = vmul.f32 %v2459_v30, %v1882_v17 }
  0x77   :  { %v492_v62 = vadd.f32 %v488_v4, %v408_v36  ;;  %v238_v28 = vmul.f32 %v234_v39, %v1914_v29  ;;  %v571_v21 = vmul.f32 %v2483_v56, %v1929_v34  ;;  %v655_v33 = vmul.f32 %v2486_v40, %v1948_v41 }
  0x78   :  { %v239_v22 = vadd.f32 %v235_v1, %v155_v46  ;;  %v322_v7 = vmul.f32 %v2467_v35, %v1953_v42  ;;  %709 = vrot.lane.b32.xlu0 %v651_v49, %s3677_s21  ;;  %v158_v43 = vadd.f32 %v154_v16, %v78_v51  ;;  %v406_v17 = vmul.f32 %v2470_v18, %v1968_v47  ;;  %v1680_v16 = vld [vmem:[%s3669_s1 + $0x1] sm:$0xff]  ;;  %s2847_s21 = sld [smem:[#allocation2 + $0x73]] }
  0x79   :  { %v576_v50 = vadd.f32 %v572_v44, %v492_v62  ;;  %v490_v29 = vmul.f32 %v2478_v8, %v1973_v48  ;;  %v77_v34 = vmul.f32 %v2456_v20, %v1812_v0  ;;  %v153_v41 = vmul.f32 %v2459_v30, %v1822_v2 }
  0x7a   :  { %v323_v45 = vadd.f32 %v319_v23, %v239_v22  ;;  %v237_v42 = vmul.f32 %v234_v39, %v1836_v5  ;;  %v242_v47 = vadd.f32 %v238_v28, %v158_v43  ;;  %v574_v48 = vmul.f32 %v2483_v56, %v2006_v60 }
  0x7b   :  { %v660_v37 = vadd.f32 %v656_v19, %v576_v50  ;;  %v658_v58 = vmul.f32 %v2486_v40, %v2011_v61  ;;  %v157_v2 = vadd.f32 %v153_v41, %v77_v34  ;;  %v321_v5 = vmul.f32 %v2467_v35, %v1857_v10  ;;  %v1683_v50 = vld [vmem:[%s3669_s1 + $0x4] sm:$0xff] }
  0x7c   :  { %v407_v0 = vadd.f32 %v403_v3, %v323_v45  ;;  %v405_v20 = vmul.f32 %v2470_v18, %v1870_v14  ;;  %v326_v30 = vadd.f32 %v322_v7, %v242_v47  ;;  %v489_v39 = vmul.f32 %v2478_v8, %v1904_v26  ;;  %v1687_v47 = vld [vmem:[%s3669_s1 + $0x1a] sm:$0xff] }
  0x7d   :  { %715 = vrot.lane.b32.xlu1 %v660_v37, %s3675_s20  ;;  %v2558_v11 = vstv %s2495_s22  ;;  %v2561_v57 = vstv %s2502_s23  ;;  %v241_v31 = vadd.f32 %v237_v42, %v157_v2  ;;  %v2568_v18 = vstv %s2508_s25  ;;  %s2626_s23 = sld [smem:[#allocation2 + $0x61]] }
  0x7e   :  { %v491_v13 = vadd.f32 %v487_v6, %v407_v0  ;;  %v82_v10 = vmul.f32 %v2558_v11, %v1983_v53  ;;  %v162_v14 = vmul.f32 %v2561_v57, %v1988_v54  ;;  %v410_v35 = vadd.f32 %v406_v17, %v326_v30  ;;  %v1686_v42 = vld [vmem:[%s3669_s1 + $0x19] sm:$0xff]  ;;  %v1688_v0 = vld [vmem:[%s3669_s1 + $0x6] sm:$0xff]  ;;  %s2710_s22 = sld [smem:[#allocation2 + $0x52]] }
  0x7f   :  { %v2571_v59 = vstv %s2517_s26  ;;  %v2574_v26 = vstv %s2522_s30  ;;  %v325_v4 = vadd.f32 %v321_v5, %v241_v31  ;;  %v246_v44 = vmul.f32 %v2568_v18, %v1993_v55  ;;  %v1689_v5 = vld [vmem:[%s3669_s1 + $0x7] sm:$0xff]  ;;  %v1690_v30 = vld [vmem:[%s3669_s1 + $0x1b] sm:$0xff]  ;;  %s2734_s30 = sld [smem:[#allocation2 + $0x62]] }
  0x80   :  { %v575_v8 = vadd.f32 %v571_v21, %v491_v13  ;;  %v166_v52 = vadd.f32 %v162_v14, %v82_v10  ;;  %v494_v32 = vadd.f32 %v490_v29, %v410_v35  ;;  %v573_v53 = vmul.f32 %v2483_v56, %v1909_v27  ;;  %v1679_v27 = vld [vmem:[%s3669_s1] sm:$0xff]  ;;  %v1685_v29 = vld [vmem:[%s3669_s1 + $0x18] sm:$0xff]  ;;  %s2753_s25 = sld [smem:[#allocation2 + $0x72]] }
  0x81   :  { %v330_v54 = vmul.f32 %v2571_v59, %v2021_v12  ;;  %v2583_v1 = vstv %s2535_s7  ;;  %v409_v36 = vadd.f32 %v405_v20, %v325_v4  ;;  %v414_v23 = vmul.f32 %v2574_v26, %v2026_v15  ;;  %v1691_v10 = vld [vmem:[%s3669_s1 + $0x1c] sm:$0xff]  ;;  %s2832_s26 = sld [smem:[#allocation2 + $0x63]] }
  0x82   :  { %v659_v9 = vadd.f32 %v655_v33, %v575_v8  ;;  %v250_v19 = vadd.f32 %v246_v44, %v166_v52  ;;  %v578_v46 = vadd.f32 %v574_v48, %v494_v32  ;;  %v2590_v3 = vstv %s2542_s8  ;;  %s2667_s8 = sld [smem:[#allocation2 + $0x79]]  ;;  %v1692_v35 = vld [vmem:[%s3669_s1 + $0x1d] sm:$0xff]  ;;  %v1693_v52 = vld [vmem:[%s3669_s1 + $0x10] sm:$0xff] }
  0x83   :  { %v2593_v55 = vstv %s2548_s24  ;;  %v81_v12 = vmul.f32 %v1679_v27, %v2558_v11  ;;  %v493_v56 = vadd.f32 %v489_v39, %v409_v36  ;;  %v657_v15 = vmul.f32 %v2486_v40, %v1941_v38  ;;  %v1681_v38 = vld [vmem:[%s3669_s1 + $0x2] sm:$0xff]  ;;  %v1694_v32 = vld [vmem:[%s3669_s1 + $0x11] sm:$0xff]  ;;  %s2692_s24 = sld [smem:[#allocation2 + $0x4a]] }
  0x84   :  { %713 = vrot.lane.b32.xlu0 %v659_v9, %s3675_s20  ;;  %v334_v6 = vadd.f32 %v330_v54, %v250_v19  ;;  %v498_v51 = vmul.f32 %v2583_v1, %v2039_v24  ;;  %v662_v49 = vadd.f32 %v658_v58, %v578_v46  ;;  %v582_v62 = vmul.f32 %v2590_v3, %v2065_v25  ;;  %v1682_v25 = vld [vmem:[%s3669_s1 + $0x3] sm:$0xff]  ;;  %v1695_v54 = vld [vmem:[%s3669_s1 + $0x12] sm:$0xff]  ;;  %s2836_s7 = sld [smem:[#allocation2 + $0x6b]] }
  0x85   :  { %v161_v28 = vmul.f32 %v1680_v16, %v2561_v57  ;;  %v245_v40 = vmul.f32 %v1681_v38, %v2568_v18  ;;  %v577_v24 = vadd.f32 %v573_v53, %v493_v56  ;;  %v666_v21 = vmul.f32 %v2593_v55, %v2073_v63  ;;  %v1684_v63 = vld [vmem:[%s3669_s1 + $0x5] sm:$0xff] }
  0x86   :  { %v418_v22 = vadd.f32 %v414_v23, %v334_v6  ;;  %v329_v33 = vmul.f32 %v1682_v25, %v2571_v59  ;;  %719 = vrot.lane.b32.xlu1 %v662_v49, %s3675_s20  ;;  %v413_v43 = vmul.f32 %v1683_v50, %v2574_v26  ;;  %v497_v17 = vmul.f32 %v1684_v63, %v2583_v1  ;;  %v1698_v6 = vld [vmem:[%s3669_s1 + $0x15] sm:$0xff]  ;;  %v2759_v63 = vld [vmem:[%s3670_s2] sm:$0xff] }
  0x87   :  { %v165_v7 = vadd.f32 %v161_v28, %v81_v12  ;;  %v84_v45 = vmul.f32 %v1685_v29, %v2558_v11  ;;  %v661_v34 = vadd.f32 %v657_v15, %v577_v24  ;;  %v164_v37 = vmul.f32 %v1686_v42, %v2561_v57  ;;  %v1697_v12 = vld [vmem:[%s3669_s1 + $0x14] sm:$0xff] }
  0x88   :  { %v502_v41 = vadd.f32 %v498_v51, %v418_v22  ;;  %v248_v48 = vmul.f32 %v1687_v47, %v2568_v18  ;;  %v581_v2 = vmul.f32 %v1688_v0, %v2590_v3  ;;  %v2661_v20 = vmul.f32 %v1689_v5, %v2593_v55  ;;  %v1699_v29 = vld [vmem:[%s3669_s1 + $0x16] sm:$0xff]  ;;  %v2786_v0 = vld [vmem:[%s3670_s2 + $0x1] sm:$0xff] }
  0x89   :  { %v249_v58 = vadd.f32 %v245_v40, %v165_v7  ;;  %v332_v39 = vmul.f32 %v1690_v30, %v2571_v59  ;;  %717 = vrot.lane.b32.xlu0 %v661_v34, %s3675_s20  ;;  %v168_v31 = vadd.f32 %v164_v37, %v84_v45  ;;  %v416_v14 = vmul.f32 %v1691_v10, %v2574_v26  ;;  %v2741_v40 = vld [vmem:[%s3670_s2 + $0xb] sm:$0xff]  ;;  %s2851_s20 = sld [smem:[#allocation2 + $0x7b]] }
  0x8a   :  { %v586_v13 = vadd.f32 %v582_v62, %v502_v41  ;;  %v500_v8 = vmul.f32 %v1692_v35, %v2583_v1  ;;  %v83_v44 = vmul.f32 %v1693_v52, %v2558_v11  ;;  %v163_v53 = vmul.f32 %v1694_v32, %v2561_v57  ;;  %v2703_v57 = vld [vmem:[%s3670_s2 + $0x8] sm:$0xff] }
  0x8b   :  { %v333_v4 = vadd.f32 %v329_v33, %v249_v58  ;;  %v247_v9 = vmul.f32 %v1695_v54, %v2568_v18  ;;  %v252_v19 = vadd.f32 %v248_v48, %v168_v31  ;;  %v584_v23 = vmul.f32 %v2590_v3, %v2006_v60  ;;  %v2708_v18 = vld [vmem:[%s3670_s2 + $0x9] sm:$0xff] }
  0x8c   :  { %v670_v36 = vadd.f32 %v666_v21, %v586_v13  ;;  %v2698_v11 = vmul.f32 %v2593_v55, %v2011_v61  ;;  %v167_v60 = vadd.f32 %v163_v53, %v83_v44  ;;  %v1696_v61 = vld [vmem:[%s3669_s1 + $0x13] sm:$0xff]  ;;  %v415_v56 = vmul.f32 %v1697_v12, %v2574_v26  ;;  %v2732_v26 = vld [vmem:[%s3670_s2 + $0xa] sm:$0xff] }
  0x8d   :  { %v417_v46 = vadd.f32 %v413_v43, %v333_v4  ;;  %v331_v27 = vmul.f32 %v1696_v61, %v2571_v59  ;;  %v336_v15 = vadd.f32 %v332_v39, %v252_v19  ;;  %v499_v59 = vmul.f32 %v1698_v6, %v2583_v1  ;;  %v2750_v21 = vld [vmem:[%s3670_s2 + $0xc] sm:$0xff]  ;;  %v2806_v31 = vld [vmem:[%s3670_s2 + $0x3] sm:$0xff] }
  0x8e   :  { %723 = vrot.lane.b32.xlu1 %v670_v36, %s3683_s14  ;;  %v768_v51 = vstv %s2587_s9  ;;  %v804_v49 = vstv %s2599_s11  ;;  %v251_v16 = vadd.f32 %v247_v9, %v167_v60  ;;  %s2743_s9 = sld [smem:[#allocation2 + $0x6a]]  ;;  %v854_v24 = vstv %s2606_s13 }
  0x8f   :  { %v501_v62 = vadd.f32 %v497_v17, %v417_v46  ;;  %v770_v28 = vmul.f32 %v768_v51, %v2703_v57  ;;  %v806_v38 = vmul.f32 %v804_v49, %v2708_v18  ;;  %v420_v1 = vadd.f32 %v416_v14, %v336_v15  ;;  %s2761_s13 = sld [smem:[#allocation2 + $0x7a]]  ;;  %v2771_v41 = vld [vmem:[%s3670_s2 + $0xd] sm:$0xff]  ;;  %v1700_v14 = vld [vmem:[%s3669_s1 + $0x17] sm:$0xff]  ;;  %v2819_v52 = vld [vmem:[%s3670_s2 + $0x4] sm:$0xff] }
  0x90   :  { %v904_v22 = vstv %s2618_s19  ;;  %v954_v25 = vstv %s2626_s23  ;;  %v335_v7 = vadd.f32 %v331_v27, %v251_v16  ;;  %v856_v43 = vmul.f32 %v854_v24, %v2732_v26  ;;  %s2793_s11 = sld [smem:[#allocation2 + $0x4b]]  ;;  %v2799_v30 = vld [vmem:[%s3670_s2 + $0xf] sm:$0xff]  ;;  %v2824_v44 = vld [vmem:[%s3670_s2 + $0x5] sm:$0xff] }
  0x91   :  { %v585_v33 = vadd.f32 %v581_v2, %v501_v62  ;;  %v808_v50 = vadd.f32 %v806_v38, %v770_v28  ;;  %v504_v17 = vadd.f32 %v500_v8, %v420_v1  ;;  %v583_v45 = vmul.f32 %v1699_v29, %v2590_v3  ;;  %v2781_v3 = vld [vmem:[%s3670_s2 + $0xe] sm:$0xff]  ;;  %v2791_v2 = vld [vmem:[%s3670_s2 + $0x2] sm:$0xff]  ;;  %s2808_s19 = sld [smem:[#allocation2 + $0x53]] }
  0x92   :  { %v906_v34 = vmul.f32 %v904_v22, %v2741_v40  ;;  %v1004_v42 = vstv %s2641_s28  ;;  %v419_v47 = vadd.f32 %v415_v56, %v335_v7  ;;  %v956_v58 = vmul.f32 %v954_v25, %v2750_v21  ;;  %s2826_s28 = sld [smem:[#allocation2 + $0x5b]]  ;;  %v2844_v61 = vld [vmem:[%s3670_s2 + $0x6] sm:$0xff] }
  0x93   :  { %v669_v37 = vadd.f32 %v2661_v20, %v585_v33  ;;  %v858_v48 = vadd.f32 %v856_v43, %v808_v50  ;;  %v588_v5 = vadd.f32 %v584_v23, %v504_v17  ;;  %v1054_v20 = vstv %s2651_s18  ;;  %s2905_s18 = sld [smem:[#allocation2 + $0x4d]] }
  0x94   :  { %v1104_v39 = vstv %s2667_s8  ;;  %v769_v13 = vmul.f32 %v768_v51, %v2759_v63  ;;  %v503_v10 = vadd.f32 %v499_v59, %v419_v47  ;;  %v667_v35 = vmul.f32 %v1700_v14, %v2593_v55  ;;  %v2856_v51 = vld [vmem:[%s3670_s2 + $0x7] sm:$0xff]  ;;  %s2947_s8 = sld [smem:[#allocation2 + $0x56]] }
  0x95   :  { %721 = vrot.lane.b32.xlu0 %v669_v37, %s3683_s14  ;;  %v908_v8 = vadd.f32 %v906_v34, %v858_v48  ;;  %v1006_v4 = vmul.f32 %v1004_v42, %v2771_v41  ;;  %v672_v32 = vadd.f32 %v2698_v11, %v588_v5  ;;  %v1056_v55 = vmul.f32 %v1054_v20, %v2781_v3  ;;  %s2951_s23 = sld [smem:[#allocation2 + $0x5e]] }
  0x96   :  { %v805_v53 = vmul.f32 %v804_v49, %v2786_v0  ;;  %v855_v54 = vmul.f32 %v854_v24, %v2791_v2  ;;  %v587_v9 = vadd.f32 %v583_v45, %v503_v10  ;;  %v1106_v19 = vmul.f32 %v1104_v39, %v2799_v30  ;;  %s3151_s1 = sld [smem:[#allocation2 + $0xbb]] }
  0x97   :  { %v958_v36 = vadd.f32 %v956_v58, %v908_v8  ;;  %v905_v23 = vmul.f32 %v904_v22, %v2806_v31  ;;  %727 = vrot.lane.b32.xlu1 %v672_v32, %s3683_s14  ;;  %v955_v46 = vmul.f32 %v954_v25, %v2819_v52  ;;  %v1005_v60 = vmul.f32 %v1004_v42, %v2824_v44  ;;  %s3177_s2 = sld [smem:[#allocation2 + $0x8c]] }
  0x98   :  { %v807_v11 = vadd.f32 %v805_v53, %v769_v13  ;;  %v772_v27 = vstv %s2678_s0  ;;  %v671_v12 = vadd.f32 %v667_v35, %v587_v9  ;;  %v810_v6 = vstv %s2692_s24  ;;  %s2861_s0 = sld [smem:[#allocation2 + $0x44]] }
  0x99   :  { %v1008_v56 = vadd.f32 %v1006_v4, %v958_v36  ;;  %v774_v15 = vmul.f32 %v772_v27, %v2703_v57  ;;  %v812_v49 = vmul.f32 %v810_v6, %v2708_v18  ;;  %v860_v62 = vstv %s2710_s22  ;;  %s2867_s24 = sld [smem:[#allocation2 + $0x4c]] }
  0x9a   :  { %v857_v59 = vadd.f32 %v855_v54, %v807_v11  ;;  %v910_v16 = vstv %s2720_s29  ;;  %725 = vrot.lane.b32.xlu0 %v671_v12, %s3683_s14  ;;  %v1055_v38 = vmul.f32 %v1054_v20, %v2844_v61  ;;  %v862_v1 = vmul.f32 %v860_v62, %v2732_v26  ;;  %s2871_s22 = sld [smem:[#allocation2 + $0x54]] }
  0x9b   :  { %v1058_v28 = vadd.f32 %v1056_v55, %v1008_v56  ;;  %v960_v24 = vstv %s2734_s30  ;;  %v814_v25 = vadd.f32 %v812_v49, %v774_v15  ;;  %v912_v33 = vmul.f32 %v910_v16, %v2741_v40  ;;  %s2876_s29 = sld [smem:[#allocation2 + $0x5c]] }
  0x9c   :  { %v907_v22 = vadd.f32 %v905_v23, %v857_v59  ;;  %v1010_v7 = vstv %s2743_s9  ;;  %v1105_v43 = vmul.f32 %v1104_v39, %v2856_v51  ;;  %v1060_v17 = vstv %s2753_s25  ;;  %s2880_s30 = sld [smem:[#allocation2 + $0x64]] }
  0x9d   :  { %v1108_v50 = vadd.f32 %v1106_v19, %v1058_v28  ;;  %v1110_v29 = vstv %s2761_s13  ;;  %v864_v34 = vadd.f32 %v862_v1, %v814_v25  ;;  %v962_v42 = vmul.f32 %v960_v24, %v2750_v21  ;;  %s2887_s9 = sld [smem:[#allocation2 + $0x6c]] }
  0x9e   :  { %v957_v45 = vadd.f32 %v955_v46, %v907_v22  ;;  %v1012_v37 = vmul.f32 %v1010_v7, %v2771_v41  ;;  %v1062_v47 = vmul.f32 %v1060_v17, %v2781_v3  ;;  %v773_v48 = vmul.f32 %v772_v27, %v2759_v63  ;;  %s2891_s25 = sld [smem:[#allocation2 + $0x74]] }
  0x9f   :  { %1147 = vrot.lane.b32.xlu1 %v1108_v50, %s3682_s17  ;;  %v811_v58 = vmul.f32 %v810_v6, %v2786_v0  ;;  %v861_v5 = vmul.f32 %v860_v62, %v2791_v2  ;;  %v914_v39 = vadd.f32 %v912_v33, %v864_v34  ;;  %v1112_v13 = vmul.f32 %v1110_v29, %v2799_v30  ;;  %s2896_s13 = sld [smem:[#allocation2 + $0x7c]] }
  0xa0   :  { %v1007_v20 = vadd.f32 %v1005_v60, %v957_v45  ;;  %v911_v10 = vmul.f32 %v910_v16, %v2806_v31  ;;  %v961_v35 = vmul.f32 %v960_v24, %v2819_v52  ;;  %v1011_v8 = vmul.f32 %v1010_v7, %v2824_v44  ;;  %s3092_s14 = sld [smem:[#allocation2 + $0xba]] }
  0xa1   :  { %v813_v14 = vadd.f32 %v811_v58, %v773_v48  ;;  %v776_v4 = vstv %s2774_s12  ;;  %v964_v55 = vadd.f32 %v962_v42, %v914_v39  ;;  %v816_v54 = vstv %s2793_s11  ;;  %s2909_s12 = sld [smem:[#allocation2 + $0x55]] }
  0xa2   :  { %v1057_v32 = vadd.f32 %v1055_v38, %v1007_v20  ;;  %v778_v53 = vmul.f32 %v776_v4, %v2703_v57  ;;  %v818_v36 = vmul.f32 %v816_v54, %v2708_v18  ;;  %v866_v19 = vstv %s2808_s19  ;;  %s2913_s11 = sld [smem:[#allocation2 + $0x5d]] }
  0xa3   :  { %v863_v9 = vadd.f32 %v861_v5, %v813_v14  ;;  %v916_v23 = vstv %s2826_s28  ;;  %v1014_v46 = vadd.f32 %v1012_v37, %v964_v55  ;;  %v868_v60 = vmul.f32 %v866_v19, %v2732_v26  ;;  %s2919_s19 = sld [smem:[#allocation2 + $0x65]] }
  0xa4   :  { %v1107_v11 = vadd.f32 %v1105_v43, %v1057_v32  ;;  %v918_v27 = vmul.f32 %v916_v23, %v2741_v40  ;;  %v820_v56 = vadd.f32 %v818_v36, %v778_v53  ;;  %v966_v15 = vstv %s2832_s26  ;;  %s2923_s28 = sld [smem:[#allocation2 + $0x6d]] }
  0xa5   :  { %v913_v12 = vadd.f32 %v911_v10, %v863_v9  ;;  %v1016_v6 = vstv %s2836_s7  ;;  %v1064_v59 = vadd.f32 %v1062_v47, %v1014_v46  ;;  %v1061_v49 = vmul.f32 %v1060_v17, %v2844_v61  ;;  %s2928_s26 = sld [smem:[#allocation2 + $0x75]] }
  0xa6   :  { %1145 = vrot.lane.b32.xlu0 %v1107_v11, %s3682_s17  ;;  %v1111_v62 = vmul.f32 %v1110_v29, %v2856_v51  ;;  %v1066_v16 = vstv %s2847_s21  ;;  %v870_v38 = vadd.f32 %v868_v60, %v820_v56  ;;  %v968_v1 = vmul.f32 %v966_v15, %v2750_v21  ;;  %s2932_s7 = sld [smem:[#allocation2 + $0x7d]] }
  0xa7   :  { %v963_v28 = vadd.f32 %v961_v35, %v913_v12  ;;  %v1116_v24 = vstv %s2851_s20  ;;  %v1114_v22 = vadd.f32 %v1112_v13, %v1064_v59  ;;  %v1018_v25 = vmul.f32 %v1016_v6, %v2771_v41  ;;  %s2938_s21 = sld [smem:[#allocation2 + $0x46]] }
  0xa8   :  { %v777_v33 = vmul.f32 %v776_v4, %v2759_v63  ;;  %v817_v7 = vmul.f32 %v816_v54, %v2786_v0  ;;  %v920_v43 = vadd.f32 %v918_v27, %v870_v38  ;;  %v1068_v17 = vmul.f32 %v1066_v16, %v2781_v3  ;;  %s2942_s20 = sld [smem:[#allocation2 + $0x4e]] }
  0xa9   :  { %v1013_v50 = vadd.f32 %v1011_v8, %v963_v28  ;;  %v867_v29 = vmul.f32 %v866_v19, %v2791_v2  ;;  %1151 = vrot.lane.b32.xlu1 %v1114_v22, %s3679_s16  ;;  %v1118_v45 = vmul.f32 %v1116_v24, %v2799_v30  ;;  %v917_v42 = vmul.f32 %v916_v23, %v2806_v31  ;;  %s3088_s17 = sld [smem:[#allocation2 + $0xb2]] }
  0xaa   :  { %v819_v34 = vadd.f32 %v817_v7, %v777_v33  ;;  %v967_v37 = vmul.f32 %v966_v15, %v2819_v52  ;;  %v970_v48 = vadd.f32 %v968_v1, %v920_v43  ;;  %v1017_v58 = vmul.f32 %v1016_v6, %v2824_v44 }
  0xab   :  { %v1063_v47 = vadd.f32 %v1061_v49, %v1013_v50  ;;  %v780_v5 = vstv %s2861_s0  ;;  %v822_v13 = vstv %s2867_s24  ;;  %v872_v10 = vstv %s2871_s22  ;;  %s2956_s0 = sld [smem:[#allocation2 + $0x66]] }
  0xac   :  { %v869_v20 = vadd.f32 %v867_v29, %v819_v34  ;;  %v782_v39 = vmul.f32 %v780_v5, %v2703_v57  ;;  %v1020_v35 = vadd.f32 %v1018_v25, %v970_v48  ;;  %v824_v8 = vmul.f32 %v822_v13, %v2708_v18  ;;  %s2961_s24 = sld [smem:[#allocation2 + $0x6e]] }
  0xad   :  { %v1113_v14 = vadd.f32 %v1111_v62, %v1063_v47  ;;  %v874_v4 = vmul.f32 %v872_v10, %v2732_v26  ;;  %v922_v55 = vstv %s2876_s29  ;;  %v972_v53 = vstv %s2880_s30  ;;  %s2966_s22 = sld [smem:[#allocation2 + $0x76]] }
  0xae   :  { %v919_v32 = vadd.f32 %v917_v42, %v869_v20  ;;  %v1022_v54 = vstv %s2887_s9  ;;  %v1070_v9 = vadd.f32 %v1068_v17, %v1020_v35  ;;  %v1067_v36 = vmul.f32 %v1066_v16, %v2844_v61  ;;  %s2970_s29 = sld [smem:[#allocation2 + $0x7e]] }
  0xaf   :  { %1149 = vrot.lane.b32.xlu0 %v1113_v14, %s3679_s16  ;;  %v826_v19 = vadd.f32 %v824_v8, %v782_v39  ;;  %v924_v23 = vmul.f32 %v922_v55, %v2741_v40  ;;  %v1117_v46 = vmul.f32 %v1116_v24, %v2856_v51  ;;  %v1072_v60 = vstv %s2891_s25  ;;  %s2975_s30 = sld [smem:[#allocation2 + $0x47]] }
  0xb0   :  { %v969_v11 = vadd.f32 %v967_v37, %v919_v32  ;;  %v1122_v27 = vstv %s2896_s13  ;;  %v1120_v12 = vadd.f32 %v1118_v45, %v1070_v9  ;;  %v974_v15 = vmul.f32 %v972_v53, %v2750_v21  ;;  %s2981_s9 = sld [smem:[#allocation2 + $0x4f]] }
  0xb1   :  { %v876_v56 = vadd.f32 %v874_v4, %v826_v19  ;;  %v1024_v6 = vmul.f32 %v1022_v54, %v2771_v41  ;;  %v781_v49 = vmul.f32 %v780_v5, %v2759_v63  ;;  %v823_v62 = vmul.f32 %v822_v13, %v2786_v0  ;;  %s2985_s25 = sld [smem:[#allocation2 + $0x57]] }
  0xb2   :  { %v1019_v59 = vadd.f32 %v1017_v58, %v969_v11  ;;  %v873_v16 = vmul.f32 %v872_v10, %v2791_v2  ;;  %1155 = vrot.lane.b32.xlu1 %v1120_v12, %s3680_s27  ;;  %v1074_v38 = vmul.f32 %v1072_v60, %v2781_v3  ;;  %v1124_v1 = vmul.f32 %v1122_v27, %v2799_v30  ;;  %s2990_s13 = sld [smem:[#allocation2 + $0x5f]] }
  0xb3   :  { %v926_v28 = vadd.f32 %v924_v23, %v876_v56  ;;  %v923_v24 = vmul.f32 %v922_v55, %v2806_v31  ;;  %v825_v25 = vadd.f32 %v823_v62, %v781_v49  ;;  %v973_v33 = vmul.f32 %v972_v53, %v2819_v52  ;;  %s2994_s16 = sld [smem:[#allocation2 + $0x67]] }
  0xb4   :  { %v1069_v22 = vadd.f32 %v1067_v36, %v1019_v59  ;;  %v1023_v7 = vmul.f32 %v1022_v54, %v2824_v44  ;;  %v784_v43 = vstv %s2900_s15  ;;  %v828_v17 = vstv %s2905_s18  ;;  %s2999_s15 = sld [smem:[#allocation2 + $0x6f]] }
  0xb5   :  { %v976_v50 = vadd.f32 %v974_v15, %v926_v28  ;;  %v878_v29 = vstv %s2909_s12  ;;  %v875_v34 = vadd.f32 %v873_v16, %v825_v25  ;;  %v786_v42 = vmul.f32 %v784_v43, %v2703_v57  ;;  %s3004_s18 = sld [smem:[#allocation2 + $0x77]]  ;;  %v3034_v28 = vpop.permute.xlu1 %677  ;;  %v3041_v25 = vpop.permute.xlu0 %673 }
  0xb6   :  { %v1119_v45 = vadd.f32 %v1117_v46, %v1069_v22  ;;  %v830_v37 = vmul.f32 %v828_v17, %v2708_v18  ;;  %v880_v48 = vmul.f32 %v878_v29, %v2732_v26  ;;  %v928_v58 = vstv %s2913_s11  ;;  %s3009_s12 = sld [smem:[#allocation2 + $0x7f]] }
  0xb7   :  { %v1026_v47 = vadd.f32 %v1024_v6, %v976_v50  ;;  %v978_v5 = vstv %s2919_s19  ;;  %v925_v20 = vadd.f32 %v923_v24, %v875_v34  ;;  %v1073_v39 = vmul.f32 %v1072_v60, %v2844_v61  ;;  %s3013_s11 = sld [smem:[#allocation2 + $0x81]] }
  0xb8   :  { %1153 = vrot.lane.b32.xlu0 %v1119_v45, %s3680_s27  ;;  %v832_v13 = vadd.f32 %v830_v37, %v786_v42  ;;  %v930_v10 = vmul.f32 %v928_v58, %v2741_v40  ;;  %v1123_v35 = vmul.f32 %v1122_v27, %v2856_v51  ;;  %v1028_v8 = vstv %s2923_s28  ;;  %s3018_s19 = sld [smem:[#allocation2 + $0x89]] }
  0xb9   :  { %v1076_v14 = vadd.f32 %v1074_v38, %v1026_v47  ;;  %v1078_v4 = vstv %s2928_s26  ;;  %v975_v32 = vadd.f32 %v973_v33, %v925_v20  ;;  %v980_v53 = vmul.f32 %v978_v5, %v2750_v21  ;;  %s3022_s28 = sld [smem:[#allocation2 + $0x91]] }
  0xba   :  { %v882_v55 = vadd.f32 %v880_v48, %v832_v13  ;;  %v1128_v54 = vstv %s2932_s7  ;;  %v1030_v36 = vmul.f32 %v1028_v8, %v2771_v41  ;;  %v785_v19 = vmul.f32 %v784_v43, %v2759_v63  ;;  %s3028_s26 = sld [smem:[#allocation2 + $0x99]] }
  0xbb   :  { %v1126_v9 = vadd.f32 %v1124_v1, %v1076_v14  ;;  %v829_v23 = vmul.f32 %v828_v17, %v2786_v0  ;;  %v1025_v11 = vadd.f32 %v1023_v7, %v975_v32  ;;  %v1080_v60 = vmul.f32 %v1078_v4, %v2781_v3  ;;  %s3032_s7 = sld [smem:[#allocation2 + $0xa1]] }
  0xbc   :  { %v932_v46 = vadd.f32 %v930_v10, %v882_v55  ;;  %v879_v27 = vmul.f32 %v878_v29, %v2791_v2  ;;  %v1130_v12 = vmul.f32 %v1128_v54, %v2799_v30  ;;  %v929_v15 = vmul.f32 %v928_v58, %v2806_v31  ;;  %s3039_s27 = sld [smem:[#allocation2 + $0xa9]] }
  0xbd   :  { %1159 = vrot.lane.b32.xlu1 %v1126_v9, %s3681_s10  ;;  %v831_v56 = vadd.f32 %v829_v23, %v785_v19  ;;  %v979_v6 = vmul.f32 %v978_v5, %v2819_v52  ;;  %v1075_v59 = vadd.f32 %v1073_v39, %v1025_v11  ;;  %v1029_v62 = vmul.f32 %v1028_v8, %v2824_v44  ;;  %v3066_v8 = vpop.permute.xlu1 %679 }
  0xbe   :  { %v982_v49 = vadd.f32 %v980_v53, %v932_v46  ;;  %v788_v16 = vstv %s2938_s21  ;;  %v834_v24 = vstv %s2942_s20  ;;  %v884_v22 = vstv %s2947_s8  ;;  %s3045_s21 = sld [smem:[#allocation2 + $0xb1]] }
  0xbf   :  { %v881_v38 = vadd.f32 %v879_v27, %v831_v56  ;;  %v790_v1 = vmul.f32 %v788_v16, %v2703_v57  ;;  %v1125_v33 = vadd.f32 %v1123_v35, %v1075_v59  ;;  %v836_v50 = vmul.f32 %v834_v24, %v2708_v18  ;;  %s3050_s20 = sld [smem:[#allocation2 + $0xb9]] }
  0xc0   :  { %v1032_v7 = vadd.f32 %v1030_v36, %v982_v49  ;;  %v886_v43 = vmul.f32 %v884_v22, %v2732_v26  ;;  %v934_v29 = vstv %s2951_s23  ;;  %v984_v45 = vstv %s2956_s0  ;;  %s3055_s8 = sld [smem:[#allocation2 + $0x82]] }
  0xc1   :  { %v931_v17 = vadd.f32 %v929_v15, %v881_v38  ;;  %v1034_v34 = vstv %s2961_s24  ;;  %1157 = vrot.lane.b32.xlu0 %v1125_v33, %s3681_s10  ;;  %v1079_v37 = vmul.f32 %v1078_v4, %v2844_v61  ;;  %v838_v47 = vadd.f32 %v836_v50, %v790_v1  ;;  %s3060_s23 = sld [smem:[#allocation2 + $0x8a]]  ;;  %v3099_v33 = vpop.permute.xlu1 %683 }
  0xc2   :  { %v1082_v42 = vadd.f32 %v1080_v60, %v1032_v7  ;;  %v936_v48 = vmul.f32 %v934_v29, %v2741_v40  ;;  %v1129_v5 = vmul.f32 %v1128_v54, %v2856_v51  ;;  %v1084_v20 = vstv %s2966_s22  ;;  %s3064_s0 = sld [smem:[#allocation2 + $0x92]]  ;;  %v3073_v54 = vpop.permute.xlu0 %675  ;;  %s3696_s22 = smov 123  }
  0xc3   :  { %v981_v58 = vadd.f32 %v979_v6, %v931_v17  ;;  %v1134_v39 = vstv %s2970_s29  ;;  %v888_v10 = vadd.f32 %v886_v43, %v838_v47  ;;  %v986_v14 = vmul.f32 %v984_v45, %v2750_v21  ;;  %s3071_s24 = sld [smem:[#allocation2 + $0x9a]] }
  0xc4   :  { %v1132_v13 = vadd.f32 %v1130_v12, %v1082_v42  ;;  %v1036_v35 = vmul.f32 %v1034_v34, %v2771_v41  ;;  %v789_v32 = vmul.f32 %v788_v16, %v2759_v63  ;;  %v835_v55 = vmul.f32 %v834_v24, %v2786_v0  ;;  %s3079_s29 = sld [smem:[#allocation2 + $0xa2]] }
  0xc5   :  { %v1031_v4 = vadd.f32 %v1029_v62, %v981_v58  ;;  %v885_v53 = vmul.f32 %v884_v22, %v2791_v2  ;;  %v938_v9 = vadd.f32 %v936_v48, %v888_v10  ;;  %v1086_v36 = vmul.f32 %v1084_v20, %v2781_v3  ;;  %s3083_s10 = sld [smem:[#allocation2 + $0xaa]] }
  0xc6   :  { %1163 = vrot.lane.b32.xlu1 %v1132_v13, %s3696_s22  ;;  %v1136_v19 = vmul.f32 %v1134_v39, %v2799_v30  ;;  %v935_v23 = vmul.f32 %v934_v29, %v2806_v31  ;;  %v837_v46 = vadd.f32 %v835_v55, %v789_v32  ;;  %v985_v60 = vmul.f32 %v984_v45, %v2819_v52  ;;  %v3106_v43 = vpop.permute.xlu0 %681 }
  0xc7   :  { %v1081_v11 = vadd.f32 %v1079_v37, %v1031_v4  ;;  %v1035_v27 = vmul.f32 %v1034_v34, %v2824_v44  ;;  %v988_v12 = vadd.f32 %v986_v14, %v938_v9  ;;  %v792_v56 = vstv %s2975_s30  ;;  %s3097_s30 = sld [smem:[#allocation2 + $0x83]]  ;;  %v3143_v14 = vld [vmem:[%s3671_s3 + $0x2] sm:$0xff] }
  0xc8   :  { %v840_v15 = vstv %s2981_s9  ;;  %v890_v6 = vstv %s2985_s25  ;;  %v887_v49 = vadd.f32 %v885_v53, %v837_v46  ;;  %v794_v62 = vmul.f32 %v792_v56, %v2703_v57  ;;  %s3104_s9 = sld [smem:[#allocation2 + $0x8b]] }
  0xc9   :  { %v1131_v59 = vadd.f32 %v1129_v5, %v1081_v11  ;;  %v842_v16 = vmul.f32 %v840_v15, %v2708_v18  ;;  %v1038_v38 = vadd.f32 %v1036_v35, %v988_v12  ;;  %v892_v1 = vmul.f32 %v890_v6, %v2732_v26  ;;  %s3115_s25 = sld [smem:[#allocation2 + $0x9b]] }
  0xca   :  { %v940_v24 = vstv %s2990_s13  ;;  %v990_v22 = vstv %s2994_s16  ;;  %v937_v7 = vadd.f32 %v935_v23, %v887_v49  ;;  %v1085_v57 = vmul.f32 %v1084_v20, %v2844_v61  ;;  %s3111_s16 = sld [smem:[#allocation2 + $0x93]] }
  0xcb   :  { %1161 = vrot.lane.b32.xlu0 %v1131_v59, %s3696_s22  ;;  %v844_v18 = vadd.f32 %v842_v16, %v794_v62  ;;  %v942_v50 = vmul.f32 %v940_v24, %v2741_v40  ;;  %v1088_v26 = vadd.f32 %v1086_v36, %v1038_v38  ;;  %v1135_v17 = vmul.f32 %v1134_v39, %v2856_v51  ;;  %s3120_s13 = sld [smem:[#allocation2 + $0xa3]] }
  0xcc   :  { %v1040_v29 = vstv %s2999_s15  ;;  %v1090_v45 = vstv %s3004_s18  ;;  %v987_v34 = vadd.f32 %v985_v60, %v937_v7  ;;  %v992_v37 = vmul.f32 %v990_v22, %v2750_v21  ;;  %v3127_v21 = vld [vmem:[%s3671_s3] sm:$0xff]  ;;  %s3163_s15 = sld [smem:[#allocation2 + $0x84]]  ;;  %s3701_s18 = smov 125  }
  0xcd   :  { %v894_v42 = vadd.f32 %v892_v1, %v844_v18  ;;  %v1140_v47 = vstv %s3009_s12  ;;  %v1138_v48 = vadd.f32 %v1136_v19, %v1088_v26  ;;  %v1042_v40 = vmul.f32 %v1040_v29, %v2771_v41  ;;  %s3129_s12 = sld [smem:[#allocation2 + $0xab]]  ;;  %v3161_v19 = vld [vmem:[%s3671_s3 + $0x3] sm:$0xff] }
  0xce   :  { %v793_v58 = vmul.f32 %v792_v56, %v2759_v63  ;;  %v841_v5 = vmul.f32 %v840_v15, %v2786_v0  ;;  %v1037_v20 = vadd.f32 %v1035_v27, %v987_v34  ;;  %v1092_v13 = vmul.f32 %v1090_v45, %v2781_v3  ;;  %v3170_v60 = vld [vmem:[%s3671_s3 + $0x4] sm:$0xff] }
  0xcf   :  { %v944_v39 = vadd.f32 %v942_v50, %v894_v42  ;;  %v891_v10 = vmul.f32 %v890_v6, %v2791_v2  ;;  %1167 = vrot.lane.b32.xlu1 %v1138_v48, %s3697_s6  ;;  %v1142_v63 = vmul.f32 %v1140_v47, %v2799_v30  ;;  %v941_v0 = vmul.f32 %v940_v24, %v2806_v31  ;;  %v3138_v2 = vld [vmem:[%s3671_s3 + $0x1] sm:$0xff]  ;;  %v3147_v30 = vpop.permute.xlu1 %687 }
  0xd0   :  { %v843_v41 = vadd.f32 %v841_v5, %v793_v58  ;;  %v991_v3 = vmul.f32 %v990_v22, %v2819_v52  ;;  %v1087_v35 = vadd.f32 %v1085_v57, %v1037_v20  ;;  %v1041_v31 = vmul.f32 %v1040_v29, %v2824_v44  ;;  %v3153_v52 = vpop.permute.xlu0 %685  ;;  %v3175_v27 = vld [vmem:[%s3671_s3 + $0x5] sm:$0xff] }
  0xd1   :  { %v994_v4 = vadd.f32 %v992_v37, %v944_v39  ;;  %v1194_v32 = vstv %s3013_s11  ;;  %v1220_v9 = vstv %s3018_s19  ;;  %v1253_v36 = vstv %s3022_s28  ;;  %s3187_s11 = sld [smem:[#allocation2 + $0x9c]]  ;;  %v3216_v37 = vld [vmem:[%s3671_s3 + $0x7] sm:$0xff] }
  0xd2   :  { %v893_v55 = vadd.f32 %v891_v10, %v843_v41  ;;  %v1195_v53 = vmul.f32 %v1194_v32, %v3127_v21  ;;  %v1137_v44 = vadd.f32 %v1135_v17, %v1087_v35  ;;  %v1221_v11 = vmul.f32 %v1220_v9, %v3138_v2  ;;  %s3210_s19 = sld [smem:[#allocation2 + $0xb4]] }
  0xd3   :  { %v1044_v23 = vadd.f32 %v1042_v40, %v994_v4  ;;  %v1254_v46 = vmul.f32 %v1253_v36, %v3143_v14  ;;  %v1286_v56 = vstv %s3028_s26  ;;  %v1319_v15 = vstv %s3032_s7  ;;  %v3194_v7 = vpop.permute.xlu1 %691  ;;  %s3198_s26 = sld [smem:[#allocation2 + $0xac]] }
  0xd4   :  { %v943_v12 = vadd.f32 %v941_v0, %v893_v55  ;;  %v1352_v6 = vstv %s3039_s27  ;;  %1165 = vrot.lane.b32.xlu0 %v1137_v44, %s3697_s6  ;;  %v1091_v49 = vmul.f32 %v1090_v45, %v2844_v61  ;;  %v1222_v62 = vadd.f32 %v1221_v11, %v1195_v53  ;;  %s3192_s27 = sld [smem:[#allocation2 + $0xa4]]  ;;  %v3200_v26 = vpop.permute.xlu0 %689 }
  0xd5   :  { %v1094_v59 = vadd.f32 %v1092_v13, %v1044_v23  ;;  %v1287_v16 = vmul.f32 %v1286_v56, %v3161_v19  ;;  %v1141_v1 = vmul.f32 %v1140_v47, %v2856_v51  ;;  %v1320_v24 = vmul.f32 %v1319_v15, %v3170_v60  ;;  %v3205_v51 = vld [vmem:[%s3671_s3 + $0x6] sm:$0xff]  ;;  %s3230_s3 = sld [smem:[#allocation2 + $0x8d]] }
  0xd6   :  { %v993_v38 = vadd.f32 %v991_v3, %v943_v12  ;;  %v1353_v22 = vmul.f32 %v1352_v6, %v3175_v27  ;;  %v1255_v57 = vadd.f32 %v1254_v46, %v1222_v62  ;;  %v1385_v18 = vstv %s3045_s21  ;;  %s3698_s21 = smov 121   ;;  %s3336_s7 = sld [smem:[#allocation2 + $0xa7]] }
  0xd7   :  { %v1144_v61 = vadd.f32 %v1142_v63, %v1094_v59  ;;  %v1418_v50 = vstv %s3050_s20  ;;  %v1197_v29 = vstv %s3055_s8  ;;  %v1224_v45 = vstv %s3060_s23  ;;  %s3221_s8 = sld [smem:[#allocation2 + $0xbc]] }
  0xd8   :  { %v1043_v17 = vadd.f32 %v1041_v31, %v993_v38  ;;  %v1257_v34 = vstv %s3064_s0  ;;  %v1288_v42 = vadd.f32 %v1287_v16, %v1255_v57  ;;  %v1198_v47 = vmul.f32 %v1197_v29, %v3127_v21  ;;  %s3226_s23 = sld [smem:[#allocation2 + $0x85]]  ;;  %v3237_v31 = vpop.permute.xlu1 %695  ;;  %v3243_v36 = vpop.permute.xlu0 %693 }
  0xd9   :  { %1171 = vrot.lane.b32.xlu1 %v1144_v61, %s3698_s21  ;;  %v1225_v48 = vmul.f32 %v1224_v45, %v3138_v2  ;;  %v1258_v40 = vmul.f32 %v1257_v34, %v3143_v14  ;;  %v1290_v5 = vstv %s3071_s24  ;;  %v1323_v20 = vstv %s3079_s29  ;;  %s3241_s0 = sld [smem:[#allocation2 + $0x9d]] }
  0xda   :  { %v1093_v58 = vadd.f32 %v1091_v49, %v1043_v17  ;;  %v1356_v39 = vstv %s3083_s10  ;;  %v1321_v13 = vadd.f32 %v1320_v24, %v1288_v42  ;;  %v1386_v10 = vmul.f32 %v1385_v18, %v3205_v51  ;;  %s3235_s10 = sld [smem:[#allocation2 + $0x95]] }
  0xdb   :  { %v1226_v63 = vadd.f32 %v1225_v48, %v1198_v47  ;;  %v1291_v41 = vmul.f32 %v1290_v5, %v3161_v19  ;;  %v1419_v3 = vmul.f32 %v1418_v50, %v3216_v37  ;;  %v1324_v35 = vmul.f32 %v1323_v20, %v3170_v60  ;;  %s3260_s24 = sld [smem:[#allocation2 + $0xb5]] }
  0xdc   :  { %v1143_v0 = vadd.f32 %v1141_v1, %v1093_v58  ;;  %v1389_v4 = vstv %s3088_s17  ;;  %v1354_v32 = vadd.f32 %v1353_v22, %v1321_v13  ;;  %v1357_v53 = vmul.f32 %v1356_v39, %v3175_v27  ;;  %s3250_s17 = sld [smem:[#allocation2 + $0xa5]]  ;;  %v3270_v50 = vpop.permute.xlu1 %699  ;;  %v3277_v42 = vpop.permute.xlu0 %697 }
  0xdd   :  { %v1259_v55 = vadd.f32 %v1258_v40, %v1226_v63  ;;  %v1422_v9 = vstv %s3092_s14  ;;  %v1390_v44 = vmul.f32 %v1389_v4, %v3205_v51  ;;  %v1200_v23 = vstv %s3097_s30  ;;  %s3254_s14 = sld [smem:[#allocation2 + $0xad]] }
  0xde   :  { %1169 = vrot.lane.b32.xlu0 %v1143_v0, %s3698_s21  ;;  %v1228_v11 = vstv %s3104_s9  ;;  %v1261_v46 = vstv %s3111_s16  ;;  %v1387_v12 = vadd.f32 %v1386_v10, %v1354_v32  ;;  %v1201_v15 = vmul.f32 %v1200_v23, %v3127_v21  ;;  %s3263_s29 = sld [smem:[#allocation2 + $0xbd]]  ;;  %s3699_s9 = smov 127  }
  0xdf   :  { %v1292_v56 = vadd.f32 %v1291_v41, %v1259_v55  ;;  %v1229_v6 = vmul.f32 %v1228_v11, %v3138_v2  ;;  %v1262_v59 = vmul.f32 %v1261_v46, %v3143_v14  ;;  %v1294_v49 = vstv %s3115_s25  ;;  %s3268_s30 = sld [smem:[#allocation2 + $0x86]] }
  0xe0   :  { %v1327_v62 = vstv %s3120_s13  ;;  %v1360_v16 = vstv %s3129_s12  ;;  %v1420_v38 = vadd.f32 %v1419_v3, %v1387_v12  ;;  %v1295_v22 = vmul.f32 %v1294_v49, %v3161_v19  ;;  %s3275_s16 = sld [smem:[#allocation2 + $0x8e]]  ;;  %v3304_v23 = vpop.permute.xlu1 %703 }
  0xe1   :  { %v1325_v1 = vadd.f32 %v1324_v35, %v1292_v56  ;;  %v1230_v24 = vadd.f32 %v1229_v6, %v1201_v15  ;;  %v1423_v61 = vmul.f32 %v1422_v9, %v3216_v37  ;;  %v1328_v57 = vmul.f32 %v1327_v62, %v3170_v60  ;;  %s3283_s25 = sld [smem:[#allocation2 + $0x96]]  ;;  %v3311_v15 = vpop.permute.xlu0 %701 }
  0xe2   :  { %v1361_v18 = vmul.f32 %v1360_v16, %v3175_v27  ;;  %1445 = vrot.lane.b32.xlu0 %v1420_v38, %s3699_s9  ;;  %v1393_v45 = vstv %s3145_s4  ;;  %v1426_v34 = vstv %s3151_s1  ;;  %v1203_v47 = vstv %s3163_s15  ;;  %s3287_s4 = sld [smem:[#allocation2 + $0x9e]]  ;;  %s3700_s15 = smov 126  }
  0xe3   :  { %v1358_v17 = vadd.f32 %v1357_v53, %v1325_v1  ;;  %v1263_v29 = vadd.f32 %v1262_v59, %v1230_v24  ;;  %v1232_v48 = vstv %s3177_s2  ;;  %v1265_v40 = vstv %s3182_s5  ;;  %s3293_s1 = sld [smem:[#allocation2 + $0xa6]] }
  0xe4   :  { %v1298_v58 = vstv %s3187_s11  ;;  %v1204_v39 = vmul.f32 %v1203_v47, %v3127_v21  ;;  %v1233_v13 = vmul.f32 %v1232_v48, %v3138_v2  ;;  %v1394_v10 = vmul.f32 %v1393_v45, %v3205_v51  ;;  %s3296_s13 = sld [smem:[#allocation2 + $0xae]] }
  0xe5   :  { %v1391_v5 = vadd.f32 %v1390_v44, %v1358_v17  ;;  %v1296_v20 = vadd.f32 %v1295_v22, %v1263_v29  ;;  %v1266_v63 = vmul.f32 %v1265_v40, %v3143_v14  ;;  %v1331_v41 = vstv %s3192_s27  ;;  %s3302_s12 = sld [smem:[#allocation2 + $0xb6]] }
  0xe6   :  { %v1364_v0 = vstv %s3198_s26  ;;  %v1234_v4 = vadd.f32 %v1233_v13, %v1204_v39  ;;  %v1299_v32 = vmul.f32 %v1298_v58, %v3161_v19  ;;  %v1427_v55 = vmul.f32 %v1426_v34, %v3216_v37  ;;  %s3309_s2 = sld [smem:[#allocation2 + $0xbe]] }
  0xe7   :  { %v1424_v3 = vadd.f32 %v1423_v61, %v1391_v5  ;;  %v1329_v35 = vadd.f32 %v1328_v57, %v1296_v20  ;;  %v1332_v53 = vmul.f32 %v1331_v41, %v3170_v60  ;;  %v1365_v9 = vmul.f32 %v1364_v0, %v3175_v27  ;;  %s3317_s5 = sld [smem:[#allocation2 + $0x87]]  ;;  %v3338_v5 = vpop.permute.xlu1 %707 }
  0xe8   :  { %v1206_v44 = vstv %s3226_s23  ;;  %v1267_v46 = vadd.f32 %v1266_v63, %v1234_v4  ;;  %v1397_v12 = vstv %s3210_s19  ;;  %v1430_v56 = vstv %s3221_s8  ;;  %s3321_s11 = sld [smem:[#allocation2 + $0x8f]]  ;;  %v3345_v63 = vpop.permute.xlu0 %705 }
  0xe9   :  { %1447 = vrot.lane.b32.xlu1 %v1424_v3, %s3700_s15  ;;  %v1362_v11 = vadd.f32 %v1361_v18, %v1329_v35  ;;  %v1207_v6 = vmul.f32 %v1206_v44, %v3127_v21  ;;  %v1236_v59 = vstv %s3230_s3  ;;  %v1269_v49 = vstv %s3235_s10  ;;  %s3327_s27 = sld [smem:[#allocation2 + $0x97]]  ;;  %s3702_s10 = smov 124  }
  0xea   :  { %v1302_v62 = vstv %s3241_s0  ;;  %v1300_v38 = vadd.f32 %v1299_v32, %v1267_v46  ;;  %v1237_v1 = vmul.f32 %v1236_v59, %v3138_v2  ;;  %v1270_v24 = vmul.f32 %v1269_v49, %v3143_v14  ;;  %s3330_s26 = sld [smem:[#allocation2 + $0x9f]] }
  0xeb   :  { %v1395_v16 = vadd.f32 %v1394_v10, %v1362_v11  ;;  %v1398_v22 = vmul.f32 %v1397_v12, %v3205_v51  ;;  %v1431_v61 = vmul.f32 %v1430_v56, %v3216_v37  ;;  %v1335_v57 = vstv %s3250_s17  ;;  %s3343_s19 = sld [smem:[#allocation2 + $0xaf]] }
  0xec   :  { %v1368_v18 = vstv %s3254_s14  ;;  %v1333_v29 = vadd.f32 %v1332_v53, %v1300_v38  ;;  %v1238_v45 = vadd.f32 %v1237_v1, %v1207_v6  ;;  %v1303_v34 = vmul.f32 %v1302_v62, %v3161_v19  ;;  %s3351_s20 = sld [smem:[#allocation2 + $0xb7]] }
  0xed   :  { %v1428_v17 = vadd.f32 %v1427_v55, %v1395_v16  ;;  %v1336_v47 = vmul.f32 %v1335_v57, %v3170_v60  ;;  %v1369_v48 = vmul.f32 %v1368_v18, %v3175_v27  ;;  %v1401_v40 = vstv %s3260_s24  ;;  %s3355_s28 = sld [smem:[#allocation2 + $0xbf]]  ;;  %v3370_v16 = vpop.permute.xlu1 %711 }
  0xee   :  { %v1209_v58 = vstv %s3268_s30  ;;  %v1366_v20 = vadd.f32 %v1365_v9, %v1333_v29  ;;  %v1271_v39 = vadd.f32 %v1270_v24, %v1238_v45  ;;  %v1434_v13 = vstv %s3263_s29  ;;  %s3359_s8 = sld [smem:[#allocation2]] }
  0xef   :  { %1449 = vrot.lane.b32.xlu0 %v1428_v17, %s3701_s18  ;;  %v1210_v10 = vmul.f32 %v1209_v58, %v3127_v21  ;;  %v1240_v41 = vstv %s3275_s16  ;;  %v1273_v0 = vstv %s3283_s25  ;;  %v1306_v3 = vstv %s3287_s4  ;;  %s3362_s23 = sld [smem:[#allocation2 + $0x8]] }
  0xf0   :  { %v1339_v35 = vstv %s3293_s1  ;;  %v1399_v4 = vadd.f32 %v1398_v22, %v1366_v20  ;;  %v1304_v32 = vadd.f32 %v1303_v34, %v1271_v39  ;;  %v1241_v55 = vmul.f32 %v1240_v41, %v3138_v2  ;;  %s3368_s3 = sld [smem:[#allocation2 + $0x10]] }
  0xf1   :  { %v1274_v53 = vmul.f32 %v1273_v0, %v3143_v14  ;;  %v1402_v9 = vmul.f32 %v1401_v40, %v3205_v51  ;;  %v1307_v44 = vmul.f32 %v1306_v3, %v3161_v19  ;;  %v1372_v56 = vstv %s3296_s13  ;;  %s3375_s0 = sld [smem:[#allocation2 + $0x18]] }
  0xf2   :  { %v1432_v11 = vadd.f32 %v1431_v61, %v1399_v4  ;;  %v1337_v46 = vadd.f32 %v1336_v47, %v1304_v32  ;;  %v1242_v12 = vadd.f32 %v1241_v55, %v1210_v10  ;;  %v1435_v6 = vmul.f32 %v1434_v13, %v3216_v37  ;;  %v3377_v61 = vpop.permute.xlu0 %709  ;;  %s3383_s17 = sld [smem:[#allocation2 + $0x20]]  ;;  %v3399_v4 = vpop.permute.xlu1 %715 }
  0xf3   :  { %v1340_v59 = vmul.f32 %v1339_v35, %v3170_v60  ;;  %v1212_v49 = vstv %s3317_s5  ;;  %v1244_v62 = vstv %s3321_s11  ;;  %v1405_v24 = vstv %s3302_s12  ;;  %s3387_s14 = sld [smem:[#allocation2 + $0x28]] }
  0xf4   :  { %1451 = vrot.lane.b32.xlu1 %v1432_v11, %s3702_s10  ;;  %v1370_v38 = vadd.f32 %v1369_v48, %v1337_v46  ;;  %v1275_v1 = vadd.f32 %v1274_v53, %v1242_v12  ;;  %v1213_v22 = vmul.f32 %v1212_v49, %v3127_v21  ;;  %v1373_v57 = vmul.f32 %v1372_v56, %v3175_v27  ;;  %s3392_s24 = sld [smem:[#allocation2 + $0x30]] }
  0xf5   :  { %v1245_v18 = vmul.f32 %v1244_v62, %v3138_v2  ;;  %v1277_v17 = vstv %s3327_s27  ;;  %v1310_v29 = vstv %s3330_s26  ;;  %v1343_v48 = vstv %s3336_s7  ;;  %s3396_s29 = sld [smem:[#allocation2 + $0x38]] }
  0xf6   :  { %v1403_v45 = vadd.f32 %v1402_v9, %v1370_v38  ;;  %v1308_v34 = vadd.f32 %v1307_v44, %v1275_v1  ;;  %v1278_v47 = vmul.f32 %v1277_v17, %v3143_v14  ;;  %v1406_v40 = vmul.f32 %v1405_v24, %v3205_v51  ;;  %v3404_v9 = vpop.permute.xlu0 %713  ;;  %s3703_s16 = sld [smem:[#allocation5_spill]] }
  0xf7   :  { %v1438_v58 = vstv %s3309_s2  ;;  %v1246_v20 = vadd.f32 %v1245_v18, %v1213_v22  ;;  %v1311_v39 = vmul.f32 %v1310_v29, %v3161_v19  ;;  %v1376_v41 = vstv %s3343_s19  ;;  %s3704_s13 = sld [smem:[#allocation7_spill]] }
  0xf8   :  { %v1436_v13 = vadd.f32 %v1435_v6, %v1403_v45  ;;  %v1341_v10 = vadd.f32 %v1340_v59, %v1308_v34  ;;  %v1409_v0 = vstv %s3351_s20  ;;  %v1344_v35 = vmul.f32 %v1343_v48, %v3170_v60  ;;  %s1543_s27 = sld [smem:[#allocation2 + $0x40]] }
  0xf9   :  { %v1279_v3 = vadd.f32 %v1278_v47, %v1246_v20  ;;  %v1439_v55 = vmul.f32 %v1438_v58, %v3216_v37  ;;  %v1442_v53 = vstv %s3355_s28  ;;  %v1377_v11 = vmul.f32 %v1376_v41, %v3175_v27  ;;  %s1551_s26 = sld [smem:[#allocation2 + $0x48]] }
  0xfa   :  { %1453 = vrot.lane.b32.xlu0 %v1436_v13, %s3696_s22  ;;  %v1374_v32 = vadd.f32 %v1373_v57, %v1341_v10  ;;  %v1410_v46 = vmul.f32 %v1409_v0, %v3205_v51  ;;  %v90_v12 = vstv %s3362_s23  ;;  %v38_v6 = vstv %s3359_s8  ;;  %v3441_v10 = vpop.permute.xlu1 %719  ;;  %s1559_s7 = sld [smem:[#allocation2 + $0x50]] }
  0xfb   :  { %v1312_v44 = vadd.f32 %v1311_v39, %v1279_v3  ;;  %v174_v62 = vstv %s3368_s3  ;;  %v1443_v1 = vmul.f32 %v1442_v53, %v3216_v37  ;;  %v3419_v57 = vstv %s3375_s0  ;;  %s3587_s18 = sld [smem:[#allocation2 + $0x58]] }
  0xfc   :  { %v1407_v56 = vadd.f32 %v1406_v40, %v1374_v32  ;;  %v1701_v59 = vld [vmem:[%s3703_s16 + $0x11] sm:$0xff]  ;;  %v3426_v45 = vstv %s3383_s17  ;;  %v3436_v20 = vstv %s3387_s14  ;;  %v1706_v39 = vld [vmem:[%s3703_s16 + $0x1] sm:$0xff]  ;;  %s3705_s20 = sld [smem:[#allocation6_spill]] }
  0xfd   :  { %v93_v49 = vmul.f32 %v1701_v59, %v90_v12  ;;  %v1345_v38 = vadd.f32 %v1344_v35, %v1312_v44  ;;  %v1702_v24 = vld [vmem:[%s3703_s16 + $0x12] sm:$0xff]  ;;  %v91_v13 = vmul.f32 %v1706_v39, %v90_v12  ;;  %v3449_v3 = vstv %s3392_s24  ;;  %v1708_v44 = vld [vmem:[%s3703_s16 + $0x2] sm:$0xff]  ;;  %s3597_s23 = sld [smem:[#allocation2 + $0x60]] }
  0xfe   :  { %v177_v22 = vmul.f32 %v1702_v24, %v174_v62  ;;  %v1440_v18 = vadd.f32 %v1439_v55, %v1407_v56  ;;  %v1703_v17 = vld [vmem:[%s3703_s16 + $0x13] sm:$0xff]  ;;  %v3452_v35 = vstv %s3396_s29  ;;  %v3454_v55 = vpop.permute.xlu0 %717  ;;  %v1709_v56 = vld [vmem:[%s3703_s16] sm:$0xff]  ;;  %s3609_s29 = sld [smem:[#allocation2 + $0x68]] }
  0xff   :  { %v261_v29 = vmul.f32 %v1703_v17, %v3419_v57  ;;  %v1704_v34 = vld [vmem:[%s3703_s16 + $0x10] sm:$0xff]  ;;  %v1378_v48 = vadd.f32 %v1377_v11, %v1345_v38  ;;  %v175_v11 = vmul.f32 %v1708_v44, %v174_v62  ;;  %v39_v59 = vmul.f32 %v1709_v56, %v38_v6  ;;  %v1710_v38 = vld [vmem:[%s3703_s16 + $0x18] sm:$0xff]  ;;  %s3618_s4 = sld [smem:[#allocation2 + $0x70]] }
 0x100   :  { %v41_v47 = vmul.f32 %v1704_v34, %v38_v6  ;;  %v1705_v40 = vld [vmem:[%s3703_s16 + $0x14] sm:$0xff]  ;;  %1455 = vrot.lane.b32.xlu1 %v1440_v18, %s3697_s6  ;;  %v42_v24 = vmul.f32 %v1710_v38, %v38_v6  ;;  %v1716_v38 = vld [vmem:[%s3703_s16 + $0x4] sm:$0xff]  ;;  %s1599_s15 = sld [smem:[#allocation2 + $0x78]] }
 0x101   :  { %v345_v58 = vmul.f32 %v1705_v40, %v3426_v45  ;;  %v1707_v41 = vld [vmem:[%s3703_s16 + $0x15] sm:$0xff]  ;;  %v1411_v53 = vadd.f32 %v1410_v46, %v1378_v48  ;;  %v95_v44 = vadd.f32 %v91_v13, %v39_v59  ;;  %v1719_v59 = vld [vmem:[%s3703_s16 + $0x9] sm:$0xff]  ;;  %s1607_s10 = sld [smem:[#allocation2 + $0x80]] }
 0x102   :  { %v429_v0 = vmul.f32 %v1707_v41, %v3436_v20  ;;  %v97_v32 = vadd.f32 %v93_v49, %v41_v47  ;;  %v1711_v49 = vld [vmem:[%s3703_s16 + $0x16] sm:$0xff]  ;;  %s1615_s0 = sld [smem:[#allocation2 + $0x88]] }
 0x103   :  { %v513_v46 = vmul.f32 %v1711_v49, %v3449_v3  ;;  %v1712_v17 = vld [vmem:[%s3703_s16 + $0x19] sm:$0xff]  ;;  %v1444_v40 = vadd.f32 %v1443_v1, %v1411_v53  ;;  %v343_v1 = vmul.f32 %v1716_v38, %v3426_v45  ;;  %s3706_s14 = sld [smem:[#allocation8_spill]] }
 0x104   :  { %v181_v18 = vadd.f32 %v177_v22, %v97_v32  ;;  %v94_v34 = vmul.f32 %v1712_v17, %v90_v12  ;;  %v1713_v47 = vld [vmem:[%s3703_s16 + $0x1a] sm:$0xff]  ;;  %v1715_v22 = vld [vmem:[%s3703_s16 + $0x3] sm:$0xff]  ;;  %s1623_s24 = sld [smem:[#allocation2 + $0x90]] }
 0x105   :  { %v178_v48 = vmul.f32 %v1713_v47, %v174_v62  ;;  %v1714_v39 = vld [vmem:[%s3703_s16 + $0x17] sm:$0xff]  ;;  %v259_v32 = vmul.f32 %v1715_v22, %v3419_v57  ;;  %1457 = vrot.lane.b32.xlu0 %v1444_v40, %s3698_s21  ;;  %v179_v47 = vadd.f32 %v175_v11, %v95_v44  ;;  %v1721_v11 = vld [vmem:[%s3703_s16 + $0x5] sm:$0xff]  ;;  %s1639_s22 = sld [smem:[#allocation2 + $0xa0]] }
 0x106   :  { %v597_v41 = vmul.f32 %v1714_v39, %v3452_v35  ;;  %v265_v56 = vadd.f32 %v261_v29, %v181_v18  ;;  %v98_v53 = vadd.f32 %v94_v34, %v42_v24  ;;  %v1717_v49 = vld [vmem:[%s3703_s16 + $0x1b] sm:$0xff]  ;;  %v1718_v29 = vld [vmem:[%s3703_s16 + $0x8] sm:$0xff]  ;;  %v92_v18 = vmul.f32 %v1719_v59, %v90_v12  ;;  %v724_v39 = vpop.permute.xlu1 %723  ;;  %s1647_s25 = sld [smem:[#allocation2 + $0xa8]] }
 0x107   :  { %v262_v17 = vmul.f32 %v1717_v49, %v3419_v57  ;;  %v40_v13 = vmul.f32 %v1718_v29, %v38_v6  ;;  %v1720_v24 = vld [vmem:[%s3703_s16 + $0xa] sm:$0xff]  ;;  %v427_v40 = vmul.f32 %v1721_v11, %v3436_v20  ;;  %v1722_v6 = vld [vmem:[%s3703_s16 + $0x1c] sm:$0xff]  ;;  %v722_v38 = vpop.permute.xlu0 %721  ;;  %s3707_s12 = sld [smem:[#allocation9_spill]] }
 0x108   :  { %v176_v34 = vmul.f32 %v1720_v24, %v174_v62  ;;  %v349_v22 = vadd.f32 %v345_v58, %v265_v56  ;;  %v182_v44 = vadd.f32 %v178_v48, %v98_v53  ;;  %v346_v12 = vmul.f32 %v1722_v6, %v3426_v45  ;;  %v1723_v62 = vld [vmem:[%s3703_s16 + $0x6] sm:$0xff]  ;;  %v1726_v6 = vld [vmem:[%s3703_s16 + $0x1d] sm:$0xff] }
 0x109   :  { %v511_v58 = vmul.f32 %v1723_v62, %v3449_v3  ;;  %v263_v56 = vadd.f32 %v259_v32, %v179_v47  ;;  %v96_v49 = vadd.f32 %v92_v18, %v40_v13  ;;  %v1724_v29 = vld [vmem:[%s3703_s16 + $0xb] sm:$0xff]  ;;  %v430_v32 = vmul.f32 %v1726_v6, %v3436_v20  ;;  %v1727_v13 = vld [vmem:[%s3703_s16 + $0x1e] sm:$0xff] }
 0x10a   :  { %v260_v48 = vmul.f32 %v1724_v29, %v3419_v57  ;;  %v433_v53 = vadd.f32 %v429_v0, %v349_v22  ;;  %v1725_v59 = vld [vmem:[%s3703_s16 + $0x7] sm:$0xff]  ;;  %v266_v11 = vadd.f32 %v262_v17, %v182_v44  ;;  %v514_v57 = vmul.f32 %v1727_v13, %v3449_v3  ;;  %v1729_v62 = vld [vmem:[%s3703_s16 + $0x1f] sm:$0xff] }
 0x10b   :  { %v595_v24 = vmul.f32 %v1725_v59, %v3452_v35  ;;  %v347_v47 = vadd.f32 %v343_v1, %v263_v56  ;;  %v180_v0 = vadd.f32 %v176_v34, %v96_v49  ;;  %v1728_v18 = vld [vmem:[%s3703_s16 + $0xc] sm:$0xff]  ;;  %v598_v1 = vmul.f32 %v1729_v62, %v3452_v35  ;;  %v728_v59 = vpop.permute.xlu1 %727 }
 0x10c   :  { %v344_v17 = vmul.f32 %v1728_v18, %v3426_v45  ;;  %v517_v22 = vadd.f32 %v513_v46, %v433_v53  ;;  %v350_v44 = vadd.f32 %v346_v12, %v266_v11  ;;  %v1730_v56 = vld [vmem:[%s3703_s16 + $0xd] sm:$0xff] }
 0x10d   :  { %v428_v34 = vmul.f32 %v1730_v56, %v3436_v20  ;;  %v431_v49 = vadd.f32 %v427_v40, %v347_v47  ;;  %v264_v29 = vadd.f32 %v260_v48, %v180_v0  ;;  %v1731_v45 = vld [vmem:[%s3703_s16 + $0xe] sm:$0xff]  ;;  %v735_v20 = vadd.f32 %v3243_v36, %v3153_v52  ;;  %v726_v48 = vpop.permute.xlu0 %725 }
 0x10e   :  { %v512_v46 = vmul.f32 %v1731_v45, %v3449_v3  ;;  %v1732_v12 = vld [vmem:[%s3703_s16 + $0xf] sm:$0xff]  ;;  %v601_v11 = vadd.f32 %v597_v41, %v517_v22  ;;  %v434_v6 = vadd.f32 %v430_v32, %v350_v44  ;;  %v743_v40 = vadd.f32 %v3377_v61, %v3311_v15  ;;  %s1663_s16 = sld [smem:[#allocation2 + $0xb8]] }
 0x10f   :  { %v596_v53 = vmul.f32 %v1732_v12, %v3452_v35  ;;  %v515_v47 = vadd.f32 %v511_v58, %v431_v49  ;;  %v348_v13 = vadd.f32 %v344_v17, %v264_v29  ;;  %v745_v3 = vadd.f32 %v722_v38, %v3404_v9  ;;  %v1734_v22 = vld [vmem:[%s3705_s20 + $0x9] sm:$0xff] }
 0x110   :  { %v747_v0 = vadd.f32 %v726_v48, %v3454_v55  ;;  %v731_v18 = vadd.f32 %v3034_v28, %v601_v11  ;;  %v518_v62 = vadd.f32 %v514_v57, %v434_v6  ;;  %v733_v35 = vadd.f32 %v3200_v26, %v3106_v43  ;;  %v1735_v29 = vld [vmem:[%s3705_s20 + $0xa] sm:$0xff] }
 0x111   :  { %v748_v41 = vadd.f32 %v728_v59, %v3441_v10  ;;  %v599_v32 = vadd.f32 %v595_v24, %v515_v47  ;;  %v432_v52 = vadd.f32 %v428_v34, %v348_v13  ;;  %v741_v36 = vadd.f32 %v3345_v63, %v3277_v42  ;;  %v1738_v48 = vld [vmem:[%s3705_s20 + $0xb] sm:$0xff] }
 0x112   :  { %v751_v15 = vadd.f32 %v747_v0, %v743_v40  ;;  %v602_v61 = vadd.f32 %v598_v1, %v518_v62  ;;  %v736_v9 = vadd.f32 %v3237_v31, %v3147_v30  ;;  %v739_v38 = vadd.f32 %v735_v20, %v731_v18 }
 0x113   :  { %v744_v28 = vadd.f32 %v3370_v16, %v3304_v23  ;;  %v729_v55 = vadd.f32 %v3041_v25, %v599_v32  ;;  %v516_v58 = vadd.f32 %v512_v46, %v432_v52  ;;  %v746_v43 = vadd.f32 %v724_v39, %v3399_v4  ;;  %v1736_v46 = vld [vmem:[%s3705_s20] sm:$0xff] }
 0x114   :  { %v749_v26 = vadd.f32 %v745_v3, %v741_v36  ;;  %v732_v10 = vadd.f32 %v3066_v8, %v602_v61  ;;  %v755_v57 = vadd.f32 %v751_v15, %v739_v38  ;;  %v734_v63 = vadd.f32 %v3194_v7, %v3099_v33  ;;  %v1739_v3 = vld [vmem:[%s3705_s20 + $0x2] sm:$0xff] }
 0x115   :  { %v752_v24 = vadd.f32 %v748_v41, %v744_v28  ;;  %v600_v42 = vadd.f32 %v596_v53, %v516_v58  ;;  %v737_v17 = vadd.f32 %v733_v35, %v729_v55  ;;  %v742_v30 = vadd.f32 %v3338_v5, %v3270_v50  ;;  %v1733_v5 = vld [vmem:[%s3705_s20 + $0x8] sm:$0xff] }
 0x116   :  { %v740_v31 = vadd.f32 %v736_v9, %v732_v10  ;;  %759 = vst [vmem:[%s3704_s13 + $0x10] sm:$0xff] %v755_v57  ;;  %v764_v7 = vstv %s1543_s27  ;;  %v798_v50 = vstv %s1551_s26  ;;  %v848_v34 = vstv %s1559_s7 }
 0x117   :  { %v730_v25 = vadd.f32 %v3073_v54, %v600_v42  ;;  %v750_v23 = vadd.f32 %v746_v43, %v742_v30  ;;  %v753_v16 = vadd.f32 %v749_v26, %v737_v17  ;;  %v3585_v54 = vpop.permute.xlu1 %1147  ;;  %v766_v39 = vmul.f32 %v1733_v5, %v764_v7  ;;  %v1737_v53 = vld [vmem:[%s3705_s20 + $0x1] sm:$0xff]  ;;  %v1740_v35 = vld [vmem:[%s3705_s20 + $0xc] sm:$0xff] }
 0x118   :  { %v756_v8 = vadd.f32 %v752_v24, %v740_v31  ;;  %v800_v44 = vmul.f32 %v1734_v22, %v798_v50  ;;  %v3595_v1 = vpop.permute.xlu0 %1145  ;;  %v850_v45 = vmul.f32 %v1735_v29, %v848_v34  ;;  %v765_v12 = vmul.f32 %v1736_v46, %v764_v7  ;;  %v1741_v36 = vld [vmem:[%s3705_s20 + $0x3] sm:$0xff]  ;;  %v1742_v28 = vld [vmem:[%s3705_s20 + $0xd] sm:$0xff] }
 0x119   :  { %v738_v4 = vadd.f32 %v734_v63, %v730_v25  ;;  %757 = vst [vmem:[%s3704_s13] sm:$0xff] %v753_v16  ;;  %v799_v59 = vmul.f32 %v1737_v53, %v798_v50  ;;  %v898_v6 = vstv %s3587_s18  ;;  %v849_v0 = vmul.f32 %v1739_v3, %v848_v34  ;;  %v1743_v43 = vld [vmem:[%s3705_s20 + $0x4] sm:$0xff]  ;;  %v1744_v63 = vld [vmem:[%s3705_s20 + $0xe] sm:$0xff] }
 0x11a   :  { %760 = vst [vmem:[%s3704_s13 + $0x18] sm:$0xff] %v756_v8  ;;  %v802_v49 = vadd.f32 %v800_v44, %v766_v39  ;;  %v900_v47 = vmul.f32 %v1738_v48, %v898_v6  ;;  %v948_v18 = vstv %s3597_s23  ;;  %v899_v15 = vmul.f32 %v1741_v36, %v898_v6  ;;  %v1745_v31 = vld [vmem:[%s3705_s20 + $0x5] sm:$0xff]  ;;  %v1746_v8 = vld [vmem:[%s3705_s20 + $0xf] sm:$0xff] }
 0x11b   :  { %v754_v33 = vadd.f32 %v750_v23, %v738_v4  ;;  %v1152_v56 = vpop.permute.xlu1 %1151  ;;  %v801_v13 = vadd.f32 %v799_v59, %v765_v12  ;;  %v950_v41 = vmul.f32 %v1740_v35, %v948_v18  ;;  %v998_v9 = vstv %s3609_s29  ;;  %v1747_v50 = vld [vmem:[%s3705_s20 + $0x6] sm:$0xff]  ;;  %s1631_s29 = sld [smem:[#allocation2 + $0x98]] }
 0x11c   :  { %v852_v40 = vadd.f32 %v850_v45, %v802_v49  ;;  %v1000_v55 = vmul.f32 %v1742_v28, %v998_v9  ;;  %v949_v26 = vmul.f32 %v1743_v43, %v948_v18  ;;  %v1048_v24 = vstv %s3618_s4  ;;  %v1748_v34 = vld [vmem:[%s3705_s20 + $0x7] sm:$0xff]  ;;  %s1655_s4 = sld [smem:[#allocation2 + $0xb0]] }
 0x11d   :  { %758 = vst [vmem:[%s3704_s13 + $0x8] sm:$0xff] %v754_v33  ;;  %v851_v52 = vadd.f32 %v849_v0, %v801_v13  ;;  %v1050_v17 = vmul.f32 %v1744_v63, %v1048_v24  ;;  %v999_v25 = vmul.f32 %v1745_v31, %v998_v9  ;;  %v1098_v23 = vstv %s1599_s15 }
 0x11e   :  { %v902_v62 = vadd.f32 %v900_v47, %v852_v40  ;;  %v1100_v4 = vmul.f32 %v1746_v8, %v1098_v23  ;;  %v1049_v5 = vmul.f32 %v1747_v50, %v1048_v24  ;;  %v1099_v49 = vmul.f32 %v1748_v34, %v1098_v23 }
 0x11f   :  { %v901_v58 = vadd.f32 %v899_v15, %v851_v52  ;;  %v1191_v35 = vstv %s1607_s10 }
 0x120   :  { %v952_v38 = vadd.f32 %v950_v41, %v902_v62  ;;  %v1216_v41 = vstv %s1615_s0 }
 0x121   :  { %v1150_v11 = vpop.permute.xlu0 %1149  ;;  %v951_v30 = vadd.f32 %v949_v26, %v901_v58  ;;  %v1282_v15 = vstv %s1631_s29  ;;  %v1348_v58 = vstv %s1647_s25 }
 0x122   :  { %v1002_v42 = vadd.f32 %v1000_v55, %v952_v38  ;;  %v1283_v9 = vmul.f32 %v1282_v15, %v3161_v19  ;;  %v1315_v38 = vstv %s1639_s22  ;;  %v1381_v26 = vstv %s1655_s4 }
 0x123   :  { %v1001_v7 = vadd.f32 %v999_v25, %v951_v30  ;;  %v1316_v55 = vmul.f32 %v1315_v38, %v3170_v60 }
 0x124   :  { %v1156_v20 = vpop.permute.xlu1 %1155  ;;  %v1052_v16 = vadd.f32 %v1050_v17, %v1002_v42  ;;  %v1414_v42 = vstv %s1663_s16 }
 0x125   :  { %v1051_v44 = vadd.f32 %v1049_v5, %v1001_v7  ;;  %v1176_v29 = vadd.f32 %v1156_v20, %v1152_v56  ;;  %v1415_v17 = vmul.f32 %v1414_v42, %v3216_v37 }
 0x126   :  { %v1102_v22 = vadd.f32 %v1100_v4, %v1052_v16 }
 0x127   :  { %v1101_v6 = vadd.f32 %v1099_v49, %v1051_v44 }
 0x128   :  { %v1174_v12 = vadd.f32 %v3585_v54, %v1102_v22 }
 0x129   :  { %v1173_v0 = vadd.f32 %v3595_v1, %v1101_v6  ;;  %v1217_v1 = vmul.f32 %v1216_v41, %v3138_v2  ;;  %v1349_v2 = vmul.f32 %v1348_v58, %v3175_v27 }
 0x12a   :  { %v1154_v32 = vpop.permute.xlu0 %1153  ;;  %v1178_v40 = vadd.f32 %v1176_v29, %v1174_v12 }
 0x12b   :  { %v1175_v47 = vadd.f32 %v1154_v32, %v1150_v11  ;;  %v1192_v11 = vmul.f32 %v1191_v35, %v3127_v21  ;;  %v1249_v32 = vstv %s1623_s24 }
 0x12c   :  { %v1250_v36 = vmul.f32 %v1249_v32, %v3143_v14 }
 0x12d   :  { %v1177_v54 = vadd.f32 %v1175_v47, %v1173_v0  ;;  %v1218_v52 = vadd.f32 %v1217_v1, %v1192_v11 }
 0x12f   :  { %v1160_v61 = vpop.permute.xlu1 %1159 }
 0x133   :  { %v1158_v10 = vpop.permute.xlu0 %1157 }
 0x138   :  { %v1164_v57 = vpop.permute.xlu1 %1163 }
 0x139   :  { %v1180_v53 = vadd.f32 %v1164_v57, %v1160_v61  ;;  %v1251_v61 = vadd.f32 %v1250_v36, %v1218_v52  ;;  %v1382_v57 = vmul.f32 %v1381_v26, %v3205_v51 }
 0x13b   :  { %v1284_v28 = vadd.f32 %v1283_v9, %v1251_v61 }
 0x13d   :  { %v1162_v33 = vpop.permute.xlu0 %1161  ;;  %v1317_v43 = vadd.f32 %v1316_v55, %v1284_v28 }
 0x13e   :  { %v1179_v18 = vadd.f32 %v1162_v33, %v1158_v10 }
 0x13f   :  { %v1350_v14 = vadd.f32 %v1349_v2, %v1317_v43 }
 0x141   :  { %v1168_v39 = vpop.permute.xlu1 %1167  ;;  %v1383_v19 = vadd.f32 %v1382_v57, %v1350_v14 }
 0x143   :  { %v1416_v31 = vadd.f32 %v1415_v17, %v1383_v19 }
 0x146   :  { %v1166_v45 = vpop.permute.xlu0 %1165 }
 0x14b   :  { %v1172_v46 = vpop.permute.xlu1 %1171 }
 0x14c   :  { %v1182_v59 = vadd.f32 %v1172_v46, %v1168_v39 }
 0x14e   :  { %v1184_v48 = vadd.f32 %v1182_v59, %v1180_v53 }
 0x150   :  { %v1186_v13 = vadd.f32 %v1184_v48, %v1178_v40  ;;  %v1170_v3 = vpop.permute.xlu0 %1169 }
 0x151   :  { %v1181_v62 = vadd.f32 %v1170_v3, %v1166_v45 }
 0x152   :  { %1188 = vst [vmem:[%s3706_s14 + $0x8] sm:$0xff] %v1186_v13 }
 0x153   :  { %v1183_v56 = vadd.f32 %v1181_v62, %v1179_v18 }
 0x154   :  { %v1446_v21 = vpop.permute.xlu0 %1445 }
 0x155   :  { %v1185_v20 = vadd.f32 %v1183_v56, %v1177_v54  ;;  %v1459_v16 = vadd.f32 %v1446_v21, %v1416_v31 }
 0x157   :  { %1187 = vst [vmem:[%s3706_s14] sm:$0xff] %v1185_v20 }
 0x15b   :  { %v1448_v10 = vpop.permute.xlu1 %1447 }
 0x161   :  { %v1450_v24 = vpop.permute.xlu0 %1449 }
 0x162   :  { %v1460_v25 = vadd.f32 %v1450_v24, %v1448_v10 }
 0x164   :  { %v1461_v27 = vadd.f32 %v1460_v25, %v1459_v16 }
 0x166   :  { %v1452_v63 = vpop.permute.xlu1 %1451 }
 0x16c   :  { %v1454_v30 = vpop.permute.xlu0 %1453 }
 0x16d   :  { %v1462_v8 = vadd.f32 %v1454_v30, %v1452_v63 }
 0x172   :  { %v1456_v60 = vpop.permute.xlu1 %1455 }
 0x177   :  { %v1458_v23 = vpop.permute.xlu0 %1457 }
 0x178   :  { %v1463_v4 = vadd.f32 %v1458_v23, %v1456_v60 }
 0x17a   :  { %v1464_v33 = vadd.f32 %v1463_v4, %v1462_v8 }
 0x17c   :  { %v1465_v7 = vadd.f32 %v1464_v33, %v1461_v27 }
 0x17e   :  { %1466 = vst [vmem:[%s3707_s12] sm:$0xff] %v1465_v7 }
 0x17f   :  { %1479 = vsyncpa [#allocation3], 1 }

</bundles_post_ra>
